<compile_context>
chip_gen: v5e
topology: v5e:2x2
jax: 0.10.0
libtpu: 0.0.40
codegen_flags: <defaults>
</compile_context>

<pallas_src>
import jax
import jax.numpy as jnp
from jax.experimental import pallas as pl
from jax.experimental.pallas import tpu as pltpu

EPS = 1e-5   # torch.nn.InstanceNorm2d default eps
K = 3        # kernel size (3x3); reflection padding = 1


def _reflect_pad_hwc(t):
    """(H, W, C) -> (H+2, W+2, C), 1-px reflection (PyTorch ReflectionPad2d(1))."""
    H, W = t.shape[0], t.shape[1]
    t = jnp.concatenate([t[1:2], t, t[H - 2:H - 1]], axis=0)
    t = jnp.concatenate([t[:, 1:2], t, t[:, W - 2:W - 1]], axis=1)
    return t


def _conv3x3(xp, w):
    """3x3 valid conv on a padded image, as 3 per-dy MXU matmuls.

    xp : (H+2, W+2, Cin) bf16 (already reflection padded)
    w  : (3, 3*Cin, Cout) bf16, rows within each dy block ordered (dx, cin)
    returns (H*W, Cout) f32
    """
    Hp, Wp, Cin = xp.shape
    H, W = Hp - 2, Wp - 2
    Cout = w.shape[-1]
    acc = jnp.zeros((H * W, Cout), jnp.float32)
    for dy in range(K):
        # dx-only im2col for this dy: (H*W, 3*Cin); the full 9*Cin buffer is
        # never materialized.
        rows = jnp.concatenate(
            [xp[dy:dy + H, dx:dx + W, :].reshape(H * W, Cin) for dx in range(K)],
            axis=1)
        acc = acc + jax.lax.dot_general(
            rows, w[dy], (((1,), (0,)), ((), ())),
            preferred_element_type=jnp.float32)
    return acc


def _instnorm_scale_shift(acc, gamma, beta):
    """Folded InstanceNorm(affine): per-channel scale/shift from an f32 conv acc.

    Two-pass (centered) variance for numerical robustness.
    acc: (H*W, Cout) f32; gamma/beta: (1, Cout) f32.
    """
    n = jnp.float32(acc.shape[0])
    mean = jnp.sum(acc, axis=0, keepdims=True) / n                 # (1, Cout)
    centered = acc - mean
    var = jnp.sum(centered * centered, axis=0, keepdims=True) / n  # biased var
    scale = jax.lax.rsqrt(var + EPS) * gamma                       # (1, Cout)
    shift = beta - mean * scale                                    # (1, Cout)
    return scale, shift


def _residual_block_kernel(x_ref, w1_ref, g1_ref, b1_ref, w2_ref, g2_ref, b2_ref,
                           o_ref):
    """Fully fused ResidualBlock for one image (grid axis = batch)."""
    x = x_ref[0]                                                   # (H, W, C) f32
    H, W, C = x.shape

    # ---- conv1 -> IN1 -> ReLU (intermediate never leaves VMEM) -------------
    xp = _reflect_pad_hwc(x.astype(jnp.bfloat16))                  # cast BEFORE pad
    acc1 = _conv3x3(xp, w1_ref[...])                               # (H*W, C) f32
    scale1, shift1 = _instnorm_scale_shift(acc1, g1_ref[...], b1_ref[...])
    h = jnp.maximum(acc1 * scale1 + shift1, 0.0).astype(jnp.bfloat16)
    h = h.reshape(H, W, C)                                         # bf16 activation

    # ---- conv2 -> IN2 -> + residual -----------------------------------------
    hp = _reflect_pad_hwc(h)
    acc2 = _conv3x3(hp, w2_ref[...])                               # (H*W, C) f32
    scale2, shift2 = _instnorm_scale_shift(acc2, g2_ref[...], b2_ref[...])
    y = (acc2 * scale2 + shift2).reshape(H, W, C)
    o_ref[0] = (y + x).astype(o_ref.dtype)


def _weight_to_dy_blocks(w):
    """PyTorch (Cout, Cin, K, K) f32 -> (K, K*Cin, Cout) bf16.

    Row within each dy block = dx*Cin + cin, matching the dx-concat in _conv3x3.
    """
    Cout, Cin, k1, k2 = w.shape
    return jnp.transpose(w.astype(jnp.float32), (2, 3, 1, 0)).reshape(
        k1, k2 * Cin, Cout).astype(jnp.bfloat16)


@jax.jit
def residual_block(x_nchw, params):
    """Forward pass of ResidualBlock.  x_nchw: (B, C, H, W) float32 -> same shape."""
    B, C, H, W = x_nchw.shape
    x = jnp.transpose(x_nchw, (0, 2, 3, 1)).astype(jnp.float32)    # NCHW -> NHWC

    w1 = _weight_to_dy_blocks(params["w1"])
    w2 = _weight_to_dy_blocks(params["w2"])
    g1 = params["gamma1"].reshape(1, C).astype(jnp.float32)
    b1 = params["beta1"].reshape(1, C).astype(jnp.float32)
    g2 = params["gamma2"].reshape(1, C).astype(jnp.float32)
    b2 = params["beta2"].reshape(1, C).astype(jnp.float32)
    # NOTE: conv biases params["b1"]/params["b2"] are mathematically exactly
    # canceled by the InstanceNorm mean subtraction that follows each conv
    # (variance unchanged), so they are intentionally not passed to the kernel.

    out = pl.pallas_call(
        _residual_block_kernel,
        out_shape=jax.ShapeDtypeStruct((B, H, W, C), jnp.float32),
        grid=(B,),
        in_specs=[
            pl.BlockSpec((1, H, W, C), lambda i: (i, 0, 0, 0)),    # x (unpadded)
            pl.BlockSpec((K, K * C, C), lambda i: (0, 0, 0)),      # w1 (per-dy blocks)
            pl.BlockSpec((1, C), lambda i: (0, 0)),                # gamma1
            pl.BlockSpec((1, C), lambda i: (0, 0)),                # beta1
            pl.BlockSpec((K, K * C, C), lambda i: (0, 0, 0)),      # w2
            pl.BlockSpec((1, C), lambda i: (0, 0)),                # gamma2
            pl.BlockSpec((1, C), lambda i: (0, 0)),                # beta2
        ],
        out_specs=pl.BlockSpec((1, H, W, C), lambda i: (i, 0, 0, 0)),
        compiler_params=pltpu.CompilerParams(
            dimension_semantics=("parallel",),
            # Below v7x's 64 MiB physical VMEM; leaves headroom for compiler
            # internal scratch.  Tiny working set at the shapes exercised here.
            vmem_limit_bytes=48 * 1024 * 1024,
        ),
    )(x, w1, g1, b1, w2, g2, b2)

    return jnp.transpose(out, (0, 3, 1, 2))                        # NHWC -> NCHW


def _init_params(key, channels, kernel_size=3):
    ks = jax.random.split(key, 8)
    fan_in = channels * kernel_size * kernel_size
    scale = 1.0 / jnp.sqrt(fan_in)
    return {
        # conv weights in PyTorch layout (Cout, Cin, K, K)
        "w1": jax.random.uniform(ks[0], (channels, channels, kernel_size, kernel_size),
                                 jnp.float32, -scale, scale),
        "b1": jax.random.uniform(ks[1], (channels,), jnp.float32, -scale, scale),
        "w2": jax.random.uniform(ks[2], (channels, channels, kernel_size, kernel_size),
                                 jnp.float32, -scale, scale),
        "b2": jax.random.uniform(ks[3], (channels,), jnp.float32, -scale, scale),
        # InstanceNorm affine params (PyTorch inits gamma=1, beta=0; perturb to exercise them)
        "gamma1": 1.0 + 0.1 * jax.random.normal(ks[4], (channels,), jnp.float32),
        "beta1": 0.1 * jax.random.normal(ks[5], (channels,), jnp.float32),
        "gamma2": 1.0 + 0.1 * jax.random.normal(ks[6], (channels,), jnp.float32),
        "beta2": 0.1 * jax.random.normal(ks[7], (channels,), jnp.float32),
    }


if __name__ == "__main__":
    key = jax.random.PRNGKey(0)
    k_x, k_p = jax.random.split(key)

    B, C, H, W = 2, 4, 16, 16
    x = jax.random.normal(k_x, (B, C, H, W), jnp.float32)
    params = _init_params(k_p, C, kernel_size=3)

    out = residual_block(x, params)
    jax.block_until_ready(out)
    assert out.shape == (B, C, H, W), out.shape
    assert bool(jnp.all(jnp.isfinite(out))), "non-finite values in output"
    print("KERNEL_OK")
</pallas_src>

<mosaic_0001>
module attributes {stable_mosaic.version = 11 : i64} {
  func.func @_residual_block_kernel(%arg0: i32, %arg1: memref<1x16x16x4xf32, #tpu.memory_space<vmem>>, %arg2: memref<3x12x4xbf16, #tpu.memory_space<vmem>>, %arg3: memref<1x4xf32, #tpu.memory_space<vmem>>, %arg4: memref<1x4xf32, #tpu.memory_space<vmem>>, %arg5: memref<3x12x4xbf16, #tpu.memory_space<vmem>>, %arg6: memref<1x4xf32, #tpu.memory_space<vmem>>, %arg7: memref<1x4xf32, #tpu.memory_space<vmem>>, %arg8: memref<1x16x16x4xf32, #tpu.memory_space<vmem>>) attributes {dimension_semantics = [#tpu.dimension_semantics<parallel>], iteration_bounds = array<i64: 2>, scalar_prefetch = 0 : i64, scratch_operands = 0 : i64, tpu.core_type = #tpu.core_type<tc>, window_params = [{transform_indices = @transform_0, window_bounds = array<i64: 1, 16, 16, 4>}, {pipeline_mode = #tpu.pipeline_mode<synchronous>, transform_indices = @transform_1, window_bounds = array<i64: 3, 12, 4>}, {pipeline_mode = #tpu.pipeline_mode<synchronous>, transform_indices = @transform_2, window_bounds = array<i64: 1, 4>}, {pipeline_mode = #tpu.pipeline_mode<synchronous>, transform_indices = @transform_3, window_bounds = array<i64: 1, 4>}, {pipeline_mode = #tpu.pipeline_mode<synchronous>, transform_indices = @transform_4, window_bounds = array<i64: 3, 12, 4>}, {pipeline_mode = #tpu.pipeline_mode<synchronous>, transform_indices = @transform_5, window_bounds = array<i64: 1, 4>}, {pipeline_mode = #tpu.pipeline_mode<synchronous>, transform_indices = @transform_6, window_bounds = array<i64: 1, 4>}, {transform_indices = @transform_7, window_bounds = array<i64: 1, 16, 16, 4>}]} {
    %c0 = arith.constant 0 : index
    %c0_0 = arith.constant 0 : index
    %c0_1 = arith.constant 0 : index
    %c0_2 = arith.constant 0 : index
    %0 = vector.load %arg1[%c0, %c0_0, %c0_1, %c0_2] : memref<1x16x16x4xf32, #tpu.memory_space<vmem>>, vector<1x16x16x4xf32>
    %1 = vector.shape_cast %0 : vector<1x16x16x4xf32> to vector<16x16x4xf32>
    %2 = arith.truncf %1 : vector<16x16x4xf32> to vector<16x16x4xbf16>
    %3 = vector.extract_strided_slice %2 {offsets = [1, 0, 0], sizes = [1, 16, 4], strides = [1, 1, 1]} : vector<16x16x4xbf16> to vector<1x16x4xbf16>
    %4 = vector.extract_strided_slice %2 {offsets = [14, 0, 0], sizes = [1, 16, 4], strides = [1, 1, 1]} : vector<16x16x4xbf16> to vector<1x16x4xbf16>
    %5 = tpu.concatenate %3, %2, %4 in 0 : vector<1x16x4xbf16>, vector<16x16x4xbf16>, vector<1x16x4xbf16> -> vector<18x16x4xbf16>
    %6 = vector.extract_strided_slice %5 {offsets = [0, 1, 0], sizes = [18, 1, 4], strides = [1, 1, 1]} : vector<18x16x4xbf16> to vector<18x1x4xbf16>
    %7 = vector.extract_strided_slice %5 {offsets = [0, 14, 0], sizes = [18, 1, 4], strides = [1, 1, 1]} : vector<18x16x4xbf16> to vector<18x1x4xbf16>
    %8 = tpu.concatenate %6, %5, %7 in 1 : vector<18x1x4xbf16>, vector<18x16x4xbf16>, vector<18x1x4xbf16> -> vector<18x18x4xbf16>
    %c0_3 = arith.constant 0 : index
    %c0_4 = arith.constant 0 : index
    %c0_5 = arith.constant 0 : index
    %9 = vector.load %arg2[%c0_3, %c0_4, %c0_5] : memref<3x12x4xbf16, #tpu.memory_space<vmem>>, vector<3x12x4xbf16>
    %cst = arith.constant 0.000000e+00 : f32
    %10 = vector.broadcast %cst : f32 to vector<256x4xf32>
    %11 = vector.extract_strided_slice %8 {offsets = [0, 0, 0], sizes = [16, 16, 4], strides = [1, 1, 1]} : vector<18x18x4xbf16> to vector<16x16x4xbf16>
    %12 = vector.shape_cast %11 : vector<16x16x4xbf16> to vector<256x4xbf16>
    %13 = vector.extract_strided_slice %8 {offsets = [0, 1, 0], sizes = [16, 16, 4], strides = [1, 1, 1]} : vector<18x18x4xbf16> to vector<16x16x4xbf16>
    %14 = vector.shape_cast %13 : vector<16x16x4xbf16> to vector<256x4xbf16>
    %15 = vector.extract_strided_slice %8 {offsets = [0, 2, 0], sizes = [16, 16, 4], strides = [1, 1, 1]} : vector<18x18x4xbf16> to vector<16x16x4xbf16>
    %16 = vector.shape_cast %15 : vector<16x16x4xbf16> to vector<256x4xbf16>
    %17 = tpu.concatenate %12, %14, %16 in 1 : vector<256x4xbf16>, vector<256x4xbf16>, vector<256x4xbf16> -> vector<256x12xbf16>
    %18 = vector.extract_strided_slice %9 {offsets = [0, 0, 0], sizes = [1, 12, 4], strides = [1, 1, 1]} : vector<3x12x4xbf16> to vector<1x12x4xbf16>
    %19 = vector.shape_cast %18 : vector<1x12x4xbf16> to vector<12x4xbf16>
    %cst_6 = arith.constant dense<0.000000e+00> : vector<256x4xf32>
    %20 = tpu.matmul %17, %19, %cst_6 {dimension_numbers = #tpu.dot_dimension_numbers<[1], [0], [0], [1], [0, 0, 1, 1], [], []>} : vector<256x12xbf16>, vector<12x4xbf16>, vector<256x4xf32> -> vector<256x4xf32>
    %21 = arith.addf %10, %20 : vector<256x4xf32>
    %22 = vector.extract_strided_slice %8 {offsets = [1, 0, 0], sizes = [16, 16, 4], strides = [1, 1, 1]} : vector<18x18x4xbf16> to vector<16x16x4xbf16>
    %23 = vector.shape_cast %22 : vector<16x16x4xbf16> to vector<256x4xbf16>
    %24 = vector.extract_strided_slice %8 {offsets = [1, 1, 0], sizes = [16, 16, 4], strides = [1, 1, 1]} : vector<18x18x4xbf16> to vector<16x16x4xbf16>
    %25 = vector.shape_cast %24 : vector<16x16x4xbf16> to vector<256x4xbf16>
    %26 = vector.extract_strided_slice %8 {offsets = [1, 2, 0], sizes = [16, 16, 4], strides = [1, 1, 1]} : vector<18x18x4xbf16> to vector<16x16x4xbf16>
    %27 = vector.shape_cast %26 : vector<16x16x4xbf16> to vector<256x4xbf16>
    %28 = tpu.concatenate %23, %25, %27 in 1 : vector<256x4xbf16>, vector<256x4xbf16>, vector<256x4xbf16> -> vector<256x12xbf16>
    %29 = vector.extract_strided_slice %9 {offsets = [1, 0, 0], sizes = [1, 12, 4], strides = [1, 1, 1]} : vector<3x12x4xbf16> to vector<1x12x4xbf16>
    %30 = vector.shape_cast %29 : vector<1x12x4xbf16> to vector<12x4xbf16>
    %cst_7 = arith.constant dense<0.000000e+00> : vector<256x4xf32>
    %31 = tpu.matmul %28, %30, %cst_7 {dimension_numbers = #tpu.dot_dimension_numbers<[1], [0], [0], [1], [0, 0, 1, 1], [], []>} : vector<256x12xbf16>, vector<12x4xbf16>, vector<256x4xf32> -> vector<256x4xf32>
    %32 = arith.addf %21, %31 : vector<256x4xf32>
    %33 = vector.extract_strided_slice %8 {offsets = [2, 0, 0], sizes = [16, 16, 4], strides = [1, 1, 1]} : vector<18x18x4xbf16> to vector<16x16x4xbf16>
    %34 = vector.shape_cast %33 : vector<16x16x4xbf16> to vector<256x4xbf16>
    %35 = vector.extract_strided_slice %8 {offsets = [2, 1, 0], sizes = [16, 16, 4], strides = [1, 1, 1]} : vector<18x18x4xbf16> to vector<16x16x4xbf16>
    %36 = vector.shape_cast %35 : vector<16x16x4xbf16> to vector<256x4xbf16>
    %37 = vector.extract_strided_slice %8 {offsets = [2, 2, 0], sizes = [16, 16, 4], strides = [1, 1, 1]} : vector<18x18x4xbf16> to vector<16x16x4xbf16>
    %38 = vector.shape_cast %37 : vector<16x16x4xbf16> to vector<256x4xbf16>
    %39 = tpu.concatenate %34, %36, %38 in 1 : vector<256x4xbf16>, vector<256x4xbf16>, vector<256x4xbf16> -> vector<256x12xbf16>
    %40 = vector.extract_strided_slice %9 {offsets = [2, 0, 0], sizes = [1, 12, 4], strides = [1, 1, 1]} : vector<3x12x4xbf16> to vector<1x12x4xbf16>
    %41 = vector.shape_cast %40 : vector<1x12x4xbf16> to vector<12x4xbf16>
    %cst_8 = arith.constant dense<0.000000e+00> : vector<256x4xf32>
    %42 = tpu.matmul %39, %41, %cst_8 {dimension_numbers = #tpu.dot_dimension_numbers<[1], [0], [0], [1], [0, 0, 1, 1], [], []>} : vector<256x12xbf16>, vector<12x4xbf16>, vector<256x4xf32> -> vector<256x4xf32>
    %43 = arith.addf %32, %42 : vector<256x4xf32>
    %c0_9 = arith.constant 0 : index
    %c0_10 = arith.constant 0 : index
    %44 = vector.load %arg3[%c0_9, %c0_10] : memref<1x4xf32, #tpu.memory_space<vmem>>, vector<1x4xf32>
    %c0_11 = arith.constant 0 : index
    %c0_12 = arith.constant 0 : index
    %45 = vector.load %arg4[%c0_11, %c0_12] : memref<1x4xf32, #tpu.memory_space<vmem>>, vector<1x4xf32>
    %cst_13 = arith.constant dense<0.000000e+00> : vector<4xf32>
    %46 = vector.multi_reduction <add>, %43, %cst_13 [0] : vector<256x4xf32> to vector<4xf32>
    %47 = vector.shape_cast %46 : vector<4xf32> to vector<1x4xf32>
    %cst_14 = arith.constant 2.560000e+02 : f32
    %48 = vector.broadcast %cst_14 : f32 to vector<1x4xf32>
    %49 = arith.divf %47, %48 : vector<1x4xf32>
    %50 = vector.broadcast %49 : vector<1x4xf32> to vector<256x4xf32>
    %51 = arith.subf %43, %50 : vector<256x4xf32>
    %52 = arith.mulf %51, %51 : vector<256x4xf32>
    %cst_15 = arith.constant dense<0.000000e+00> : vector<4xf32>
    %53 = vector.multi_reduction <add>, %52, %cst_15 [0] : vector<256x4xf32> to vector<4xf32>
    %54 = vector.shape_cast %53 : vector<4xf32> to vector<1x4xf32>
    %cst_16 = arith.constant 2.560000e+02 : f32
    %55 = vector.broadcast %cst_16 : f32 to vector<1x4xf32>
    %56 = arith.divf %54, %55 : vector<1x4xf32>
    %cst_17 = arith.constant 9.99999974E-6 : f32
    %57 = vector.broadcast %cst_17 : f32 to vector<1x4xf32>
    %58 = arith.addf %56, %57 : vector<1x4xf32>
    %59 = math.rsqrt %58 : vector<1x4xf32>
    %60 = arith.mulf %59, %44 : vector<1x4xf32>
    %61 = arith.mulf %49, %60 : vector<1x4xf32>
    %62 = arith.subf %45, %61 : vector<1x4xf32>
    %63 = vector.broadcast %60 : vector<1x4xf32> to vector<256x4xf32>
    %64 = arith.mulf %43, %63 : vector<256x4xf32>
    %65 = vector.broadcast %62 : vector<1x4xf32> to vector<256x4xf32>
    %66 = arith.addf %64, %65 : vector<256x4xf32>
    %cst_18 = arith.constant 0.000000e+00 : f32
    %67 = vector.broadcast %cst_18 : f32 to vector<256x4xf32>
    %68 = arith.maximumf %66, %67 : vector<256x4xf32>
    %69 = arith.truncf %68 : vector<256x4xf32> to vector<256x4xbf16>
    %70 = vector.shape_cast %69 : vector<256x4xbf16> to vector<16x16x4xbf16>
    %71 = vector.extract_strided_slice %70 {offsets = [1, 0, 0], sizes = [1, 16, 4], strides = [1, 1, 1]} : vector<16x16x4xbf16> to vector<1x16x4xbf16>
    %72 = vector.extract_strided_slice %70 {offsets = [14, 0, 0], sizes = [1, 16, 4], strides = [1, 1, 1]} : vector<16x16x4xbf16> to vector<1x16x4xbf16>
    %73 = tpu.concatenate %71, %70, %72 in 0 : vector<1x16x4xbf16>, vector<16x16x4xbf16>, vector<1x16x4xbf16> -> vector<18x16x4xbf16>
    %74 = vector.extract_strided_slice %73 {offsets = [0, 1, 0], sizes = [18, 1, 4], strides = [1, 1, 1]} : vector<18x16x4xbf16> to vector<18x1x4xbf16>
    %75 = vector.extract_strided_slice %73 {offsets = [0, 14, 0], sizes = [18, 1, 4], strides = [1, 1, 1]} : vector<18x16x4xbf16> to vector<18x1x4xbf16>
    %76 = tpu.concatenate %74, %73, %75 in 1 : vector<18x1x4xbf16>, vector<18x16x4xbf16>, vector<18x1x4xbf16> -> vector<18x18x4xbf16>
    %c0_19 = arith.constant 0 : index
    %c0_20 = arith.constant 0 : index
    %c0_21 = arith.constant 0 : index
    %77 = vector.load %arg5[%c0_19, %c0_20, %c0_21] : memref<3x12x4xbf16, #tpu.memory_space<vmem>>, vector<3x12x4xbf16>
    %cst_22 = arith.constant 0.000000e+00 : f32
    %78 = vector.broadcast %cst_22 : f32 to vector<256x4xf32>
    %79 = vector.extract_strided_slice %76 {offsets = [0, 0, 0], sizes = [16, 16, 4], strides = [1, 1, 1]} : vector<18x18x4xbf16> to vector<16x16x4xbf16>
    %80 = vector.shape_cast %79 : vector<16x16x4xbf16> to vector<256x4xbf16>
    %81 = vector.extract_strided_slice %76 {offsets = [0, 1, 0], sizes = [16, 16, 4], strides = [1, 1, 1]} : vector<18x18x4xbf16> to vector<16x16x4xbf16>
    %82 = vector.shape_cast %81 : vector<16x16x4xbf16> to vector<256x4xbf16>
    %83 = vector.extract_strided_slice %76 {offsets = [0, 2, 0], sizes = [16, 16, 4], strides = [1, 1, 1]} : vector<18x18x4xbf16> to vector<16x16x4xbf16>
    %84 = vector.shape_cast %83 : vector<16x16x4xbf16> to vector<256x4xbf16>
    %85 = tpu.concatenate %80, %82, %84 in 1 : vector<256x4xbf16>, vector<256x4xbf16>, vector<256x4xbf16> -> vector<256x12xbf16>
    %86 = vector.extract_strided_slice %77 {offsets = [0, 0, 0], sizes = [1, 12, 4], strides = [1, 1, 1]} : vector<3x12x4xbf16> to vector<1x12x4xbf16>
    %87 = vector.shape_cast %86 : vector<1x12x4xbf16> to vector<12x4xbf16>
    %cst_23 = arith.constant dense<0.000000e+00> : vector<256x4xf32>
    %88 = tpu.matmul %85, %87, %cst_23 {dimension_numbers = #tpu.dot_dimension_numbers<[1], [0], [0], [1], [0, 0, 1, 1], [], []>} : vector<256x12xbf16>, vector<12x4xbf16>, vector<256x4xf32> -> vector<256x4xf32>
    %89 = arith.addf %78, %88 : vector<256x4xf32>
    %90 = vector.extract_strided_slice %76 {offsets = [1, 0, 0], sizes = [16, 16, 4], strides = [1, 1, 1]} : vector<18x18x4xbf16> to vector<16x16x4xbf16>
    %91 = vector.shape_cast %90 : vector<16x16x4xbf16> to vector<256x4xbf16>
    %92 = vector.extract_strided_slice %76 {offsets = [1, 1, 0], sizes = [16, 16, 4], strides = [1, 1, 1]} : vector<18x18x4xbf16> to vector<16x16x4xbf16>
    %93 = vector.shape_cast %92 : vector<16x16x4xbf16> to vector<256x4xbf16>
    %94 = vector.extract_strided_slice %76 {offsets = [1, 2, 0], sizes = [16, 16, 4], strides = [1, 1, 1]} : vector<18x18x4xbf16> to vector<16x16x4xbf16>
    %95 = vector.shape_cast %94 : vector<16x16x4xbf16> to vector<256x4xbf16>
    %96 = tpu.concatenate %91, %93, %95 in 1 : vector<256x4xbf16>, vector<256x4xbf16>, vector<256x4xbf16> -> vector<256x12xbf16>
    %97 = vector.extract_strided_slice %77 {offsets = [1, 0, 0], sizes = [1, 12, 4], strides = [1, 1, 1]} : vector<3x12x4xbf16> to vector<1x12x4xbf16>
    %98 = vector.shape_cast %97 : vector<1x12x4xbf16> to vector<12x4xbf16>
    %cst_24 = arith.constant dense<0.000000e+00> : vector<256x4xf32>
    %99 = tpu.matmul %96, %98, %cst_24 {dimension_numbers = #tpu.dot_dimension_numbers<[1], [0], [0], [1], [0, 0, 1, 1], [], []>} : vector<256x12xbf16>, vector<12x4xbf16>, vector<256x4xf32> -> vector<256x4xf32>
    %100 = arith.addf %89, %99 : vector<256x4xf32>
    %101 = vector.extract_strided_slice %76 {offsets = [2, 0, 0], sizes = [16, 16, 4], strides = [1, 1, 1]} : vector<18x18x4xbf16> to vector<16x16x4xbf16>
    %102 = vector.shape_cast %101 : vector<16x16x4xbf16> to vector<256x4xbf16>
    %103 = vector.extract_strided_slice %76 {offsets = [2, 1, 0], sizes = [16, 16, 4], strides = [1, 1, 1]} : vector<18x18x4xbf16> to vector<16x16x4xbf16>
    %104 = vector.shape_cast %103 : vector<16x16x4xbf16> to vector<256x4xbf16>
    %105 = vector.extract_strided_slice %76 {offsets = [2, 2, 0], sizes = [16, 16, 4], strides = [1, 1, 1]} : vector<18x18x4xbf16> to vector<16x16x4xbf16>
    %106 = vector.shape_cast %105 : vector<16x16x4xbf16> to vector<256x4xbf16>
    %107 = tpu.concatenate %102, %104, %106 in 1 : vector<256x4xbf16>, vector<256x4xbf16>, vector<256x4xbf16> -> vector<256x12xbf16>
    %108 = vector.extract_strided_slice %77 {offsets = [2, 0, 0], sizes = [1, 12, 4], strides = [1, 1, 1]} : vector<3x12x4xbf16> to vector<1x12x4xbf16>
    %109 = vector.shape_cast %108 : vector<1x12x4xbf16> to vector<12x4xbf16>
    %cst_25 = arith.constant dense<0.000000e+00> : vector<256x4xf32>
    %110 = tpu.matmul %107, %109, %cst_25 {dimension_numbers = #tpu.dot_dimension_numbers<[1], [0], [0], [1], [0, 0, 1, 1], [], []>} : vector<256x12xbf16>, vector<12x4xbf16>, vector<256x4xf32> -> vector<256x4xf32>
    %111 = arith.addf %100, %110 : vector<256x4xf32>
    %c0_26 = arith.constant 0 : index
    %c0_27 = arith.constant 0 : index
    %112 = vector.load %arg6[%c0_26, %c0_27] : memref<1x4xf32, #tpu.memory_space<vmem>>, vector<1x4xf32>
    %c0_28 = arith.constant 0 : index
    %c0_29 = arith.constant 0 : index
    %113 = vector.load %arg7[%c0_28, %c0_29] : memref<1x4xf32, #tpu.memory_space<vmem>>, vector<1x4xf32>
    %cst_30 = arith.constant dense<0.000000e+00> : vector<4xf32>
    %114 = vector.multi_reduction <add>, %111, %cst_30 [0] : vector<256x4xf32> to vector<4xf32>
    %115 = vector.shape_cast %114 : vector<4xf32> to vector<1x4xf32>
    %cst_31 = arith.constant 2.560000e+02 : f32
    %116 = vector.broadcast %cst_31 : f32 to vector<1x4xf32>
    %117 = arith.divf %115, %116 : vector<1x4xf32>
    %118 = vector.broadcast %117 : vector<1x4xf32> to vector<256x4xf32>
    %119 = arith.subf %111, %118 : vector<256x4xf32>
    %120 = arith.mulf %119, %119 : vector<256x4xf32>
    %cst_32 = arith.constant dense<0.000000e+00> : vector<4xf32>
    %121 = vector.multi_reduction <add>, %120, %cst_32 [0] : vector<256x4xf32> to vector<4xf32>
    %122 = vector.shape_cast %121 : vector<4xf32> to vector<1x4xf32>
    %cst_33 = arith.constant 2.560000e+02 : f32
    %123 = vector.broadcast %cst_33 : f32 to vector<1x4xf32>
    %124 = arith.divf %122, %123 : vector<1x4xf32>
    %cst_34 = arith.constant 9.99999974E-6 : f32
    %125 = vector.broadcast %cst_34 : f32 to vector<1x4xf32>
    %126 = arith.addf %124, %125 : vector<1x4xf32>
    %127 = math.rsqrt %126 : vector<1x4xf32>
    %128 = arith.mulf %127, %112 : vector<1x4xf32>
    %129 = arith.mulf %117, %128 : vector<1x4xf32>
    %130 = arith.subf %113, %129 : vector<1x4xf32>
    %131 = vector.broadcast %128 : vector<1x4xf32> to vector<256x4xf32>
    %132 = arith.mulf %111, %131 : vector<256x4xf32>
    %133 = vector.broadcast %130 : vector<1x4xf32> to vector<256x4xf32>
    %134 = arith.addf %132, %133 : vector<256x4xf32>
    %135 = vector.shape_cast %134 : vector<256x4xf32> to vector<16x16x4xf32>
    %136 = arith.addf %135, %1 : vector<16x16x4xf32>
    %c0_35 = arith.constant 0 : index
    %c0_36 = arith.constant 0 : index
    %c0_37 = arith.constant 0 : index
    %c0_38 = arith.constant 0 : index
    %137 = vector.load %arg8[%c0_35, %c0_36, %c0_37, %c0_38] : memref<1x16x16x4xf32, #tpu.memory_space<vmem>>, vector<1x16x16x4xf32>
    %138 = vector.shape_cast %137 : vector<1x16x16x4xf32> to vector<16x16x4xf32>
    %139 = vector.shape_cast %136 : vector<16x16x4xf32> to vector<1x16x16x4xf32>
    tpu.vector_store %arg8[%c0_35, %c0_36, %c0_37, %c0_38], %139 {strides = array<i32>} : memref<1x16x16x4xf32, #tpu.memory_space<vmem>>, vector<1x16x16x4xf32>,
    return
  }
  func.func @transform_0(%arg0: i32) -> (i32, i32, i32, i32) {
    %c0_i32 = arith.constant 0 : i32
    %c0_i32_0 = arith.constant 0 : i32
    %c0_i32_1 = arith.constant 0 : i32
    %c0_i32_2 = arith.constant 0 : i32
    return %arg0, %c0_i32, %c0_i32_0, %c0_i32_1 : i32, i32, i32, i32
  }
  func.func @transform_1(%arg0: i32) -> (i32, i32, i32) {
    %c0_i32 = arith.constant 0 : i32
    %c0_i32_0 = arith.constant 0 : i32
    %c0_i32_1 = arith.constant 0 : i32
    %c0_i32_2 = arith.constant 0 : i32
    return %c0_i32, %c0_i32_0, %c0_i32_1 : i32, i32, i32
  }
  func.func @transform_2(%arg0: i32) -> (i32, i32) {
    %c0_i32 = arith.constant 0 : i32
    %c0_i32_0 = arith.constant 0 : i32
    %c0_i32_1 = arith.constant 0 : i32
    return %c0_i32, %c0_i32_0 : i32, i32
  }
  func.func @transform_3(%arg0: i32) -> (i32, i32) {
    %c0_i32 = arith.constant 0 : i32
    %c0_i32_0 = arith.constant 0 : i32
    %c0_i32_1 = arith.constant 0 : i32
    return %c0_i32, %c0_i32_0 : i32, i32
  }
  func.func @transform_4(%arg0: i32) -> (i32, i32, i32) {
    %c0_i32 = arith.constant 0 : i32
    %c0_i32_0 = arith.constant 0 : i32
    %c0_i32_1 = arith.constant 0 : i32
    %c0_i32_2 = arith.constant 0 : i32
    return %c0_i32, %c0_i32_0, %c0_i32_1 : i32, i32, i32
  }
  func.func @transform_5(%arg0: i32) -> (i32, i32) {
    %c0_i32 = arith.constant 0 : i32
    %c0_i32_0 = arith.constant 0 : i32
    %c0_i32_1 = arith.constant 0 : i32
    return %c0_i32, %c0_i32_0 : i32, i32
  }
  func.func @transform_6(%arg0: i32) -> (i32, i32) {
    %c0_i32 = arith.constant 0 : i32
    %c0_i32_0 = arith.constant 0 : i32
    %c0_i32_1 = arith.constant 0 : i32
    return %c0_i32, %c0_i32_0 : i32, i32
  }
  func.func @transform_7(%arg0: i32) -> (i32, i32, i32, i32) {
    %c0_i32 = arith.constant 0 : i32
    %c0_i32_0 = arith.constant 0 : i32
    %c0_i32_1 = arith.constant 0 : i32
    %c0_i32_2 = arith.constant 0 : i32
    return %arg0, %c0_i32, %c0_i32_0, %c0_i32_1 : i32, i32, i32, i32
  }
}

</mosaic_0001>

<bundles_post_ra>
// kernel: residual_block.1
= control target key start
LH: loop header
LB: loop body
LE: loop exit
PB: predicated region body
PF: predicated region fallthrough
CT: control target
= control target key end

     0   :  { %s3746_s24 = smov 0   ;;  %s5764_s0 = inlined_call_operand.vmem [shape: f32[2,16,16,4], index: 0, kind: input, shape index: {}]   ;;  %s5765_s1 = inlined_call_operand.vmem [shape: bf16[3,12,4], index: 1, kind: input, shape index: {}]   ;;  %s5766_s2 = inlined_call_operand.vmem [shape: f32[1,4], index: 2, kind: input, shape index: {}]   ;;  %s5767_s3 = inlined_call_operand.vmem [shape: f32[1,4], index: 3, kind: input, shape index: {}]   ;;  %s5768_s4 = inlined_call_operand.vmem [shape: bf16[3,12,4], index: 4, kind: input, shape index: {}]   ;;  %s5769_s5 = inlined_call_operand.vmem [shape: f32[1,4], index: 5, kind: input, shape index: {}]   ;;  %s5770_s6 = inlined_call_operand.vmem [shape: f32[1,4], index: 6, kind: input, shape index: {}]   ;;  %s5771_s7 = inlined_call_operand.vmem [shape: f32[2,16,16,4], index: 7, kind: output, shape index: {}]  }
   0x1 LB: > { %s3505_s25 = sadd.s32 4294967295, %s3701_s24   ;;  %p3509_p0 = scmp.ge.s32.totalorder %s3701_s24, 1  ;;  %s3701_s24 = sphi %s3746_s24, %s17_s24  }
   0x2   : > { %p237_p1 = scmp.lt.s32.totalorder %s3701_s24, 3 }
   0x4   : > { %p238_p2 = pnand %p3509_p0, %p237_p1 }
   0x6   : > { %241 = sbr.rel (%p238_p2) target bundleno = 1522 (0x5f2), region = 48 }
   0xb   : > { %p269_p3 = scmp.lt.s32.totalorder %s3505_s25, 1  ;;  %vm744_vm0 = vcmask 1040384   ;;  %vm745_vm1 = vsmask.f32 256  ;;  %vm996_vm2 = vcmask 1046528   ;;  %v5782_v42 = vmov 0 }
   0xc   : > { %vm785_vm3 = vsmask.f32 7424  ;;  %vm3778_vm4 = vmand %vm744_vm0, %vm745_vm1  ;;  %s3703_s30 = smov 4   ;;  %s3704_s8 = smov 8   ;;  %vm1227_vm5 = vcmask 1045504   ;;  %vm1102_vm6 = vcmask 31744  }
   0xd   : > { %s5828_s25 = smov (!%p269_p3, %s3505_s25), 1  ;;  %v5783_v42 = vsel %vm3778_vm4, 4294967295, %v5782_v42  ;;  %vm1133_vm7 = vcmask 64512   ;;  %vm1194_vm8 = vcmask 97280  }
   0xe   : > { %s3636_s26 = sshll.u32 %s5828_s25, 8  ;;  %5784 = vst [vmem:[#allocation2_spill] sm:$0xff] %v5783_v42 }
   0xf   : > { %s3762_s29 = scalar_lea.vmem %s5764_s0, %s3636_s26  ;;  %s5586_s27 = scalar_lea.vmem %s5771_s7, %s3636_s26 }
  0x10   : > { %v298_v0 = vld [vmem:[%s3762_s29 + $0x90] sm:$0xff]  ;;  %v299_v1 = vld [vmem:[%s3762_s29 + $0x98] sm:$0xff]  ;;  %v296_v2 = vld [vmem:[%s3762_s29 + $0x80] sm:$0xff] }
  0x11   : > { %v330_v3 = vpack.c.bf16 %v298_v0, %v298_v0  ;;  %v331_v4 = vpack.c.bf16 %v299_v1, %v299_v1  ;;  %v297_v5 = vld [vmem:[%s3762_s29 + $0x88] sm:$0xff]  ;;  %v328_v6 = vpack.c.bf16 %v296_v2, %v296_v2  ;;  %v302_v7 = vld [vmem:[%s3762_s29 + $0xb0] sm:$0xff]  ;;  %v303_v8 = vld [vmem:[%s3762_s29 + $0xb8] sm:$0xff] }
  0x12   : > { %v329_v9 = vpack.c.bf16 %v297_v5, %v297_v5  ;;  %v334_v10 = vpack.c.bf16 %v302_v7, %v302_v7  ;;  %v335_v11 = vpack.c.bf16 %v303_v8, %v303_v8  ;;  %v306_v12 = vld [vmem:[%s3762_s29 + $0xd0] sm:$0xff]  ;;  %v3772_v13 = vld [vmem:[%s3762_s29 + $0xd8] sm:$0xff]  ;;  %v300_v7 = vld [vmem:[%s3762_s29 + $0xa0] sm:$0xff] }
  0x13   : > { %v369_v14 = vunpack.c.l.b16 %v330_v3  ;;  %v481_v15 = vunpack.c.l.b16 %v331_v4  ;;  %v368_v16 = vunpack.c.l.b16 %v328_v6  ;;  %v338_v17 = vpack.c.bf16 %v306_v12, %v306_v12  ;;  %v301_v8 = vld [vmem:[%s3762_s29 + $0xa8] sm:$0xff] }
  0x14   : > { %v480_v18 = vunpack.c.l.b16 %v329_v9  ;;  %v371_v19 = vunpack.c.l.b16 %v334_v10  ;;  %v483_v20 = vunpack.c.l.b16 %v335_v11  ;;  %v339_v21 = vpack.c.bf16 %v3772_v13, %v3772_v13 }
  0x15   : > { %v385_v22 = vpack.c.b16 %v369_v14, %v369_v14  ;;  %v497_v23 = vpack.c.b16 %v481_v15, %v369_v14  ;;  %v657_v24 = vpack.c.b16 %v481_v15, %v481_v15  ;;  %v384_v25 = vpack.c.b16 %v368_v16, %v368_v16 }
  0x16   : > { %v496_v26 = vpack.c.b16 %v480_v18, %v368_v16  ;;  %v656_v27 = vpack.c.b16 %v480_v18, %v480_v18  ;;  %v387_v28 = vpack.c.b16 %v371_v19, %v371_v19  ;;  %v499_v29 = vpack.c.b16 %v483_v20, %v371_v19 }
  0x17   : > { %v420_v30 = vshrl.u32 %v385_v22, 16  ;;  %v568_v31 = vshrl.u32 %v497_v23, 16  ;;  %v571_v32 = vshll.u32 %v497_v23, 16  ;;  %v701_v33 = vshll.u32 %v657_v24, 16 }
  0x18   : > { %v417_v34 = vshrl.u32 %v384_v25, 16  ;;  %v561_v35 = vshrl.u32 %v496_v26, 16  ;;  %v564_v36 = vshll.u32 %v496_v26, 16  ;;  %v697_v37 = vshll.u32 %v656_v27, 16 }
  0x19   : > { %v570_v38 = vrot.slane %v568_v31, 7  ;;  %v703_v39 = vrot.slane %v701_v33, 3  ;;  %v426_v40 = vshrl.u32 %v387_v28, 16  ;;  %v582_v41 = vshrl.u32 %v499_v29, 16 }
  0x1a   : > { %v563_v43 = vrot.slane %v561_v35, 7  ;;  %v699_v44 = vrot.slane %v697_v37, 3  ;;  %v585_v45 = vshll.u32 %v499_v29, 16  ;;  %v659_v46 = vpack.c.b16 %v483_v20, %v483_v20 }
  0x1b   : > { %v573_v47 = vor.u32 %v571_v32, %v570_v38  ;;  %v772_v48 = vsel %vm3778_vm4, %v570_v38, %v703_v39  ;;  %v584_v49 = vrot.slane %v582_v41, 7  ;;  %v373_v50 = vunpack.c.l.b16 %v338_v17  ;;  %v308_v41 = vld [vmem:[%s3762_s29 + $0xe0] sm:$0xff] }
  0x1c   : > { %v902_v51 = vshll.u32 %v772_v48, 16  ;;  %v566_v52 = vor.u32 %v564_v36, %v563_v43  ;;  %v771_v53 = vsel %vm3778_vm4, %v563_v43, %v699_v44  ;;  %v1025_v54 = vrot.slane %v772_v48, 1  ;;  %v304_v48 = vld [vmem:[%s3762_s29 + $0xc0] sm:$0xff] }
  0x1d   : > { %v3788_v55 = vsel %vm3778_vm4, %v420_v30, %v573_v47  ;;  %v890_v56 = vshll.u32 %v771_v53, 16  ;;  %v1022_v57 = vrot.slane %v771_v53, 1  ;;  %v587_v58 = vor.u32 %v585_v45, %v584_v49  ;;  %v309_v47 = vld [vmem:[%s3762_s29 + $0xe8] sm:$0xff] }
  0x1e   : > { %v895_v59 = vshrl.u32 %v3788_v55, 16  ;;  %v897_v60 = vshll.u32 %v3788_v55, 16  ;;  %v904_v61 = vrot.slane %v902_v51, 1  ;;  %v3794_v62 = vsel %vm3778_vm4, %v417_v34, %v566_v52 }
  0x1f   : > { %v883_v63 = vshrl.u32 %v3794_v62, 16  ;;  %v885_v0 = vshll.u32 %v3794_v62, 16  ;;  %v892_v1 = vrot.slane %v890_v56, 1  ;;  %v1024_v2 = vrot.slane %v3788_v55, 1 }
  0x20   : > { %v899_v3 = vrot.slane %v897_v60, 1  ;;  %v1021_v4 = vrot.slane %v3794_v62, 1  ;;  %v709_v5 = vshll.u32 %v659_v46, 16  ;;  %v3802_v6 = vsel %vm3778_vm4, %v426_v40, %v587_v58 }
  0x21   : > { %v887_v9 = vrot.slane %v885_v0, 1  ;;  %v1026_v10 = vsel %vm996_vm2, %v1024_v2, %v1025_v54  ;;  %v1030_v11 = vrot.slane %v3802_v6, 1  ;;  %v389_v12 = vpack.c.b16 %v373_v50, %v373_v50 }
  0x22   : > { %v900_v13 = vor.u32 %v899_v3, %v895_v59  ;;  %v1023_v14 = vsel %vm996_vm2, %v1021_v4, %v1022_v57  ;;  %v711_v15 = vrot.slane %v709_v5, 3  ;;  %v485_v16 = vunpack.c.l.b16 %v339_v21 }
  0x23   : > { %v888_v17 = vor.u32 %v887_v9, %v883_v63  ;;  %v432_v18 = vshrl.u32 %v389_v12, 16  ;;  %v332_v19 = vpack.c.bf16 %v300_v7, %v300_v7  ;;  %v333_v20 = vpack.c.bf16 %v301_v8, %v301_v8 }
  0x24   : > { %v905_v22 = vsel %vm785_vm3, %v900_v13, %v904_v61  ;;  %v774_v23 = vsel %vm3778_vm4, %v584_v49, %v711_v15  ;;  %v501_v24 = vpack.c.b16 %v485_v16, %v373_v50  ;;  %v661_v25 = vpack.c.b16 %v485_v16, %v485_v16  ;;  %v305_v16 = vld [vmem:[%s3762_s29 + $0xc8] sm:$0xff] }
  0x25   : > { %1060 = vrot.lane.b32.xlu1 %v905_v22, %s3703_s30  ;;  %v893_v26 = vsel %vm785_vm3, %v888_v17, %v892_v1  ;;  %v1031_v27 = vrot.slane %v774_v23, 1  ;;  %v370_v28 = vunpack.c.l.b16 %v332_v19  ;;  %v482_v21 = vunpack.c.l.b16 %v333_v20  ;;  %v282_v22 = vld [vmem:[%s3762_s29 + $0x10] sm:$0xff] }
  0x26   : > { %1058 = vrot.lane.b32.xlu0 %v893_v26, %s3703_s30  ;;  %v596_v29 = vshrl.u32 %v501_v24, 16  ;;  %v599_v30 = vshll.u32 %v501_v24, 16  ;;  %v717_v31 = vshll.u32 %v661_v25, 16  ;;  %v919_v32 = vshrl.u32 %v3802_v6, 16 }
  0x27   : > { %v3817_v33 = vsel %vm996_vm2, %v1030_v11, %v1031_v27  ;;  %v386_v34 = vpack.c.b16 %v370_v28, %v370_v28  ;;  %v498_v35 = vpack.c.b16 %v482_v21, %v370_v28  ;;  %v658_v36 = vpack.c.b16 %v482_v21, %v482_v21  ;;  %v283_v27 = vld [vmem:[%s3762_s29 + $0x18] sm:$0xff]  ;;  %v284_v28 = vld [vmem:[%s3762_s29 + $0x20] sm:$0xff] }
  0x28   : > { %v598_v37 = vrot.slane %v596_v29, 7  ;;  %v719_v38 = vrot.slane %v717_v31, 3  ;;  %v921_v39 = vshll.u32 %v3802_v6, 16  ;;  %v926_v40 = vshll.u32 %v774_v23, 16 }
  0x29   : > { %v423_v43 = vshrl.u32 %v386_v34, 16  ;;  %v575_v44 = vshrl.u32 %v498_v35, 16  ;;  %v578_v45 = vshll.u32 %v498_v35, 16  ;;  %v705_v46 = vshll.u32 %v658_v36, 16 }
  0x2a   : > { %v601_v49 = vor.u32 %v599_v30, %v598_v37  ;;  %v3825_v50 = vsel %vm3778_vm4, %v598_v37, %v719_v38  ;;  %v923_v51 = vrot.slane %v921_v39, 1  ;;  %v928_v52 = vrot.slane %v926_v40, 1 }
  0x2b   : > { %v950_v53 = vshll.u32 %v3825_v50, 16  ;;  %v577_v54 = vrot.slane %v575_v44, 7  ;;  %v707_v56 = vrot.slane %v705_v46, 3  ;;  %v340_v57 = vpack.c.bf16 %v308_v41, %v308_v41 }
  0x2c   : > { %v3830_v58 = vsel %vm3778_vm4, %v432_v18, %v601_v49  ;;  %v924_v59 = vor.u32 %v923_v51, %v919_v32  ;;  %v341_v60 = vpack.c.bf16 %v309_v47, %v309_v47  ;;  %v336_v61 = vpack.c.bf16 %v304_v48, %v304_v48 }
  0x2d   : > { %1090 = vrot.lane.b32.xlu1 %v1026_v10, %s3704_s8  ;;  %v943_v63 = vshrl.u32 %v3830_v58, 16  ;;  %v945_v0 = vshll.u32 %v3830_v58, 16  ;;  %v952_v1 = vrot.slane %v950_v53, 1  ;;  %v580_v2 = vor.u32 %v578_v45, %v577_v54 }
  0x2e   : > { %1088 = vrot.lane.b32.xlu0 %v1023_v14, %s3704_s8  ;;  %v773_v3 = vsel %vm3778_vm4, %v577_v54, %v707_v56  ;;  %v929_v4 = vsel %vm785_vm3, %v924_v59, %v928_v52  ;;  %v374_v5 = vunpack.c.l.b16 %v340_v57  ;;  %v486_v7 = vunpack.c.l.b16 %v341_v60 }
  0x2f   : > { %v947_v8 = vrot.slane %v945_v0, 1  ;;  %v3841_v9 = vsel %vm3778_vm4, %v423_v43, %v580_v2  ;;  %v914_v10 = vshll.u32 %v773_v3, 16  ;;  %v1028_v11 = vrot.slane %v773_v3, 1 }
  0x30   : > { %v907_v12 = vshrl.u32 %v3841_v9, 16  ;;  %v909_v13 = vshll.u32 %v3841_v9, 16  ;;  %v390_v14 = vpack.c.b16 %v374_v5, %v374_v5  ;;  %v502_v15 = vpack.c.b16 %v486_v7, %v374_v5 }
  0x31   : > { %v948_v17 = vor.u32 %v947_v8, %v943_v63  ;;  %v916_v18 = vrot.slane %v914_v10, 1  ;;  %v662_v19 = vpack.c.b16 %v486_v7, %v486_v7  ;;  %v1027_v20 = vrot.slane %v3841_v9, 1 }
  0x32   : > { %v911_v23 = vrot.slane %v909_v13, 1  ;;  %v435_v24 = vshrl.u32 %v390_v14, 16  ;;  %v603_v25 = vshrl.u32 %v502_v15, 16  ;;  %v606_v26 = vshll.u32 %v502_v15, 16 }
  0x33   : > { %v953_v21 = vsel %vm785_vm3, %v948_v17, %v952_v1  ;;  %v721_v29 = vshll.u32 %v662_v19, 16  ;;  %v1029_v30 = vsel %vm996_vm2, %v1027_v20, %v1028_v11  ;;  %v337_v31 = vpack.c.bf16 %v305_v16, %v305_v16  ;;  %v285_v1 = vld [vmem:[%s3762_s29 + $0x28] sm:$0xff] }
  0x34   : > { %v912_v32 = vor.u32 %v911_v23, %v907_v12  ;;  %v605_v34 = vrot.slane %v603_v25, 7  ;;  %v372_v35 = vunpack.c.l.b16 %v336_v61  ;;  %v314_v36 = vpack.c.bf16 %v282_v22, %v282_v22 }
  0x35   : > { %1094 = vrot.lane.b32.xlu1 %v3817_v33, %s3704_s8  ;;  %v723_v37 = vrot.slane %v721_v29, 3  ;;  %v484_v38 = vunpack.c.l.b16 %v337_v31  ;;  %v315_v39 = vpack.c.bf16 %v283_v27, %v283_v27  ;;  %v316_v40 = vpack.c.bf16 %v284_v28, %v284_v28 }
  0x36   : > { %v917_v41 = vsel %vm785_vm3, %v912_v32, %v916_v18  ;;  %1064 = vrot.lane.b32.xlu0 %v929_v4, %s3703_s30  ;;  %v608_v43 = vor.u32 %v606_v26, %v605_v34  ;;  %v388_v44 = vpack.c.b16 %v372_v35, %v372_v35  ;;  %v360_v45 = vunpack.c.l.b16 %v314_v36 }
  0x37   : > { %1062 = vrot.lane.b32.xlu2 %v917_v41, %s3703_s30  ;;  %v777_v46 = vsel %vm3778_vm4, %v605_v34, %v723_v37  ;;  %v500_v47 = vpack.c.b16 %v484_v38, %v372_v35  ;;  %v660_v48 = vpack.c.b16 %v484_v38, %v484_v38  ;;  %v472_v33 = vunpack.c.l.b16 %v315_v39  ;;  %v310_v37 = vld [vmem:[%s3762_s29 + $0xf0] sm:$0xff] }
  0x38   : > { %v3861_v49 = vsel %vm3778_vm4, %v435_v24, %v608_v43  ;;  %v1040_v51 = vrot.slane %v777_v46, 1  ;;  %v429_v52 = vshrl.u32 %v388_v44, 16  ;;  %v376_v53 = vpack.c.b16 %v360_v45, %v360_v45  ;;  %v311_v43 = vld [vmem:[%s3762_s29 + $0xf8] sm:$0xff] }
  0x39   : > { %v1039_v54 = vrot.slane %v3861_v49, 1  ;;  %v589_v56 = vshrl.u32 %v500_v47, 16  ;;  %v592_v57 = vshll.u32 %v500_v47, 16  ;;  %v713_v59 = vshll.u32 %v660_v48, 16 }
  0x3a   : > { %v393_v60 = vshrl.u32 %v376_v53, 16  ;;  %v488_v61 = vpack.c.b16 %v472_v33, %v360_v45  ;;  %v648_v63 = vpack.c.b16 %v472_v33, %v472_v33  ;;  %v955_v0 = vshrl.u32 %v3861_v49, 16  ;;  %v288_v53 = vld [vmem:[%s3762_s29 + $0x40] sm:$0xff] }
  0x3b   : > { %v1041_v2 = vsel %vm996_vm2, %v1039_v54, %v1040_v51  ;;  %v591_v3 = vrot.slane %v589_v56, 7  ;;  %v715_v4 = vrot.slane %v713_v59, 3  ;;  %v957_v5 = vshll.u32 %v3861_v49, 16 }
  0x3c   : > { %v505_v7 = vshrl.u32 %v488_v61, 16  ;;  %v508_v8 = vshll.u32 %v488_v61, 16  ;;  %v665_v10 = vshll.u32 %v648_v63, 16  ;;  %v962_v11 = vshll.u32 %v777_v46, 16  ;;  %v290_v61 = vld [vmem:[%s3762_s29 + $0x50] sm:$0xff] }
  0x3d   : > { %1068 = vrot.lane.b32.xlu1 %v953_v21, %s3703_s30  ;;  %v594_v12 = vor.u32 %v592_v57, %v591_v3  ;;  %v775_v13 = vsel %vm3778_vm4, %v591_v3, %v715_v4  ;;  %v959_v14 = vrot.slane %v957_v5, 1  ;;  %v317_v15 = vpack.c.bf16 %v285_v1, %v285_v1 }
  0x3e   : > { %v1034_v16 = vrot.slane %v775_v13, 1  ;;  %v507_v17 = vrot.slane %v505_v7, 7  ;;  %v667_v18 = vrot.slane %v665_v10, 3  ;;  %v938_v19 = vshll.u32 %v775_v13, 16 }
  0x3f   : > { %1092 = vrot.lane.b32.xlu2 %v1029_v30, %s3704_s8  ;;  %v3874_v20 = vsel %vm3778_vm4, %v429_v52, %v594_v12  ;;  %v960_v22 = vor.u32 %v959_v14, %v955_v0  ;;  %v964_v23 = vrot.slane %v962_v11, 1  ;;  %v362_v24 = vunpack.c.l.b16 %v316_v40 }
  0x40   : > { %v1033_v25 = vrot.slane %v3874_v20, 1  ;;  %v510_v26 = vor.u32 %v508_v8, %v507_v17  ;;  %v3879_v27 = vsel %vm3778_vm4, %v507_v17, %v667_v18  ;;  %v931_v28 = vshrl.u32 %v3874_v20, 16 }
  0x41   : > { %v794_v21 = vshll.u32 %v3879_v27, 16  ;;  %v933_v29 = vshll.u32 %v3874_v20, 16  ;;  %v940_v30 = vrot.slane %v938_v19, 1  ;;  %v965_v31 = vsel %vm785_vm3, %v960_v22, %v964_v23 }
  0x42   : > { %v1035_v32 = vsel %vm996_vm2, %v1033_v25, %v1034_v16  ;;  %v3888_v34 = vsel %vm3778_vm4, %v393_v60, %v510_v26  ;;  %v378_v35 = vpack.c.b16 %v362_v24, %v362_v24  ;;  %v474_v36 = vunpack.c.l.b16 %v317_v15  ;;  %v289_v60 = vld [vmem:[%s3762_s29 + $0x48] sm:$0xff] }
  0x43   : > { %1096 = vrot.lane.b32.xlu0 %v1035_v32, %s3704_s8  ;;  %v787_v38 = vshrl.u32 %v3888_v34, 16  ;;  %v789_v39 = vshll.u32 %v3888_v34, 16  ;;  %v796_v40 = vrot.slane %v794_v21, 1  ;;  %v935_v41 = vrot.slane %v933_v29, 1 }
  0x44   : > { %v399_v44 = vshrl.u32 %v378_v35, 16  ;;  %v490_v45 = vpack.c.b16 %v474_v36, %v362_v24  ;;  %v650_v46 = vpack.c.b16 %v474_v36, %v474_v36  ;;  %v1036_v47 = vrot.slane %v3830_v58, 1 }
  0x45   : > { %1100 = vrot.lane.b32.xlu1 %v1041_v2, %s3704_s8  ;;  %v791_v48 = vrot.slane %v789_v39, 1  ;;  %v936_v33 = vor.u32 %v935_v41, %v931_v28  ;;  %v1037_v51 = vrot.slane %v3825_v50, 1  ;;  %v342_v52 = vpack.c.bf16 %v310_v37, %v310_v37 }
  0x46   : > { %v519_v54 = vshrl.u32 %v490_v45, 16  ;;  %v522_v56 = vshll.u32 %v490_v45, 16  ;;  %v673_v57 = vshll.u32 %v650_v46, 16  ;;  %v343_v59 = vpack.c.bf16 %v311_v43, %v311_v43 }
  0x47   : > { %v792_v63 = vor.u32 %v791_v48, %v787_v38  ;;  %v941_v0 = vsel %vm785_vm3, %v936_v33, %v940_v30  ;;  %v1038_v1 = vsel %vm996_vm2, %v1036_v47, %v1037_v51  ;;  %v375_v3 = vunpack.c.l.b16 %v342_v52 }
  0x48   : > { %1066 = vrot.lane.b32.xlu2 %v941_v0, %s3703_s30  ;;  %v521_v2 = vrot.slane %v519_v54, 7  ;;  %v675_v4 = vrot.slane %v673_v57, 3  ;;  %v487_v5 = vunpack.c.l.b16 %v343_v59  ;;  %v320_v50 = vpack.c.bf16 %v288_v53, %v288_v53 }
  0x49   : > { %v797_v7 = vsel %vm785_vm3, %v792_v63, %v796_v40  ;;  %v391_v8 = vpack.c.b16 %v375_v3, %v375_v3  ;;  %v321_v10 = vpack.c.bf16 %v289_v60, %v289_v60  ;;  %v322_v11 = vpack.c.bf16 %v290_v61, %v290_v61  ;;  %v291_v40 = vld [vmem:[%s3762_s29 + $0x58] sm:$0xff] }
  0x4a   : > { %v524_v12 = vor.u32 %v522_v56, %v521_v2  ;;  %v765_v13 = vsel %vm3778_vm4, %v521_v2, %v675_v4  ;;  %v503_v14 = vpack.c.b16 %v487_v5, %v375_v3  ;;  %v663_v15 = vpack.c.b16 %v487_v5, %v487_v5 }
  0x4b   : > { %1070 = vrot.lane.b32.xlu0 %v965_v31, %s3703_s30  ;;  %v1004_v16 = vrot.slane %v765_v13, 1  ;;  %v438_v17 = vshrl.u32 %v391_v8, 16  ;;  %v364_v18 = vunpack.c.l.b16 %v320_v50  ;;  %v476_v19 = vunpack.c.l.b16 %v321_v10  ;;  %v286_v50 = vld [vmem:[%s3762_s29 + $0x30] sm:$0xff] }
  0x4c   : > { %v3910_v22 = vsel %vm3778_vm4, %v399_v44, %v524_v12  ;;  %v610_v23 = vshrl.u32 %v503_v14, 16  ;;  %v613_v24 = vshll.u32 %v503_v14, 16  ;;  %v725_v25 = vshll.u32 %v663_v15, 16 }
  0x4d   : > { %1042 = vrot.lane.b32.xlu1 %v797_v7, %s3703_s30  ;;  %v1003_v26 = vrot.slane %v3910_v22, 1  ;;  %v380_v28 = vpack.c.b16 %v364_v18, %v364_v18  ;;  %v492_v21 = vpack.c.b16 %v476_v19, %v364_v18  ;;  %v652_v29 = vpack.c.b16 %v476_v19, %v476_v19 }
  0x4e   : > { %v612_v30 = vrot.slane %v610_v23, 7  ;;  %v727_v31 = vrot.slane %v725_v25, 3  ;;  %v811_v32 = vshrl.u32 %v3910_v22, 16  ;;  %v813_v35 = vshll.u32 %v3910_v22, 16 }
  0x4f   : > { %v1005_v36 = vsel %vm996_vm2, %v1003_v26, %v1004_v16  ;;  %v405_v37 = vshrl.u32 %v380_v28, 16  ;;  %v533_v38 = vshrl.u32 %v492_v21, 16  ;;  %v536_v39 = vshll.u32 %v492_v21, 16  ;;  %v294_v16 = vld [vmem:[%s3762_s29 + $0x70] sm:$0xff]  ;;  %v295_v21 = vld [vmem:[%s3762_s29 + $0x78] sm:$0xff] }
  0x50   : > { %1098 = vrot.lane.b32.xlu2 %v1038_v1, %s3704_s8  ;;  %v615_v41 = vor.u32 %v613_v24, %v612_v30  ;;  %v778_v43 = vsel %vm3778_vm4, %v612_v30, %v727_v31  ;;  %v681_v44 = vshll.u32 %v652_v29, 16  ;;  %v815_v45 = vrot.slane %v813_v35, 1 }
  0x51   : > { %v1179_v46 = vrot.slane %v778_v43, 1  ;;  %v535_v47 = vrot.slane %v533_v38, 7  ;;  %v1172_v48 = vshll.u32 %v778_v43, 16  ;;  %v818_v33 = vshll.u32 %v765_v13, 16 }
  0x52   : > { %v3923_v51 = vsel %vm3778_vm4, %v438_v17, %v615_v41  ;;  %v683_v52 = vrot.slane %v681_v44, 3  ;;  %v816_v53 = vor.u32 %v815_v45, %v811_v32  ;;  %v323_v54 = vpack.c.bf16 %v291_v40, %v291_v40 }
  0x53   : > { %v1178_v56 = vrot.slane %v3923_v51, 1  ;;  %v538_v57 = vor.u32 %v536_v39, %v535_v47  ;;  %v1165_v59 = vshrl.u32 %v3923_v51, 16  ;;  %v1167_v60 = vshll.u32 %v3923_v51, 16 }
  0x54   : > { %v3930_v61 = vsel %vm3778_vm4, %v535_v47, %v683_v52  ;;  %v1174_v63 = vrot.slane %v1172_v48, 1  ;;  %v820_v0 = vrot.slane %v818_v33, 1  ;;  %v365_v1 = vunpack.c.l.b16 %v322_v11  ;;  %v287_v11 = vld [vmem:[%s3762_s29 + $0x38] sm:$0xff] }
  0x55   : > { %1076 = vrot.lane.b32.xlu1 %v1005_v36, %s3704_s8  ;;  %v1180_v3 = vsel %vm996_vm2, %v1178_v56, %v1179_v46  ;;  %v3936_v2 = vsel %vm3778_vm4, %v405_v37, %v538_v57  ;;  %v842_v4 = vshll.u32 %v3930_v61, 16  ;;  %v1169_v5 = vrot.slane %v1167_v60, 1 }
  0x56   : > { %1183 = vrot.lane.b32.xlu0 %v1180_v3, %s3704_s8  ;;  %v835_v7 = vshrl.u32 %v3936_v2, 16  ;;  %v837_v8 = vshll.u32 %v3936_v2, 16  ;;  %v381_v10 = vpack.c.b16 %v365_v1, %v365_v1  ;;  %v821_v14 = vsel %vm785_vm3, %v816_v53, %v820_v0 }
  0x57   : > { %v844_v12 = vrot.slane %v842_v4, 1  ;;  %v1170_v13 = vor.u32 %v1169_v5, %v1165_v59  ;;  %v477_v15 = vunpack.c.l.b16 %v323_v54  ;;  %v997_v19 = vrot.slane %v3888_v34, 1 }
  0x58   : > { %v839_v17 = vrot.slane %v837_v8, 1  ;;  %v408_v18 = vshrl.u32 %v381_v10, 16  ;;  %v318_v23 = vpack.c.bf16 %v286_v50, %v286_v50  ;;  %v319_v28 = vpack.c.bf16 %v287_v11, %v287_v11 }
  0x59   : > { %v1175_v24 = vsel %vm785_vm3, %v1170_v13, %v1174_v63  ;;  %v493_v25 = vpack.c.b16 %v477_v15, %v365_v1  ;;  %v653_v26 = vpack.c.b16 %v477_v15, %v477_v15  ;;  %v998_v30 = vrot.slane %v3879_v27, 1 }
  0x5a   : > { %v840_v29 = vor.u32 %v839_v17, %v835_v7  ;;  %1181 = vrot.lane.b32.xlu2 %v1175_v24, %s3703_s30  ;;  %v363_v31 = vunpack.c.l.b16 %v318_v23  ;;  %v326_v32 = vpack.c.bf16 %v294_v16, %v294_v16  ;;  %v475_v38 = vunpack.c.l.b16 %v319_v28 }
  0x5b   : > { %v540_v35 = vshrl.u32 %v493_v25, 16  ;;  %v543_v36 = vshll.u32 %v493_v25, 16  ;;  %v685_v37 = vshll.u32 %v653_v26, 16  ;;  %v327_v41 = vpack.c.bf16 %v295_v21, %v295_v21 }
  0x5c   : > { %v845_v39 = vsel %vm785_vm3, %v840_v29, %v844_v12  ;;  %v379_v40 = vpack.c.b16 %v363_v31, %v363_v31  ;;  %v367_v43 = vunpack.c.l.b16 %v326_v32  ;;  %v491_v46 = vpack.c.b16 %v475_v38, %v363_v31  ;;  %v292_v32 = vld [vmem:[%s3762_s29 + $0x60] sm:$0xff] }
  0x5d   : > { %1050 = vrot.lane.b32.xlu1 %v845_v39, %s3703_s30  ;;  %v542_v44 = vrot.slane %v540_v35, 7  ;;  %v687_v45 = vrot.slane %v685_v37, 3  ;;  %v651_v47 = vpack.c.b16 %v475_v38, %v475_v38  ;;  %v999_v27 = vsel %vm996_vm2, %v997_v19, %v998_v30  ;;  %v293_v35 = vld [vmem:[%s3762_s29 + $0x68] sm:$0xff] }
  0x5e   : > { %1046 = vrot.lane.b32.xlu0 %v821_v14, %s3703_s30  ;;  %v383_v48 = vpack.c.b16 %v367_v43, %v367_v43  ;;  %v479_v33 = vunpack.c.l.b16 %v327_v41  ;;  %v526_v54 = vshrl.u32 %v491_v46, 16  ;;  %v529_v56 = vshll.u32 %v491_v46, 16  ;;  %v281_v41 = vld [vmem:[%s3762_s29 + $0x8] sm:$0xff] }
  0x5f   : > { %v545_v52 = vor.u32 %v543_v36, %v542_v44  ;;  %v768_v53 = vsel %vm3778_vm4, %v542_v44, %v687_v45  ;;  %v402_v59 = vshrl.u32 %v379_v40, 16  ;;  %v677_v60 = vshll.u32 %v651_v47, 16  ;;  %v280_v40 = vld [vmem:[%s3762_s29] sm:$0xff] }
  0x60   : > { %v1013_v57 = vrot.slane %v768_v53, 1  ;;  %v495_v63 = vpack.c.b16 %v479_v33, %v367_v43  ;;  %v528_v1 = vrot.slane %v526_v54, 7  ;;  %v414_v3 = vshrl.u32 %v383_v48, 16 }
  0x61   : > { %v3959_v0 = vsel %vm3778_vm4, %v408_v18, %v545_v52  ;;  %v655_v4 = vpack.c.b16 %v479_v33, %v479_v33  ;;  %v679_v50 = vrot.slane %v677_v60, 3  ;;  %v854_v13 = vshll.u32 %v768_v53, 16 }
  0x62   : > { %v1012_v5 = vrot.slane %v3959_v0, 1  ;;  %1072 = vrot.lane.b32.xlu2 %v999_v27, %s3704_s8  ;;  %v554_v7 = vshrl.u32 %v495_v63, 16  ;;  %v557_v8 = vshll.u32 %v495_v63, 16  ;;  %v531_v10 = vor.u32 %v529_v56, %v528_v1 }
  0x63   : > { %v693_v11 = vshll.u32 %v655_v4, 16  ;;  %v849_v12 = vshll.u32 %v3959_v0, 16  ;;  %v766_v15 = vsel %vm3778_vm4, %v528_v1, %v679_v50  ;;  %v847_v17 = vshrl.u32 %v3959_v0, 16 }
  0x64   : > { %v1014_v14 = vsel %vm996_vm2, %v1012_v5, %v1013_v57  ;;  %v556_v16 = vrot.slane %v554_v7, 7  ;;  %v3971_v18 = vsel %vm3778_vm4, %v402_v59, %v531_v10  ;;  %v1007_v19 = vrot.slane %v766_v15, 1 }
  0x65   : > { %1082 = vrot.lane.b32.xlu1 %v1014_v14, %s3704_s8  ;;  %v695_v23 = vrot.slane %v693_v11, 3  ;;  %v830_v24 = vshll.u32 %v766_v15, 16  ;;  %v1006_v25 = vrot.slane %v3971_v18, 1  ;;  %v823_v28 = vshrl.u32 %v3971_v18, 16 }
  0x66   : > { %v559_v26 = vor.u32 %v557_v8, %v556_v16  ;;  %v825_v21 = vshll.u32 %v3971_v18, 16  ;;  %v851_v31 = vrot.slane %v849_v12, 1  ;;  %v856_v45 = vrot.slane %v854_v13, 1 }
  0x67   : > { %v3978_v29 = vsel %vm3778_vm4, %v556_v16, %v695_v23  ;;  %v832_v30 = vrot.slane %v830_v24, 1  ;;  %v1008_v36 = vsel %vm996_vm2, %v1006_v25, %v1007_v19  ;;  %v324_v27 = vpack.c.bf16 %v292_v32, %v292_v32 }
  0x68   : > { %v3985_v37 = vsel %vm3778_vm4, %v414_v3, %v559_v26  ;;  %v878_v38 = vshll.u32 %v3978_v29, 16  ;;  %v827_v39 = vrot.slane %v825_v21, 1  ;;  %1078 = vrot.lane.b32.xlu0 %v1008_v36, %s3704_s8  ;;  %v852_v47 = vor.u32 %v851_v31, %v847_v17 }
  0x69   : > { %v871_v43 = vshrl.u32 %v3985_v37, 16  ;;  %v873_v44 = vshll.u32 %v3985_v37, 16  ;;  %v325_v48 = vpack.c.bf16 %v293_v35, %v293_v35  ;;  %v312_v53 = vpack.c.bf16 %v280_v40, %v280_v40 }
  0x6a   : > { %v828_v46 = vor.u32 %v827_v39, %v823_v28  ;;  %v880_v52 = vrot.slane %v878_v38, 1  ;;  %v313_v54 = vpack.c.bf16 %v281_v41, %v281_v41  ;;  %v1009_v57 = vrot.slane %v3936_v2, 1 }
  0x6b   : > { %v875_v33 = vrot.slane %v873_v44, 1  ;;  %v366_v59 = vunpack.c.l.b16 %v324_v27  ;;  %v478_v60 = vunpack.c.l.b16 %v325_v48  ;;  %v1010_v1 = vrot.slane %v3930_v61, 1 }
  0x6c   : > { %v833_v56 = vsel %vm785_vm3, %v828_v46, %v832_v30  ;;  %v361_v3 = vunpack.c.l.b16 %v312_v53  ;;  %v473_v4 = vunpack.c.l.b16 %v313_v54  ;;  %v857_v5 = vsel %vm785_vm3, %v852_v47, %v856_v45  ;;  %v3516_v54 = vld [vmem:[%s5765_s1 + $0x8] sm:$0xf] }
  0x6d   : > { %v876_v63 = vor.u32 %v875_v33, %v871_v43  ;;  %1048 = vrot.lane.b32.xlu2 %v833_v56, %s3703_s30  ;;  %v382_v50 = vpack.c.b16 %v366_v59, %v366_v59  ;;  %v494_v7 = vpack.c.b16 %v478_v60, %v366_v59  ;;  %v654_v8 = vpack.c.b16 %v478_v60, %v478_v60 }
  0x6e   : > { %v489_v11 = vpack.c.b16 %v473_v4, %v361_v3  ;;  %v649_v12 = vpack.c.b16 %v473_v4, %v473_v4  ;;  %v377_v16 = vpack.c.b16 %v361_v3, %v361_v3  ;;  %v1011_v23 = vsel %vm996_vm2, %v1009_v57, %v1010_v1  ;;  %v3639_v57 = vld [vmem:[%s5765_s1 + $0x8] sm:$0x30] }
  0x6f   : > { %v881_v10 = vsel %vm785_vm3, %v876_v63, %v880_v52  ;;  %v547_v13 = vshrl.u32 %v494_v7, 16  ;;  %v550_v14 = vshll.u32 %v494_v7, 16  ;;  %v689_v15 = vshll.u32 %v654_v8, 16 }
  0x70   : > { %1056 = vrot.lane.b32.xlu1 %v881_v10, %s3703_s30  ;;  %1052 = vrot.lane.b32.xlu0 %v857_v5, %s3703_s30  ;;  %v512_v61 = vshrl.u32 %v489_v11, 16  ;;  %v515_v17 = vshll.u32 %v489_v11, 16  ;;  %v669_v19 = vshll.u32 %v649_v12, 16  ;;  %v411_v24 = vshrl.u32 %v382_v50, 16  ;;  %v3556_v11 = vld [vmem:[%s5765_s1 + $0x10] sm:$0xf] }
  0x71   : > { %v549_v25 = vrot.slane %v547_v13, 7  ;;  %v691_v26 = vrot.slane %v689_v15, 3  ;;  %v396_v32 = vshrl.u32 %v377_v16, 16  ;;  %v3517_v1 = vor.u32 %v3639_v57, %v3516_v54  ;;  %v3640_v12 = vld [vmem:[%s5765_s1 + $0x10] sm:$0x30] }
  0x72   : > { %v514_v28 = vrot.slane %v512_v61, 7  ;;  %v671_v21 = vrot.slane %v669_v19, 3  ;;  %v1018_v8 = vrot.slane %v3985_v37, 1  ;;  %v1019_v10 = vrot.slane %v3978_v29, 1 }
  0x73   : > { %v552_v30 = vor.u32 %v550_v14, %v549_v25  ;;  %v769_v31 = vsel %vm3778_vm4, %v549_v25, %v691_v26  ;;  %v1229_v50 = vsel %vm1227_vm5, %v3517_v1, 0  ;;  %v3557_v14 = vor.u32 %v3640_v12, %v3556_v11 }
  0x74   : > { %v1016_v35 = vrot.slane %v769_v31, 1  ;;  %v866_v36 = vshll.u32 %v769_v31, 16  ;;  %v517_v38 = vor.u32 %v515_v17, %v514_v28  ;;  %v764_v39 = vsel %vm3778_vm4, %v514_v28, %v671_v21  ;;  %3644 = vmatpush.bf16.msra.mxu2 %v1229_v50  ;;  %1238 = vmatpush.bf16.msra.mxu0 %v1229_v50 }
  0x75   : > { %1080 = vrot.lane.b32.xlu2 %v1011_v23, %s3704_s8  ;;  %v4009_v40 = vsel %vm3778_vm4, %v411_v24, %v552_v30  ;;  %v806_v45 = vshll.u32 %v764_v39, 16  ;;  %v1001_v27 = vrot.slane %v764_v39, 1  ;;  %v1020_v13 = vsel %vm996_vm2, %v1018_v8, %v1019_v10  ;;  %v3536_v39 = vld [vmem:[%s5765_s1] sm:$0xf] }
  0x76   : > { %v1015_v41 = vrot.slane %v4009_v40, 1  ;;  %v859_v43 = vshrl.u32 %v4009_v40, 16  ;;  %v861_v44 = vshll.u32 %v4009_v40, 16  ;;  %v868_v46 = vrot.slane %v866_v36, 1 }
  0x77   : > { %v4016_v47 = vsel %vm3778_vm4, %v396_v32, %v517_v38  ;;  %v808_v63 = vrot.slane %v806_v45, 1  ;;  %v1423_v15 = vsel %vm1227_vm5, %v3557_v14, 0 }
  0x78   : > { %v1017_v48 = vsel %vm996_vm2, %v1015_v41, %v1016_v35  ;;  %v863_v33 = vrot.slane %v861_v44, 1  ;;  %v799_v52 = vshrl.u32 %v4016_v47, 16  ;;  %v801_v53 = vshll.u32 %v4016_v47, 16  ;;  %1432 = vmatpush.bf16.msrb.mxu2 %v1423_v15  ;;  %v3638_v41 = vld [vmem:[%s5765_s1] sm:$0x30] }
  0x79   : > { %1084 = vrot.lane.b32.xlu0 %v1017_v48, %s3704_s8  ;;  %v1000_v56 = vrot.slane %v4016_v47, 1 }
  0x7a   : > { %v864_v59 = vor.u32 %v863_v33, %v859_v43  ;;  %v803_v60 = vrot.slane %v801_v53, 1  ;;  %v3537_v43 = vor.u32 %v3638_v41, %v3536_v39 }
  0x7b   : > { %v1002_v3 = vsel %vm996_vm2, %v1000_v56, %v1001_v27 }
  0x7c   : > { %v869_v4 = vsel %vm785_vm3, %v864_v59, %v868_v46  ;;  %v804_v5 = vor.u32 %v803_v60, %v799_v52  ;;  %1074 = vrot.lane.b32.xlu1 %v1002_v3, %s3704_s8  ;;  %v1326_v46 = vsel %vm1227_vm5, %v3537_v43, 0 }
  0x7d   : > { %1054 = vrot.lane.b32.xlu2 %v869_v4, %s3703_s30  ;;  %3645 = vmatpush.bf16.msra.mxu3 %v1326_v46 }
  0x7e   : > { %v809_v7 = vsel %vm785_vm3, %v804_v5, %v808_v63  ;;  %1335 = vmatpush.bf16.msra.mxu1 %v1326_v46 }
  0x81   : > { %1044 = vrot.lane.b32.xlu0 %v809_v7, %s3703_s30 }
  0x85   : > { %1086 = vrot.lane.b32.xlu2 %v1020_v13, %s3704_s8 }
  0x91   : > { %v1063_v29 = vpop.permute.xlu2 %1062 }
  0x92   : > { %v1124_v44 = vsel %vm1102_vm6, %v3841_v9, %v1063_v29 }
  0x97   : > { %v1061_v16 = vpop.permute.xlu1 %1060 }
  0x98   : > { %v1059_v61 = vpop.permute.xlu0 %1058  ;;  %v1122_v31 = vsel %vm1102_vm6, %v3788_v55, %v1061_v16 }
  0x99   : > { %v1093_v17 = vpop.permute.xlu2 %1092  ;;  %v1120_v23 = vsel %vm1102_vm6, %v3794_v62, %v1059_v61 }
  0x9a   : > { %v4074_v52 = vsel %vm1133_vm7, %v1124_v44, %v1093_v17 }
  0x9f   : > { %v1091_v19 = vpop.permute.xlu1 %1090 }
  0xa0   : > { %v1089_v24 = vpop.permute.xlu0 %1088  ;;  %v4057_v35 = vsel %vm1133_vm7, %v1122_v31, %v1091_v19 }
  0xa1   : > { %v4050_v25 = vsel %vm1133_vm7, %v1120_v23, %v1089_v24 }
  0xa2   : > { %3526 = vmatmul.msk.bf16.vlgmr.msra.gmra.mxu2 %vm1194_vm8, %v4050_v25  ;;  %v1067_v26 = vpop.permute.xlu2 %1066 }
  0xa7   : > { %v1095_v28 = vpop.permute.xlu1 %1094 }
  0xa8   : > { %v1065_v30 = vpop.permute.xlu0 %1064 }
  0xa9   : > { %v1126_v57 = vsel %vm1102_vm6, %v3802_v6, %v1065_v30 }
  0xaa   : > { %v1099_v21 = vpop.permute.xlu2 %1098  ;;  %v4087_v63 = vsel %vm1133_vm7, %v1126_v57, %v1095_v28 }
  0xaf   : > { %v1069_v32 = vpop.permute.xlu1 %1068 }
  0xb0   : > { %v1130_v56 = vsel %vm1102_vm6, %v3830_v58, %v1069_v32  ;;  %v1128_v58 = vsel %vm1102_vm6, %v3874_v20, %v1067_v26 }
  0xb2   : > { %3527 = vmatmul.msk.bf16.gmra.mxu2 %vm1194_vm8, %v4057_v35 }
  0xb4   : > { %v1182_v62 = vpop.permute.xlu2 %1181 }
  0xb5   : > { %v1097_v36 = vpop.permute.xlu0 %1096  ;;  %v1186_v11 = vsel %vm1102_vm6, %v3923_v51, %v1182_v62 }
  0xb6   : > { %v4094_v6 = vsel %vm1133_vm7, %v1128_v58, %v1097_v36 }
  0xb7   : > { %v1101_v38 = vpop.permute.xlu1 %1100 }
  0xbc   : > { %v1073_v55 = vpop.permute.xlu2 %1072 }
  0xbd   : > { %v1071_v45 = vpop.permute.xlu0 %1070 }
  0xbf   : > { %v1043_v27 = vpop.permute.xlu1 %1042 }
  0xc0   : > { %v1104_v48 = vsel %vm1102_vm6, %v3888_v34, %v1043_v27  ;;  %v4084_v34 = vsel %vm1133_vm7, %v1130_v56, %v1099_v21 }
  0xc1   : > { %v1135_v33 = vsel %vm1133_vm7, %v1104_v48, %v1073_v55 }
  0xc2   : > { %3528 = vmatmul.msk.bf16.gmra.mxu2 %vm1194_vm8, %v4074_v52  ;;  %3538 = vmatmul.msk.bf16.vlgmr.msra.gmra.mxu1 %vm1194_vm8, %v1135_v33 }
  0xc7   : > { %v1077_v9 = vpop.permute.xlu1 %1076  ;;  %v1049_v53 = vpop.permute.xlu2 %1048 }
  0xc8   : > { %v1184_v54 = vpop.permute.xlu0 %1183  ;;  %v1110_v17 = vsel %vm1102_vm6, %v3971_v18, %v1049_v53 }
  0xc9   : > { %v4108_v20 = vsel %vm1133_vm7, %v1186_v11, %v1184_v54 }
  0xcf   : > { %v1051_v59 = vpop.permute.xlu1 %1050  ;;  %v1081_v60 = vpop.permute.xlu2 %1080 }
  0xd0   : > { %v1047_v1 = vpop.permute.xlu0 %1046 }
  0xd1   : > { %v1108_v14 = vsel %vm1102_vm6, %v3910_v22, %v1047_v1  ;;  %v1132_v22 = vsel %vm1102_vm6, %v3861_v49, %v1071_v45  ;;  %v1112_v49 = vsel %vm1102_vm6, %v3936_v2, %v1051_v59 }
  0xd2   : > { %3529 = vmatmul.msk.bf16.gmra.mxu2 %vm1194_vm8, %v4087_v63  ;;  %v1139_v29 = vsel %vm1133_vm7, %v1108_v14, %v1077_v9  ;;  %v4125_v61 = vsel %vm1133_vm7, %v1132_v22, %v1101_v38  ;;  %v1143_v18 = vsel %vm1133_vm7, %v1112_v49, %v1081_v60 }
  0xd7   : > { %v1083_v3 = vpop.permute.xlu1 %1082  ;;  %v1055_v4 = vpop.permute.xlu2 %1054 }
  0xd8   : > { %v1116_v31 = vsel %vm1102_vm6, %v4009_v40, %v1055_v4 }
  0xda   : > { %v1079_v5 = vpop.permute.xlu0 %1078 }
  0xdf   : > { %v1087_v50 = vpop.permute.xlu2 %1086 }
  0xe2   : > { %v1057_v7 = vpop.permute.xlu1 %1056  ;;  %3530 = vmatmul.msk.bf16.gmra.mxu2 %vm1194_vm8, %v4094_v6  ;;  %v1053_v10 = vpop.permute.xlu0 %1052 }
  0xe3   : > { %v1118_v8 = vsel %vm1102_vm6, %v3985_v37, %v1057_v7  ;;  %v1114_v26 = vsel %vm1102_vm6, %v3959_v0, %v1053_v10 }
  0xe4   : > { %v4103_v12 = vsel %vm1133_vm7, %v1118_v8, %v1087_v50  ;;  %v1145_v28 = vsel %vm1133_vm7, %v1114_v26, %v1083_v3 }
  0xe5   : > { %3546 = vmatmul.msk.bf16.vlgmr.msra.gmra.mxu3 %vm1194_vm8, %v4103_v12 }
  0xeb   : > { %v1085_v13 = vpop.permute.xlu0 %1084 }
  0xec   : > { %v1147_v0 = vsel %vm1133_vm7, %v1116_v31, %v1085_v13 }
  0xee   : > { %v1075_v37 = vpop.permute.xlu1 %1074 }
  0xf2   : > { %3531 = vmatmul.msk.bf16.gmra.mxu2 %vm1194_vm8, %v4084_v34 }
  0xf3   : > { %v1045_v15 = vpop.permute.xlu0 %1044 }
  0xf4   : > { %v1106_v51 = vsel %vm1102_vm6, %v4016_v47, %v1045_v15  ;;  %v1141_v47 = vsel %vm1133_vm7, %v1110_v17, %v1079_v5 }
  0xf5   : > { %3547 = vmatmul.msk.bf16.gmra.mxu3 %vm1194_vm8, %v4050_v25  ;;  %v1137_v16 = vsel %vm1133_vm7, %v1106_v51, %v1075_v37 }
  0xf6   : > { %3518 = vmatmul.msk.bf16.vlgmr.msra.gmra.mxu0 %vm1194_vm8, %v1137_v16  ;;  %3539 = vmatmul.msk.bf16.gmra.mxu1 %vm1194_vm8, %v1137_v16 }
 0x102   : > { %3532 = vmatmul.msk.bf16.gmra.mxu2 %vm1194_vm8, %v4125_v61 }
 0x105   : > { %3548 = vmatmul.msk.bf16.gmra.mxu3 %vm1194_vm8, %v4057_v35 }
 0x106   : > { %3519 = vmatmul.msk.bf16.gmra.mxu0 %vm1194_vm8, %v1135_v33  ;;  %3540 = vmatmul.msk.bf16.gmra.mxu1 %vm1194_vm8, %v1135_v33 }
 0x112   : > { %3533 = vmatmul.msk.bf16.gmra.mxu2 %vm1194_vm8, %v4108_v20 }
 0x115   : > { %3549 = vmatmul.msk.bf16.gmra.mxu3 %vm1194_vm8, %v4074_v52 }
 0x116   : > { %3520 = vmatmul.msk.bf16.gmra.mxu0 %vm1194_vm8, %v1139_v29  ;;  %3541 = vmatmul.msk.bf16.gmra.mxu1 %vm1194_vm8, %v1139_v29 }
 0x122   : > { %3558 = vmatmul.msk.bf16.vlgmr.msrb.gmra.mxu2 %vm1194_vm8, %v1135_v33 }
 0x125   : > { %3550 = vmatmul.msk.bf16.gmra.mxu3 %vm1194_vm8, %v4087_v63  ;;  %v1280_v19 = vpop.f32.mrf.mxu2 }
 0x126   : > { %3521 = vmatmul.msk.bf16.gmra.mxu0 %vm1194_vm8, %v1141_v47  ;;  %3542 = vmatmul.msk.bf16.gmra.mxu1 %vm1194_vm8, %v1141_v47 }
 0x12d   : > { %v4150_v2 = vpop.f32.mrf.mxu2 }
 0x132   : > { %3559 = vmatmul.msk.bf16.gmra.mxu2 %vm1194_vm8, %v1139_v29 }
 0x135   : > { %3551 = vmatmul.msk.bf16.gmra.mxu3 %vm1194_vm8, %v4094_v6  ;;  %v1285_v23 = vpop.f32.mrf.mxu2 }
 0x136   : > { %3522 = vmatmul.msk.bf16.gmra.mxu0 %vm1194_vm8, %v1143_v18  ;;  %3543 = vmatmul.msk.bf16.gmra.mxu1 %vm1194_vm8, %v1143_v18 }
 0x13d   : > { %v4157_v24 = vpop.f32.mrf.mxu2 }
 0x13f   : > { %v1337_v39 = vpop.f32.mrf.mxu1 }
 0x142   : > { %3560 = vmatmul.msk.bf16.gmra.mxu2 %vm1194_vm8, %v1141_v47 }
 0x145   : > { %3552 = vmatmul.msk.bf16.gmra.mxu3 %vm1194_vm8, %v4084_v34  ;;  %v1290_v21 = vpop.f32.mrf.mxu2 }
 0x146   : > { %3523 = vmatmul.msk.bf16.gmra.mxu0 %vm1194_vm8, %v1145_v28  ;;  %3544 = vmatmul.msk.bf16.gmra.mxu1 %vm1194_vm8, %v1145_v28 }
 0x147   : > { %v4193_v46 = vpop.f32.mrf.mxu1 }
 0x14d   : > { %v4167_v30 = vpop.f32.mrf.mxu2 }
 0x152   : > { %3561 = vmatmul.msk.bf16.gmra.mxu2 %vm1194_vm8, %v1143_v18 }
 0x155   : > { %3553 = vmatmul.msk.bf16.gmra.mxu3 %vm1194_vm8, %v4125_v61  ;;  %v4175_v32 = vpop.f32.mrf.mxu2 }
 0x156   : > { %3524 = vmatmul.msk.bf16.gmra.mxu0 %vm1194_vm8, %v1147_v0  ;;  %3545 = vmatmul.msk.bf16.gmra.mxu1 %vm1194_vm8, %v1147_v0 }
 0x15d   : > { %v4179_v62 = vpop.f32.mrf.mxu2 }
 0x162   : > { %3562 = vmatmul.msk.bf16.gmra.mxu2 %vm1194_vm8, %v1145_v28 }
 0x165   : > { %v4182_v36 = vpop.f32.mrf.mxu2 }
 0x166   : > { %3525 = vmatmul.msk.bf16.gmra.mxu0 %vm1194_vm8, %v4103_v12 }
 0x168   : > { %v1377_v40 = vpop.f32.mrf.mxu3 }
 0x169   : > { %v4186_v38 = vadd.f32 %v1377_v40, %v1280_v19 }
 0x16d   : > { %v4188_v41 = vpop.f32.mrf.mxu2 }
 0x170   : > { %v1379_v43 = vpop.f32.mrf.mxu3 }
 0x172   : > { %3563 = vmatmul.msk.bf16.gmra.mxu2 %vm1194_vm8, %v1147_v0  ;;  %v1380_v0 = vadd.f32 %v1379_v43, %v4150_v2 }
 0x173   : > { %v1240_v55 = vpop.f32.mrf.mxu0  ;;  %v1342_v54 = vpop.f32.mrf.mxu1 }
 0x174   : > { %v1338_v45 = vadd.f32 %v1337_v39, %v1240_v55 }
 0x175   : > { %v4191_v44 = vpop.f32.mrf.mxu2 }
 0x178   : > { %v1382_v27 = vpop.f32.mrf.mxu3 }
 0x179   : > { %v1383_v48 = vadd.f32 %v1382_v27, %v1285_v23 }
 0x17b   : > { %v4195_v33 = vpop.f32.mrf.mxu0  ;;  %v4203_v3 = vpop.f32.mrf.mxu1 }
 0x17d   : > { %v4197_v9 = vpop.f32.mrf.mxu2 }
 0x17e   : > { %5785 = vst [vmem:[#allocation3_spill] sm:$0xff] %v4197_v9 }
 0x180   : > { %v1384_v53 = vpop.f32.mrf.mxu3 }
 0x182   : > { %3564 = vmatmul.msk.bf16.gmra.mxu2 %vm1194_vm8, %v4103_v12 }
 0x183   : > { %v1245_v56 = vpop.f32.mrf.mxu0  ;;  %v1347_v50 = vpop.f32.mrf.mxu1 }
 0x184   : > { %v1343_v59 = vadd.f32 %v1342_v54, %v1245_v56 }
 0x185   : > { %v4201_v57 = vpop.f32.mrf.mxu2 }
 0x186   : > { %5786 = vst [vmem:[#allocation4_spill] sm:$0xff] %v4201_v57 }
 0x188   : > { %v1387_v60 = vpop.f32.mrf.mxu3 }
 0x189   : > { %v1388_v1 = vadd.f32 %v1387_v60, %v1290_v21  ;;  %v1385_v60 = vadd.f32 %v1384_v53, %v4157_v24 }
 0x18b   : > { %v4205_v4 = vpop.f32.mrf.mxu0  ;;  %v1349_v49 = vpop.f32.mrf.mxu1 }
 0x18d   : > { %v4207_v5 = vpop.f32.mrf.mxu2 }
 0x18e   : > { %5787 = vst [vmem:[#allocation5_spill] sm:$0xff] %v4207_v5 }
 0x192   : > { %3565 = vmatmul.msk.bf16.gmra.mxu2 %vm1194_vm8, %v4050_v25 }
 0x193   : > { %v1250_v58 = vpop.f32.mrf.mxu0  ;;  %v1352_v19 = vpop.f32.mrf.mxu1 }
 0x194   : > { %v1348_v8 = vadd.f32 %v1347_v50, %v1250_v58 }
 0x195   : > { %v4211_v7 = vpop.f32.mrf.mxu2 }
 0x196   : > { %5788 = vst [vmem:[#allocation6_spill] sm:$0xff] %v4211_v7 }
 0x19b   : > { %v1354_v28 = vpop.f32.mrf.mxu1 }
 0x19d   : > { %v4213_v10 = vpop.f32.mrf.mxu2 }
 0x19e   : > { %5789 = vst [vmem:[#allocation7_spill] sm:$0xff] %v4213_v10 }
 0x1a2   : > { %3566 = vmatmul.msk.bf16.gmra.mxu2 %vm1194_vm8, %v4057_v35 }
 0x1a3   : > { %v1357_v39 = vpop.f32.mrf.mxu1 }
 0x1a5   : > { %v1434_v11 = vpop.f32.mrf.mxu2 }
 0x1a6   : > { %v4217_v12 = vadd.f32 %v1434_v11, %v1338_v45 }
 0x1ab   : > { %v1359_v56 = vpop.f32.mrf.mxu1 }
 0x1ad   : > { %v1436_v13 = vpop.f32.mrf.mxu2 }
 0x1b2   : > { %3567 = vmatmul.msk.bf16.gmra.mxu2 %vm1194_vm8, %v4074_v52 }
 0x1b3   : > { %v1362_v2 = vpop.f32.mrf.mxu1 }
 0x1b5   : > { %v1439_v14 = vpop.f32.mrf.mxu2 }
 0x1b6   : > { %v4221_v37 = vadd.f32 %v1439_v14, %v1343_v59 }
 0x1bd   : > { %v1441_v25 = vpop.f32.mrf.mxu2 }
 0x1c2   : > { %3568 = vmatmul.msk.bf16.gmra.mxu2 %vm1194_vm8, %v4087_v63 }
 0x1c5   : > { %v1444_v15 = vpop.f32.mrf.mxu2 }
 0x1c6   : > { %v4225_v51 = vadd.f32 %v1444_v15, %v1348_v8  ;;  %v1364_v15 = vpop.f32.mrf.mxu1 }
 0x1cd   : > { %v4227_v29 = vpop.f32.mrf.mxu2 }
 0x1ce   : > { %v1367_v24 = vpop.f32.mrf.mxu1 }
 0x1d2   : > { %3569 = vmatmul.msk.bf16.gmra.mxu2 %vm1194_vm8, %v4094_v6 }
 0x1d5   : > { %v4231_v35 = vpop.f32.mrf.mxu2 }
 0x1d6   : > { %v1369_v42 = vpop.f32.mrf.mxu1 }
 0x1dd   : > { %v4233_v16 = vpop.f32.mrf.mxu2 }
 0x1e2   : > { %3570 = vmatmul.msk.bf16.gmra.mxu2 %vm1194_vm8, %v4084_v34  ;;  %v1252_v34 = vpop.f32.mrf.mxu0 }
 0x1e3   : > { %v1350_v57 = vadd.f32 %v1349_v49, %v1252_v34  ;;  %v1555_v34 = vsel %vm1102_vm6, %v4225_v51, 0.0 }
 0x1e5   : > { %v4237_v52 = vpop.f32.mrf.mxu2 }
 0x1ea   : > { %v1255_v23 = vpop.f32.mrf.mxu0 }
 0x1ed   : > { %v4239_v22 = vpop.f32.mrf.mxu2 }
 0x1f2   : > { %3571 = vmatmul.msk.bf16.gmra.mxu2 %vm1194_vm8, %v4125_v61  ;;  %v1257_v21 = vpop.f32.mrf.mxu0 }
 0x1f3   : > { %v1355_v49 = vadd.f32 %v1354_v28, %v1257_v21 }
 0x1f5   : > { %v4243_v63 = vpop.f32.mrf.mxu2 }
 0x1fa   : > { %v1260_v45 = vpop.f32.mrf.mxu0 }
 0x1fd   : > { %v4245_v17 = vpop.f32.mrf.mxu2 }
 0x202   : > { %3572 = vmatmul.msk.bf16.gmra.mxu2 %vm1194_vm8, %v4108_v20  ;;  %v1262_v59 = vpop.f32.mrf.mxu0 }
 0x205   : > { %v4249_v6 = vpop.f32.mrf.mxu2 }
 0x20a   : > { %v1265_v43 = vpop.f32.mrf.mxu0 }
 0x20d   : > { %v4251_v47 = vpop.f32.mrf.mxu2 }
 0x212   : > { %3573 = vmatmul.msk.bf16.gmra.mxu2 %vm1194_vm8, %v4125_v61  ;;  %v4265_v61 = vpop.f32.mrf.mxu3 }
 0x215   : > { %v4255_v18 = vpop.f32.mrf.mxu2 }
 0x21d   : > { %v4257_v26 = vpop.f32.mrf.mxu2 }
 0x225   : > { %v1474_v31 = vpop.f32.mrf.mxu2 }
 0x226   : > { %v4260_v20 = vadd.f32 %v1474_v31, %v4186_v38  ;;  %v4272_v38 = vpop.f32.mrf.mxu3  ;;  %v1267_v31 = vpop.f32.mrf.mxu0 }
 0x22d   : > { %v1476_v40 = vpop.f32.mrf.mxu2 }
 0x22e   : > { %v4263_v55 = vadd.f32 %v1476_v40, %v1380_v0  ;;  %v4276_v14 = vpop.f32.mrf.mxu3  ;;  %v1270_v53 = vpop.f32.mrf.mxu0 }
 0x235   : > { %v1479_v27 = vpop.f32.mrf.mxu2 }
 0x236   : > { %v4267_v54 = vadd.f32 %v1479_v27, %v1383_v48  ;;  %v4280_v0 = vpop.f32.mrf.mxu3  ;;  %v1340_v27 = vadd.f32 %v4193_v46, %v4195_v33  ;;  %v1272_v10 = vpop.f32.mrf.mxu0  ;;  %v1548_v46 = vsel %vm1102_vm6, %v4217_v12, 0.0  ;;  %v1551_v33 = vsel %vm1102_vm6, %v4221_v37, 0.0 }
 0x23d   : > { %v1481_v58 = vpop.f32.mrf.mxu2 }
 0x23e   : > { %v4270_v50 = vadd.f32 %v1481_v58, %v1385_v60  ;;  %v4286_v60 = vpop.f32.mrf.mxu3 }
 0x245   : > { %v1484_v8 = vpop.f32.mrf.mxu2 }
 0x246   : > { %v4274_v11 = vadd.f32 %v1484_v8, %v1388_v1  ;;  %v4290_v1 = vadd.f32 %v1436_v13, %v1340_v27  ;;  %v1345_v8 = vadd.f32 %v4203_v3, %v4205_v4  ;;  %v1353_v27 = vadd.f32 %v1352_v19, %v1255_v23 }
 0x247   : > { %v4307_v4 = vadd.f32 %v4227_v29, %v1350_v57  ;;  %v4319_v23 = vadd.f32 %v4233_v16, %v1355_v49  ;;  %v1372_v57 = vpop.f32.mrf.mxu1 }
 0x248   : > { %5790 = vst [vmem:[#allocation8_spill] sm:$0xff] %v4290_v1  ;;  %v1549_v7 = vsel %vm1102_vm6, %v4290_v1, 0.0  ;;  %v4296_v5 = vadd.f32 %v1441_v25, %v1345_v8  ;;  %v4309_v25 = vpop.f32.mrf.mxu3  ;;  %v4314_v8 = vadd.f32 %v4231_v35, %v1353_v27 }
 0x249   : > { %v1550_v9 = vadd.f32 %v1549_v7, %v1548_v46  ;;  %v1358_v46 = vadd.f32 %v1357_v39, %v1260_v45  ;;  %v1557_v19 = vsel %vm1102_vm6, %v4307_v4, 0.0  ;;  %v1363_v39 = vadd.f32 %v1362_v2, %v1265_v43 }
 0x24a   : > { %v1553_v3 = vsel %vm1102_vm6, %v4296_v5, 0.0  ;;  %v1559_v28 = vsel %vm1102_vm6, %v4314_v8, 0.0  ;;  %v1561_v45 = vsel %vm1102_vm6, %v4319_v23, 0.0 }
 0x24b   : > { %v1552_v1 = vadd.f32 %v1551_v33, %v1550_v9  ;;  %v1275_v9 = vpop.f32.mrf.mxu0  ;;  %v1360_v33 = vadd.f32 %v1359_v56, %v1262_v59  ;;  %v4324_v21 = vadd.f32 %v4237_v52, %v1358_v46  ;;  %v4336_v59 = vadd.f32 %v4243_v63, %v1363_v39 }
 0x24d   : > { %v4278_v48 = vpop.f32.mrf.mxu2  ;;  %v1554_v7 = vadd.f32 %v1553_v3, %v1552_v1  ;;  %v4331_v16 = vadd.f32 %v4239_v22, %v1360_v33  ;;  %v1365_v3 = vadd.f32 %v1364_v15, %v1267_v31  ;;  %v1563_v56 = vsel %vm1102_vm6, %v4324_v21, 0.0 }
 0x24e   : > { %v1370_v22 = vadd.f32 %v1369_v42, %v1272_v10  ;;  %v1567_v15 = vsel %vm1102_vm6, %v4336_v59, 0.0  ;;  %v1373_v33 = vadd.f32 %v1372_v57, %v1275_v9 }
 0x24f   : > { %v1556_v29 = vadd.f32 %v1555_v34, %v1554_v7  ;;  %v1368_v34 = vadd.f32 %v1367_v24, %v1270_v53  ;;  %v1565_v2 = vsel %vm1102_vm6, %v4331_v16, 0.0  ;;  %v4341_v43 = vadd.f32 %v4245_v17, %v1365_v3  ;;  %v1374_v46 = vpop.f32.mrf.mxu1 }
 0x250   : > { %v1404_v52 = vpop.f32.mrf.mxu3  ;;  %v4351_v53 = vadd.f32 %v4251_v47, %v1370_v22  ;;  %v4356_v10 = vadd.f32 %v4255_v18, %v1373_v33  ;;  %v1579_v18 = vsel %vm1102_vm6, %v4260_v20, 0.0 }
 0x251   : > { %v1558_v35 = vadd.f32 %v1557_v19, %v1556_v29  ;;  %v4346_v31 = vadd.f32 %v4249_v6, %v1368_v34  ;;  %v1569_v24 = vsel %vm1102_vm6, %v4341_v43, 0.0  ;;  %v1581_v34 = vsel %vm1102_vm6, %v4263_v55, 0.0 }
 0x252   : > { %v1575_v47 = vsel %vm1102_vm6, %v4356_v10, 0.0 }
 0x253   : > { %v1560_v1 = vadd.f32 %v1559_v28, %v1558_v35  ;;  %v1277_v19 = vpop.f32.mrf.mxu0  ;;  %v1571_v42 = vsel %vm1102_vm6, %v4346_v31, 0.0  ;;  %v1573_v35 = vsel %vm1102_vm6, %v4351_v53, 0.0 }
 0x254   : > { %v1375_v28 = vadd.f32 %v1374_v46, %v1277_v19  ;;  %v1585_v19 = vsel %vm1102_vm6, %v4270_v50, 0.0 }
 0x255   : > { %v4282_v40 = vpop.f32.mrf.mxu2  ;;  %v1562_v49 = vadd.f32 %v1561_v45, %v1560_v1 }
 0x256   : > { %v4361_v57 = vadd.f32 %v4257_v26, %v1375_v28 }
 0x257   : > { %v1564_v7 = vadd.f32 %v1563_v56, %v1562_v49 }
 0x258   : > { %v1407_v9 = vpop.f32.mrf.mxu3  ;;  %v1577_v3 = vsel %vm1102_vm6, %v4361_v57, 0.0 }
 0x259   : > { %v1566_v63 = vadd.f32 %v1565_v2, %v1564_v7  ;;  %v1390_v2 = vadd.f32 %v4265_v61, %v4167_v30  ;;  %v1583_v7 = vsel %vm1102_vm6, %v4267_v54, 0.0  ;;  %v1587_v30 = vsel %vm1102_vm6, %v4274_v11, 0.0 }
 0x25b   : > { %v1568_v17 = vadd.f32 %v1567_v15, %v1566_v63  ;;  %v1393_v63 = vadd.f32 %v4272_v38, %v4175_v32  ;;  %v4380_v33 = vadd.f32 %v4278_v48, %v1390_v2  ;;  %v1398_v32 = vadd.f32 %v4280_v0, %v4182_v36 }
 0x25c   : > { %v1403_v36 = vadd.f32 %v4309_v25, %v4191_v44 }
 0x25d   : > { %v4288_v58 = vpop.f32.mrf.mxu2  ;;  %v1570_v6 = vadd.f32 %v1569_v24, %v1568_v17  ;;  %v1395_v17 = vadd.f32 %v4276_v14, %v4179_v62  ;;  %v4387_v61 = vadd.f32 %v4282_v40, %v1393_v63  ;;  %v1589_v38 = vsel %vm1102_vm6, %v4380_v33, 0.0 }
 0x25e   : > { %v1400_v62 = vadd.f32 %v4286_v60, %v4188_v41  ;;  %v5791_v41 = vld [vmem:[#allocation3_spill] sm:$0xff] }
 0x25f   : > { %v1572_v39 = vadd.f32 %v1571_v42, %v1570_v6  ;;  %v4394_v48 = vadd.f32 %v4288_v58, %v1395_v17  ;;  %v1591_v14 = vsel %vm1102_vm6, %v4387_v61, 0.0  ;;  %v1405_v60 = vadd.f32 %v1404_v52, %v5791_v41 }
 0x260   : > { %v1409_v22 = vpop.f32.mrf.mxu3 }
 0x261   : > { %v1574_v45 = vadd.f32 %v1573_v35, %v1572_v39  ;;  %v1593_v0 = vsel %vm1102_vm6, %v4394_v48, 0.0 }
 0x263   : > { %v1576_v56 = vadd.f32 %v1575_v47, %v1574_v45 }
 0x265   : > { %v4302_v13 = vpop.f32.mrf.mxu2  ;;  %v1578_v49 = vadd.f32 %v1577_v3, %v1576_v56  ;;  %v5792_v56 = vld [vmem:[#allocation4_spill] sm:$0xff] }
 0x266   : > { %v4401_v40 = vadd.f32 %v4302_v13, %v1398_v32  ;;  %v5795_v32 = vld [vmem:[#allocation7_spill] sm:$0xff] }
 0x267   : > { %v1580_v26 = vadd.f32 %v1579_v18, %v1578_v49  ;;  %v1408_v18 = vadd.f32 %v1407_v9, %v5792_v56 }
 0x268   : > { %v1412_v39 = vpop.f32.mrf.mxu3  ;;  %v1595_v45 = vsel %vm1102_vm6, %v4401_v40, 0.0 }
 0x269   : > { %v1582_v46 = vadd.f32 %v1581_v34, %v1580_v26 }
 0x26b   : > { %v1584_v24 = vadd.f32 %v1583_v7, %v1582_v46 }
 0x26d   : > { %v4326_v27 = vpop.f32.mrf.mxu2  ;;  %v1586_v28 = vadd.f32 %v1585_v19, %v1584_v24 }
 0x26e   : > { %v4408_v58 = vadd.f32 %v4326_v27, %v1400_v62  ;;  %v5793_v27 = vld [vmem:[#allocation5_spill] sm:$0xff] }
 0x26f   : > { %v1588_v42 = vadd.f32 %v1587_v30, %v1586_v28  ;;  %v1410_v34 = vadd.f32 %v1409_v22, %v5793_v27  ;;  %v3705_v30 = vmov 256.0  }
 0x270   : > { %v1597_v44 = vsel %vm1102_vm6, %v4408_v58, 0.0  ;;  %v1414_v22 = vpop.f32.mrf.mxu3  ;;  %3657 = vrcp.f32 %v3705_v30 }
 0x271   : > { %v1590_v6 = vadd.f32 %v1589_v38, %v1588_v42  ;;  %v1415_v38 = vadd.f32 %v1414_v22, %v5795_v32 }
 0x273   : > { %v1592_v47 = vadd.f32 %v1591_v14, %v1590_v6 }
 0x275   : > { %v1499_v29 = vpop.f32.mrf.mxu2  ;;  %v1594_v3 = vadd.f32 %v1593_v0, %v1592_v47 }
 0x276   : > { %v4413_v13 = vadd.f32 %v1499_v29, %v1403_v36  ;;  %v5794_v29 = vld [vmem:[#allocation6_spill] sm:$0xff] }
 0x277   : > { %v1596_v49 = vadd.f32 %v1595_v45, %v1594_v3  ;;  %v1413_v46 = vadd.f32 %v1412_v39, %v5794_v29 }
 0x278   : > { %v1599_v26 = vsel %vm1102_vm6, %v4413_v13, 0.0 }
 0x279   : > { %v1598_v2 = vadd.f32 %v1597_v44, %v1596_v49 }
 0x27b   : > { %v1600_v19 = vadd.f32 %v1599_v26, %v1598_v2 }
 0x27d   : > { %v1501_v1 = vpop.f32.mrf.mxu2 }
 0x27e   : > { %v4418_v25 = vadd.f32 %v1501_v1, %v1405_v60 }
 0x280   : > { %v1601_v9 = vsel %vm1102_vm6, %v4418_v25, 0.0 }
 0x281   : > { %v1602_v17 = vadd.f32 %v1601_v9, %v1600_v19 }
 0x285   : > { %v1504_v15 = vpop.f32.mrf.mxu2 }
 0x286   : > { %v4423_v52 = vadd.f32 %v1504_v15, %v1408_v18 }
 0x288   : > { %v1603_v1 = vsel %vm1102_vm6, %v4423_v52, 0.0 }
 0x289   : > { %v1604_v28 = vadd.f32 %v1603_v1, %v1602_v17 }
 0x28d   : > { %v1506_v35 = vpop.f32.mrf.mxu2 }
 0x28e   : > { %v4428_v63 = vadd.f32 %v1506_v35, %v1410_v34  ;;  %v3658_v35 = vpop.eup %3657 }
 0x28f   : > { %v1618_v47 = vmul.f32 256.0, %v3658_v35  ;;  %vm1622_vm9 = vweird.f32 %v3658_v35 }
 0x290   : > { %v1605_v15 = vsel %vm1102_vm6, %v4428_v63, 0.0 }
 0x291   : > { %v1606_v62 = vadd.f32 %v1605_v15, %v1604_v28  ;;  %v1619_v45 = vsub.f32 1.0, %v1618_v47 }
 0x293   : > { %v1620_v18 = vmul.f32 %v3658_v35, %v1619_v45 }
 0x295   : > { %v1509_v7 = vpop.f32.mrf.mxu2  ;;  %v1621_v49 = vadd.f32 %v3658_v35, %v1620_v18 }
 0x296   : > { %v4432_v24 = vadd.f32 %v1509_v7, %v1413_v46  ;;  %v5797_v7 = vld [vmem:[#allocation8_spill] sm:$0xff] }
 0x297   : > { %v4443_v34 = vsel %vm1622_vm9, %v3658_v35, %v1621_v49 }
 0x298   : > { %v1607_v42 = vsel %vm1102_vm6, %v4432_v24, 0.0  ;;  %5796 = vst [vmem:[#allocation3_spill] sm:$0xff] %v4443_v34 }
 0x299   : > { %v1608_v36 = vadd.f32 %v1607_v42, %v1606_v62 }
 0x29d   : > { %v1511_v14 = vpop.f32.mrf.mxu2 }
 0x29e   : > { %v4439_v6 = vadd.f32 %v1511_v14, %v1415_v38 }
 0x2a0   : > { %v1609_v0 = vsel %vm1102_vm6, %v4439_v6, 0.0 }
 0x2a1   : > { %v1610_v39 = vadd.f32 %v1609_v0, %v1608_v36 }
 0x2a3   : > { %v1611_v41 = vrot.slane %v1610_v39, 4 }
 0x2a5   : > { %v1612_v60 = vadd.f32 %v1611_v41, %v1610_v39 }
 0x2a7   : > { %v1613_v3 = vrot.slane %v1612_v60, 2 }
 0x2a9   : > { %v1614_v56 = vadd.f32 %v1613_v3, %v1612_v60 }
 0x2ab   : > { %v1615_v44 = vrot.slane %v1614_v56, 1 }
 0x2ad   : > { %v1616_v27 = vadd.f32 %v1615_v44, %v1614_v56 }
 0x2af   : > { %v4446_v26 = vmul.f32 %v4443_v34, %v1616_v27 }
 0x2b1   : > { %v1625_v2 = vsub.f32 %v4217_v12, %v4446_v26  ;;  %v1626_v29 = vsub.f32 %v5797_v7, %v4446_v26  ;;  %v1627_v46 = vsub.f32 %v4221_v37, %v4446_v26  ;;  %v1628_v9 = vsub.f32 %v4296_v5, %v4446_v26 }
 0x2b2   : > { %v1629_v22 = vsub.f32 %v4225_v51, %v4446_v26  ;;  %v1630_v30 = vsub.f32 %v4307_v4, %v4446_v26  ;;  %v1631_v42 = vsub.f32 %v4314_v8, %v4446_v26  ;;  %v1632_v36 = vsub.f32 %v4319_v23, %v4446_v26 }
 0x2b3   : > { %v1657_v19 = vmul.f32 %v1625_v2, %v1625_v2  ;;  %v1658_v1 = vmul.f32 %v1626_v29, %v1626_v29  ;;  %v1659_v17 = vmul.f32 %v1627_v46, %v1627_v46  ;;  %v1660_v15 = vmul.f32 %v1628_v9, %v1628_v9 }
 0x2b4   : > { %v1661_v62 = vmul.f32 %v1629_v22, %v1629_v22  ;;  %v1662_v0 = vmul.f32 %v1630_v30, %v1630_v30  ;;  %v1633_v41 = vsub.f32 %v4324_v21, %v4446_v26  ;;  %v1663_v60 = vmul.f32 %v1631_v42, %v1631_v42 }
 0x2b5   : > { %v1689_v28 = vsel %vm1102_vm6, %v1657_v19, 0.0  ;;  %v1690_v32 = vsel %vm1102_vm6, %v1658_v1, 0.0  ;;  %v1692_v14 = vsel %vm1102_vm6, %v1659_v17, 0.0  ;;  %v1694_v39 = vsel %vm1102_vm6, %v1660_v15, 0.0 }
 0x2b6   : > { %v1691_v38 = vadd.f32 %v1690_v32, %v1689_v28  ;;  %v1696_v45 = vsel %vm1102_vm6, %v1661_v62, 0.0  ;;  %v1634_v56 = vsub.f32 %v4331_v16, %v4446_v26  ;;  %v1664_v18 = vmul.f32 %v1632_v36, %v1632_v36 }
 0x2b7   : > { %v1698_v44 = vsel %vm1102_vm6, %v1662_v0, 0.0  ;;  %v1635_v27 = vsub.f32 %v4336_v59, %v4446_v26  ;;  %v1665_v2 = vmul.f32 %v1633_v41, %v1633_v41  ;;  %v1700_v29 = vsel %vm1102_vm6, %v1663_v60, 0.0 }
 0x2b8   : > { %v1693_v35 = vadd.f32 %v1692_v14, %v1691_v38  ;;  %v1636_v9 = vsub.f32 %v4341_v43, %v4446_v26  ;;  %v1666_v19 = vmul.f32 %v1634_v56, %v1634_v56  ;;  %v1702_v1 = vsel %vm1102_vm6, %v1664_v18, 0.0 }
 0x2b9   : > { %v1637_v17 = vsub.f32 %v4346_v31, %v4446_v26  ;;  %v1667_v30 = vmul.f32 %v1635_v27, %v1635_v27  ;;  %v1704_v15 = vsel %vm1102_vm6, %v1665_v2, 0.0  ;;  %v1638_v32 = vsub.f32 %v4351_v53, %v4446_v26 }
 0x2ba   : > { %v1695_v47 = vadd.f32 %v1694_v39, %v1693_v35  ;;  %v1668_v38 = vmul.f32 %v1636_v9, %v1636_v9  ;;  %v1706_v42 = vsel %vm1102_vm6, %v1666_v19, 0.0  ;;  %v1639_v14 = vsub.f32 %v4356_v10, %v4446_v26 }
 0x2bb   : > { %v1669_v35 = vmul.f32 %v1637_v17, %v1637_v17  ;;  %v1708_v36 = vsel %vm1102_vm6, %v1667_v30, 0.0  ;;  %v1640_v39 = vsub.f32 %v4361_v57, %v4446_v26 }
 0x2bc   : > { %v1697_v3 = vadd.f32 %v1696_v45, %v1695_v47  ;;  %v1670_v47 = vmul.f32 %v1638_v32, %v1638_v32  ;;  %v1710_v41 = vsel %vm1102_vm6, %v1668_v38, 0.0  ;;  %v1641_v45 = vsub.f32 %v4260_v20, %v4446_v26 }
 0x2bd   : > { %v1712_v56 = vsel %vm1102_vm6, %v1669_v35, 0.0 }
 0x2be   : > { %v1699_v49 = vadd.f32 %v1698_v44, %v1697_v3  ;;  %v1671_v3 = vmul.f32 %v1639_v14, %v1639_v14  ;;  %v1642_v44 = vsub.f32 %v4263_v55, %v4446_v26  ;;  %v1714_v27 = vsel %vm1102_vm6, %v1670_v47, 0.0 }
 0x2c0   : > { %v1701_v46 = vadd.f32 %v1700_v29, %v1699_v49  ;;  %v1672_v49 = vmul.f32 %v1640_v39, %v1640_v39  ;;  %v1643_v29 = vsub.f32 %v4267_v54, %v4446_v26  ;;  %v1716_v9 = vsel %vm1102_vm6, %v1671_v3, 0.0 }
 0x2c2   : > { %v1703_v22 = vadd.f32 %v1702_v1, %v1701_v46  ;;  %v1673_v46 = vmul.f32 %v1641_v45, %v1641_v45  ;;  %v1644_v1 = vsub.f32 %v4270_v50, %v4446_v26  ;;  %v1718_v17 = vsel %vm1102_vm6, %v1672_v49, 0.0 }
 0x2c4   : > { %v1705_v28 = vadd.f32 %v1704_v15, %v1703_v22  ;;  %v1674_v22 = vmul.f32 %v1642_v44, %v1642_v44  ;;  %v1645_v15 = vsub.f32 %v4274_v11, %v4446_v26  ;;  %v1720_v32 = vsel %vm1102_vm6, %v1673_v46, 0.0 }
 0x2c6   : > { %v1707_v62 = vadd.f32 %v1706_v42, %v1705_v28  ;;  %v1675_v28 = vmul.f32 %v1643_v29, %v1643_v29  ;;  %v1646_v42 = vsub.f32 %v4380_v33, %v4446_v26  ;;  %v1722_v14 = vsel %vm1102_vm6, %v1674_v22, 0.0 }
 0x2c8   : > { %v1709_v0 = vadd.f32 %v1708_v36, %v1707_v62  ;;  %v1676_v62 = vmul.f32 %v1644_v1, %v1644_v1  ;;  %v1647_v36 = vsub.f32 %v4387_v61, %v4446_v26  ;;  %v1724_v39 = vsel %vm1102_vm6, %v1675_v28, 0.0 }
 0x2ca   : > { %v1711_v60 = vadd.f32 %v1710_v41, %v1709_v0  ;;  %v1677_v0 = vmul.f32 %v1645_v15, %v1645_v15  ;;  %v1648_v41 = vsub.f32 %v4394_v48, %v4446_v26  ;;  %v1726_v45 = vsel %vm1102_vm6, %v1676_v62, 0.0 }
 0x2cc   : > { %v1713_v18 = vadd.f32 %v1712_v56, %v1711_v60  ;;  %v1678_v60 = vmul.f32 %v1646_v42, %v1646_v42  ;;  %v1649_v56 = vsub.f32 %v4401_v40, %v4446_v26  ;;  %v1728_v44 = vsel %vm1102_vm6, %v1677_v0, 0.0 }
 0x2ce   : > { %v1715_v2 = vadd.f32 %v1714_v27, %v1713_v18  ;;  %v1679_v18 = vmul.f32 %v1647_v36, %v1647_v36  ;;  %v1650_v27 = vsub.f32 %v4408_v58, %v4446_v26  ;;  %v1730_v29 = vsel %vm1102_vm6, %v1678_v60, 0.0 }
 0x2d0   : > { %v1717_v19 = vadd.f32 %v1716_v9, %v1715_v2  ;;  %v1680_v2 = vmul.f32 %v1648_v41, %v1648_v41  ;;  %v1651_v9 = vsub.f32 %v4413_v13, %v4446_v26  ;;  %v1732_v1 = vsel %vm1102_vm6, %v1679_v18, 0.0 }
 0x2d2   : > { %v1719_v30 = vadd.f32 %v1718_v17, %v1717_v19  ;;  %v1681_v19 = vmul.f32 %v1649_v56, %v1649_v56  ;;  %v1652_v17 = vsub.f32 %v4418_v25, %v4446_v26  ;;  %v1734_v15 = vsel %vm1102_vm6, %v1680_v2, 0.0 }
 0x2d4   : > { %v1721_v38 = vadd.f32 %v1720_v32, %v1719_v30  ;;  %v1682_v30 = vmul.f32 %v1650_v27, %v1650_v27  ;;  %v1653_v32 = vsub.f32 %v4423_v52, %v4446_v26  ;;  %v1736_v42 = vsel %vm1102_vm6, %v1681_v19, 0.0 }
 0x2d6   : > { %v1723_v35 = vadd.f32 %v1722_v14, %v1721_v38  ;;  %v1683_v38 = vmul.f32 %v1651_v9, %v1651_v9  ;;  %v1654_v14 = vsub.f32 %v4428_v63, %v4446_v26  ;;  %v1738_v36 = vsel %vm1102_vm6, %v1682_v30, 0.0 }
 0x2d8   : > { %v1725_v47 = vadd.f32 %v1724_v39, %v1723_v35  ;;  %v1684_v35 = vmul.f32 %v1652_v17, %v1652_v17  ;;  %v1655_v39 = vsub.f32 %v4432_v24, %v4446_v26  ;;  %v1740_v41 = vsel %vm1102_vm6, %v1683_v38, 0.0 }
 0x2da   : > { %v1727_v3 = vadd.f32 %v1726_v45, %v1725_v47  ;;  %v1685_v47 = vmul.f32 %v1653_v32, %v1653_v32  ;;  %v1656_v45 = vsub.f32 %v4439_v6, %v4446_v26  ;;  %v1742_v56 = vsel %vm1102_vm6, %v1684_v35, 0.0 }
 0x2dc   : > { %v1729_v49 = vadd.f32 %v1728_v44, %v1727_v3  ;;  %v1686_v3 = vmul.f32 %v1654_v14, %v1654_v14  ;;  %v1687_v44 = vmul.f32 %v1655_v39, %v1655_v39  ;;  %v1688_v2 = vmul.f32 %v1656_v45, %v1656_v45 }
 0x2de   : > { %v1731_v46 = vadd.f32 %v1730_v29, %v1729_v49  ;;  %v1744_v49 = vsel %vm1102_vm6, %v1685_v47, 0.0  ;;  %v1746_v29 = vsel %vm1102_vm6, %v1686_v3, 0.0  ;;  %v1748_v9 = vsel %vm1102_vm6, %v1687_v44, 0.0  ;;  %v1546_v47 = vld [vmem:[%s5766_s2] sm:$0x1] }
 0x2df   : > { %v1547_v3 = vld [vmem:[%s5767_s3] sm:$0x1] }
 0x2e0   : > { %v1733_v22 = vadd.f32 %v1732_v1, %v1731_v46  ;;  %v1750_v1 = vsel %vm1102_vm6, %v1688_v2, 0.0 }
 0x2e2   : > { %v1735_v28 = vadd.f32 %v1734_v15, %v1733_v22 }
 0x2e4   : > { %v1737_v62 = vadd.f32 %v1736_v42, %v1735_v28 }
 0x2e6   : > { %v1739_v0 = vadd.f32 %v1738_v36, %v1737_v62 }
 0x2e8   : > { %v1741_v60 = vadd.f32 %v1740_v41, %v1739_v0 }
 0x2ea   : > { %v1743_v18 = vadd.f32 %v1742_v56, %v1741_v60 }
 0x2ec   : > { %v1745_v27 = vadd.f32 %v1744_v49, %v1743_v18 }
 0x2ee   : > { %v1747_v46 = vadd.f32 %v1746_v29, %v1745_v27 }
 0x2f0   : > { %v1749_v19 = vadd.f32 %v1748_v9, %v1747_v46 }
 0x2f2   : > { %v1751_v22 = vadd.f32 %v1750_v1, %v1749_v19 }
 0x2f4   : > { %v1752_v17 = vrot.slane %v1751_v22, 4 }
 0x2f6   : > { %v1753_v30 = vadd.f32 %v1752_v17, %v1751_v22 }
 0x2f8   : > { %v1754_v15 = vrot.slane %v1753_v30, 2 }
 0x2fa   : > { %v1755_v28 = vadd.f32 %v1754_v15, %v1753_v30 }
 0x2fc   : > { %v1756_v32 = vrot.slane %v1755_v28, 1 }
 0x2fe   : > { %v1757_v38 = vadd.f32 %v1756_v32, %v1755_v28 }
 0x300   : > { %v1758_v42 = vmul.f32 %v1757_v38, %v4443_v34 }
 0x302   : > { %v1759_v62 = vadd.f32 1e-05, %v1758_v42 }
 0x304   : > { %3659 = vrsqrt.f32 %v1759_v62  ;;  %vm1766_vm11 = vweird.f32 %v1759_v62 }
 0x30a   : > { %v3660_v14 = vpop.eup %3659 }
 0x30b   : > { %v1761_v35 = vmul.f32 %v3660_v14, %v1759_v62  ;;  %vm1767_vm10 = vweird.f32 %v3660_v14 }
 0x30c   : > { %vm1768_vm12 = vmor %vm1766_vm11, %vm1767_vm10 }
 0x30d   : > { %v1762_v36 = vmul.f32 %v3660_v14, %v1761_v35 }
 0x30f   : > { %v1763_v0 = vmul.f32 0.5, %v1762_v36 }
 0x311   : > { %v1764_v39 = vsub.f32 1.5, %v1763_v0 }
 0x313   : > { %v1765_v41 = vmul.f32 %v3660_v14, %v1764_v39 }
 0x315   : > { %v1769_v60 = vsel %vm1768_vm12, %v3660_v14, %v1765_v41 }
 0x316   : > { %v1770_v45 = vmul.f32 %v1769_v60, %v1546_v47 }
 0x318   : > { %v1771_v56 = vmul.f32 %v1770_v45, %v4446_v26  ;;  %v1773_v18 = vperm.slane %v1770_v45, 0 }
 0x31a   : > { %v1772_v44 = vsub.f32 %v1547_v3, %v1771_v56  ;;  %v1804_v49 = vmul.f32 %v1773_v18, %v4432_v24  ;;  %v1805_v27 = vmul.f32 %v1773_v18, %v4439_v6  ;;  %v1774_v24 = vmul.f32 %v1773_v18, %v4217_v12 }
 0x31b   : > { %v1775_v6 = vmul.f32 %v1773_v18, %v5797_v7  ;;  %v1776_v15 = vmul.f32 %v1773_v18, %v4221_v37  ;;  %v1777_v28 = vmul.f32 %v1773_v18, %v4296_v5  ;;  %v1778_v32 = vmul.f32 %v1773_v18, %v4225_v51 }
 0x31c   : > { %v4554_v2 = vperm.slane %v1772_v44, 0  ;;  %v1798_v38 = vmul.f32 %v1773_v18, %v4401_v40  ;;  %v1799_v42 = vmul.f32 %v1773_v18, %v4408_v58  ;;  %v1800_v62 = vmul.f32 %v1773_v18, %v4413_v13 }
 0x31d   : > { %v1801_v14 = vmul.f32 %v1773_v18, %v4418_v25  ;;  %v1779_v35 = vmul.f32 %v1773_v18, %v4307_v4  ;;  %v1780_v12 = vmul.f32 %v1773_v18, %v4314_v8  ;;  %v1802_v7 = vmul.f32 %v1773_v18, %v4423_v52 }
 0x31e   : > { %v1839_v29 = vadd.f32 %v4554_v2, %v1804_v49  ;;  %v1840_v46 = vadd.f32 %v4554_v2, %v1805_v27  ;;  %v1803_v37 = vmul.f32 %v1773_v18, %v4428_v63  ;;  %v4577_v5 = vadd.f32 %v4554_v2, %v1798_v38 }
 0x31f   : > { %v4580_v51 = vadd.f32 %v4554_v2, %v1799_v42  ;;  %v4583_v40 = vadd.f32 %v4554_v2, %v1800_v62  ;;  %v4586_v58 = vadd.f32 %v4554_v2, %v1801_v14  ;;  %v1781_v4 = vmul.f32 %v1773_v18, %v4319_v23 }
 0x320   : > { %v1871_v9 = vmax.f32 %v1839_v29, 0.0  ;;  %v1872_v19 = vmax.f32 %v1840_v46, 0.0  ;;  %v1782_v8 = vmul.f32 %v1773_v18, %v4324_v21  ;;  %v4591_v13 = vadd.f32 %v4554_v2, %v1802_v7 }
 0x321   : > { %v4594_v25 = vadd.f32 %v4554_v2, %v1803_v37  ;;  %v1783_v52 = vmul.f32 %v1773_v18, %v4331_v16  ;;  %v1784_v63 = vmul.f32 %v1773_v18, %v4336_v59  ;;  %v1785_v36 = vmul.f32 %v1773_v18, %v4341_v43 }
 0x322   : > { %v1903_v1 = vpack.c.bf16 %v1871_v9, %v1871_v9  ;;  %v1904_v22 = vpack.c.bf16 %v1872_v19, %v1872_v19  ;;  %v1786_v0 = vmul.f32 %v1773_v18, %v4346_v31  ;;  %v1787_v39 = vmul.f32 %v1773_v18, %v4351_v53 }
 0x323   : > { %v1788_v23 = vmul.f32 %v1773_v18, %v4356_v10  ;;  %v1789_v21 = vmul.f32 %v1773_v18, %v4361_v57  ;;  %v1790_v47 = vmul.f32 %v1773_v18, %v4260_v20  ;;  %v1791_v41 = vmul.f32 %v1773_v18, %v4263_v55 }
 0x324   : > { %v4558_v17 = vunpack.c.l.b16 %v1903_v1  ;;  %v2048_v30 = vunpack.c.l.b16 %v1904_v22  ;;  %v1792_v60 = vmul.f32 %v1773_v18, %v4267_v54  ;;  %v1793_v16 = vmul.f32 %v1773_v18, %v4270_v50 }
 0x325   : > { %v1794_v59 = vmul.f32 %v1773_v18, %v4274_v11  ;;  %v1795_v43 = vmul.f32 %v1773_v18, %v4380_v33  ;;  %v1796_v31 = vmul.f32 %v1773_v18, %v4387_v61  ;;  %v1797_v53 = vmul.f32 %v1773_v18, %v4394_v48 }
 0x326   : > { %5798 = vst [vmem:[#allocation4_spill] sm:$0xff] %v4558_v17  ;;  %v4561_v26 = vpack.c.b16 %v2048_v30, %v4558_v17  ;;  %v2224_v45 = vpack.c.b16 %v2048_v30, %v2048_v30  ;;  %v1809_v10 = vadd.f32 %v4554_v2, %v1774_v24  ;;  %v1810_v57 = vadd.f32 %v4554_v2, %v1775_v6 }
 0x327   : > { %v1811_v20 = vadd.f32 %v4554_v2, %v1776_v15  ;;  %v1812_v55 = vadd.f32 %v4554_v2, %v1777_v28  ;;  %v1813_v50 = vadd.f32 %v4554_v2, %v1778_v32  ;;  %v1814_v11 = vadd.f32 %v4554_v2, %v1779_v35 }
 0x328   : > { %5799 = vst [vmem:[#allocation5_spill] sm:$0xff] %v4561_v26  ;;  %v1815_v33 = vadd.f32 %v4554_v2, %v1780_v12  ;;  %v1816_v61 = vadd.f32 %v4554_v2, %v1781_v4  ;;  %v1817_v48 = vadd.f32 %v4554_v2, %v1782_v8  ;;  %v1818_v3 = vadd.f32 %v4554_v2, %v1783_v52 }
 0x329   : > { %v1819_v56 = vadd.f32 %v4554_v2, %v1784_v63  ;;  %v4625_v44 = vshll.u32 %v2224_v45, 16  ;;  %v1820_v49 = vadd.f32 %v4554_v2, %v1785_v36  ;;  %v1821_v27 = vadd.f32 %v4554_v2, %v1786_v0 }
 0x32a   : > { %v1822_v29 = vadd.f32 %v4554_v2, %v1787_v39  ;;  %v1823_v46 = vadd.f32 %v4554_v2, %v1788_v23  ;;  %v1824_v9 = vadd.f32 %v4554_v2, %v1789_v21  ;;  %v1825_v19 = vadd.f32 %v4554_v2, %v1790_v47 }
 0x32b   : > { %5800 = vst [vmem:[#allocation6_spill] sm:$0xff] %v4625_v44  ;;  %v1826_v1 = vadd.f32 %v4554_v2, %v1791_v41  ;;  %v1827_v22 = vadd.f32 %v4554_v2, %v1792_v60  ;;  %v1828_v30 = vadd.f32 %v4554_v2, %v1793_v16  ;;  %v1829_v24 = vadd.f32 %v4554_v2, %v1794_v59 }
 0x32c   : > { %v1830_v6 = vadd.f32 %v4554_v2, %v1795_v43  ;;  %v1831_v15 = vadd.f32 %v4554_v2, %v1796_v31  ;;  %v4640_v28 = vadd.f32 %v4554_v2, %v1797_v53  ;;  %v1841_v32 = vmax.f32 %v1809_v10, 0.0 }
 0x32d   : > { %v1842_v38 = vmax.f32 %v1810_v57, 0.0  ;;  %v1843_v42 = vmax.f32 %v1811_v20, 0.0  ;;  %v1844_v62 = vmax.f32 %v1812_v55, 0.0  ;;  %v1845_v14 = vmax.f32 %v1813_v50, 0.0 }
 0x32e   : > { %v1846_v35 = vmax.f32 %v1814_v11, 0.0  ;;  %v1847_v12 = vmax.f32 %v1815_v33, 0.0  ;;  %v1848_v7 = vmax.f32 %v1816_v61, 0.0  ;;  %v1849_v37 = vmax.f32 %v1817_v48, 0.0 }
 0x32f   : > { %v1850_v4 = vmax.f32 %v1818_v3, 0.0  ;;  %v1851_v8 = vmax.f32 %v1819_v56, 0.0  ;;  %v1852_v52 = vmax.f32 %v1820_v49, 0.0  ;;  %v1853_v63 = vmax.f32 %v1821_v27, 0.0 }
 0x330   : > { %v1854_v36 = vmax.f32 %v1822_v29, 0.0  ;;  %v1855_v0 = vmax.f32 %v1823_v46, 0.0  ;;  %v1856_v39 = vmax.f32 %v1824_v9, 0.0  ;;  %v1857_v23 = vmax.f32 %v1825_v19, 0.0 }
 0x331   : > { %v1858_v21 = vmax.f32 %v1826_v1, 0.0  ;;  %v1859_v2 = vmax.f32 %v1827_v22, 0.0  ;;  %v1860_v47 = vmax.f32 %v1828_v30, 0.0  ;;  %v1861_v41 = vmax.f32 %v1829_v24, 0.0 }
 0x332   : > { %v1862_v60 = vmax.f32 %v1830_v6, 0.0  ;;  %v1863_v16 = vmax.f32 %v1831_v15, 0.0  ;;  %v1864_v59 = vmax.f32 %v4640_v28, 0.0  ;;  %v1865_v45 = vmax.f32 %v4577_v5, 0.0 }
 0x333   : > { %v1866_v43 = vmax.f32 %v4580_v51, 0.0  ;;  %v1867_v31 = vmax.f32 %v4583_v40, 0.0  ;;  %v1868_v53 = vmax.f32 %v4586_v58, 0.0  ;;  %v1869_v10 = vmax.f32 %v4591_v13, 0.0 }
 0x334   : > { %v1870_v57 = vmax.f32 %v4594_v25, 0.0  ;;  %v1873_v20 = vpack.c.bf16 %v1841_v32, %v1841_v32  ;;  %v4649_v55 = vpack.c.bf16 %v1842_v38, %v1842_v38  ;;  %v1875_v50 = vpack.c.bf16 %v1843_v42, %v1843_v42 }
 0x335   : > { %v4651_v11 = vpack.c.bf16 %v1844_v62, %v1844_v62  ;;  %v1877_v33 = vpack.c.bf16 %v1845_v14, %v1845_v14  ;;  %v4653_v61 = vpack.c.bf16 %v1846_v35, %v1846_v35  ;;  %v1879_v5 = vpack.c.bf16 %v1847_v12, %v1847_v12 }
 0x336   : > { %v4655_v48 = vpack.c.bf16 %v1848_v7, %v1848_v7  ;;  %v1881_v51 = vpack.c.bf16 %v1849_v37, %v1849_v37  ;;  %v4657_v40 = vpack.c.bf16 %v1850_v4, %v1850_v4  ;;  %v1883_v58 = vpack.c.bf16 %v1851_v8, %v1851_v8 }
 0x337   : > { %v4659_v3 = vpack.c.bf16 %v1852_v52, %v1852_v52  ;;  %v1885_v13 = vpack.c.bf16 %v1853_v63, %v1853_v63  ;;  %v4661_v25 = vpack.c.bf16 %v1854_v36, %v1854_v36  ;;  %v1887_v56 = vpack.c.bf16 %v1855_v0, %v1855_v0 }
 0x338   : > { %v4663_v49 = vpack.c.bf16 %v1856_v39, %v1856_v39  ;;  %v1889_v27 = vpack.c.bf16 %v1857_v23, %v1857_v23  ;;  %v4665_v29 = vpack.c.bf16 %v1858_v21, %v1858_v21  ;;  %v1891_v46 = vpack.c.bf16 %v1859_v2, %v1859_v2 }
 0x339   : > { %v4667_v9 = vpack.c.bf16 %v1860_v47, %v1860_v47  ;;  %v1893_v19 = vpack.c.bf16 %v1861_v41, %v1861_v41  ;;  %v4669_v1 = vpack.c.bf16 %v1862_v60, %v1862_v60  ;;  %v1895_v22 = vpack.c.bf16 %v1863_v16, %v1863_v16 }
 0x33a   : > { %v1897_v30 = vpack.c.bf16 %v1865_v45, %v1865_v45  ;;  %v1898_v24 = vpack.c.bf16 %v1866_v43, %v1866_v43  ;;  %v1899_v6 = vpack.c.bf16 %v1867_v31, %v1867_v31  ;;  %v1900_v15 = vpack.c.bf16 %v1868_v53, %v1868_v53 }
 0x33b   : > { %v1901_v28 = vpack.c.bf16 %v1869_v10, %v1869_v10  ;;  %v1902_v32 = vpack.c.bf16 %v1870_v57, %v1870_v57  ;;  %v1921_v38 = vunpack.c.l.b16 %v1875_v50  ;;  %v4671_v42 = vunpack.c.l.b16 %v1873_v20 }
 0x33c   : > { %v4673_v62 = vunpack.c.l.b16 %v1877_v33  ;;  %v4675_v14 = vunpack.c.l.b16 %v1879_v5  ;;  %v4677_v35 = vunpack.c.l.b16 %v1881_v51  ;;  %v4679_v12 = vunpack.c.l.b16 %v1883_v58 }
 0x33d   : > { %v4681_v7 = vunpack.c.l.b16 %v1885_v13  ;;  %v4683_v37 = vunpack.c.l.b16 %v1887_v56  ;;  %v4685_v4 = vunpack.c.l.b16 %v1889_v27  ;;  %v4687_v8 = vunpack.c.l.b16 %v1891_v46 }
 0x33e   : > { %v4689_v52 = vunpack.c.l.b16 %v1893_v19  ;;  %v4691_v63 = vunpack.c.l.b16 %v1895_v22  ;;  %v1933_v36 = vunpack.c.l.b16 %v1897_v30  ;;  %v1934_v0 = vunpack.c.l.b16 %v1899_v6 }
 0x33f   : > { %v1935_v39 = vunpack.c.l.b16 %v1901_v28  ;;  %v4693_v23 = vunpack.c.l.b16 %v1898_v24  ;;  %v4695_v21 = vunpack.c.l.b16 %v1900_v15  ;;  %v4697_v2 = vunpack.c.l.b16 %v1902_v32 }
 0x340   : > { %v1896_v47 = vpack.c.bf16 %v1864_v59, %v1864_v59  ;;  %v1937_v41 = vpack.c.b16 %v1921_v38, %v1921_v38  ;;  %v1938_v60 = vpack.c.b16 %v4671_v42, %v4671_v42  ;;  %v1939_v16 = vpack.c.b16 %v4673_v62, %v4673_v62 }
 0x341   : > { %v1940_v45 = vpack.c.b16 %v4675_v14, %v4675_v14  ;;  %v1941_v43 = vpack.c.b16 %v4677_v35, %v4677_v35  ;;  %v1942_v31 = vpack.c.b16 %v4679_v12, %v4679_v12  ;;  %v1943_v53 = vpack.c.b16 %v4681_v7, %v4681_v7 }
 0x342   : > { %v1944_v59 = vpack.c.b16 %v4683_v37, %v4683_v37  ;;  %v1945_v10 = vpack.c.b16 %v4685_v4, %v4685_v4  ;;  %v1946_v57 = vpack.c.b16 %v4687_v8, %v4687_v8  ;;  %v4718_v20 = vpack.c.b16 %v4693_v23, %v1933_v36 }
 0x343   : > { %v1947_v50 = vpack.c.b16 %v4689_v52, %v4689_v52  ;;  %v1948_v33 = vpack.c.b16 %v4691_v63, %v4691_v63  ;;  %v4725_v5 = vpack.c.b16 %v4695_v21, %v1934_v0  ;;  %v4728_v51 = vpack.c.b16 %v4697_v2, %v1935_v39 }
 0x344   : > { %v1949_v58 = vpack.c.b16 %v1933_v36, %v1933_v36  ;;  %v1950_v13 = vpack.c.b16 %v1934_v0, %v1934_v0  ;;  %v1951_v56 = vpack.c.b16 %v1935_v39, %v1935_v39  ;;  %v4730_v27 = vshrl.u32 %v1937_v41, 16 }
 0x345   : > { %v4732_v46 = vshrl.u32 %v1938_v60, 16  ;;  %v4734_v19 = vshrl.u32 %v1939_v16, 16  ;;  %v4736_v22 = vshrl.u32 %v1940_v45, 16  ;;  %v4738_v30 = vshrl.u32 %v1941_v43, 16 }
 0x346   : > { %v4740_v24 = vshrl.u32 %v1942_v31, 16  ;;  %v4742_v6 = vshrl.u32 %v1943_v53, 16  ;;  %v4744_v15 = vshrl.u32 %v1944_v59, 16  ;;  %v2033_v28 = vunpack.c.l.b16 %v4651_v11 }
 0x347   : > { %v4747_v32 = vshrl.u32 %v1945_v10, 16  ;;  %v4749_v36 = vshrl.u32 %v1946_v57, 16  ;;  %v2034_v0 = vunpack.c.l.b16 %v4649_v55  ;;  %v2035_v39 = vunpack.c.l.b16 %v4653_v61  ;;  %v3596_v57 = vld [vmem:[%s5768_s4] sm:$0xf] }
 0x348   : > { %v4753_v41 = vshrl.u32 %v1947_v50, 16  ;;  %v4756_v60 = vunpack.c.l.b16 %v4655_v48  ;;  %v4759_v16 = vunpack.c.l.b16 %v4657_v40  ;;  %v4762_v45 = vunpack.c.l.b16 %v4659_v3  ;;  %v3641_v50 = vld [vmem:[%s5768_s4] sm:$0x30] }
 0x349   : > { %v4764_v11 = vshrl.u32 %v1948_v33, 16  ;;  %v4767_v43 = vunpack.c.l.b16 %v4661_v25  ;;  %v4770_v55 = vunpack.c.l.b16 %v4663_v49  ;;  %v4773_v61 = vunpack.c.l.b16 %v4665_v29 }
 0x34a   : > { %5801 = vst [vmem:[#allocation7_spill] sm:$0xff] %v4753_v41  ;;  %v4776_v48 = vunpack.c.l.b16 %v4667_v9  ;;  %v4779_v40 = vunpack.c.l.b16 %v4669_v1  ;;  %v4781_v31 = vunpack.c.l.b16 %v1896_v47  ;;  %v4783_v3 = vpack.c.b16 %v2033_v28, %v1921_v38 }
 0x34b   : > { %5802 = vst [vmem:[#allocation8_spill] sm:$0xff] %v4764_v11  ;;  %v4785_v53 = vshrl.u32 %v1949_v58, 16  ;;  %v4787_v25 = vshrl.u32 %v1950_v13, 16  ;;  %v2050_v49 = vpack.c.b16 %v2034_v0, %v4671_v42  ;;  %v4791_v59 = vpack.c.b16 %v2035_v39, %v4673_v62  ;;  %v3643_v13 = vld [vmem:[%s5768_s4 + $0x10] sm:$0x30] }
 0x34c   : > { %v4793_v29 = vshrl.u32 %v1951_v56, 16  ;;  %v4797_v9 = vpack.c.b16 %v4756_v60, %v4675_v14  ;;  %v4801_v1 = vpack.c.b16 %v4759_v16, %v4677_v35  ;;  %v4805_v38 = vpack.c.b16 %v4762_v45, %v4679_v12  ;;  %v3576_v35 = vld [vmem:[%s5768_s4 + $0x8] sm:$0xf]  ;;  %v3642_v12 = vld [vmem:[%s5768_s4 + $0x8] sm:$0x30] }
 0x34d   : > { %5803 = vst [vmem:[#allocation9_spill] sm:$0xff] %v4785_v53  ;;  %v4809_v42 = vpack.c.b16 %v4767_v43, %v4681_v7  ;;  %v4813_v62 = vpack.c.b16 %v4770_v55, %v4683_v37  ;;  %v4817_v14 = vpack.c.b16 %v4773_v61, %v4685_v4  ;;  %v2209_v47 = vpack.c.b16 %v2033_v28, %v2033_v28 }
 0x34e   : > { %5804 = vst [vmem:[#allocation10_spill] sm:$0xff] %v4787_v25  ;;  %v4827_v7 = vpack.c.b16 %v4776_v48, %v4687_v8  ;;  %v4831_v37 = vpack.c.b16 %v4779_v40, %v4689_v52  ;;  %v4835_v4 = vpack.c.b16 %v4781_v31, %v4691_v63  ;;  %v2069_v10 = vshll.u32 %v4783_v3, 16  ;;  %v3616_v63 = vld [vmem:[%s5768_s4 + $0x10] sm:$0xf] }
 0x34f   : > { %5805 = vst [vmem:[#allocation11_spill] sm:$0xff] %v4793_v29  ;;  %v2076_v8 = vshll.u32 %v2050_v49, 16  ;;  %v2083_v33 = vshll.u32 %v4791_v59, 16  ;;  %v2210_v58 = vpack.c.b16 %v2034_v0, %v2034_v0  ;;  %v2211_v52 = vpack.c.b16 %v2035_v39, %v2035_v39 }
 0x350   : > { %v2094_v28 = vshrl.u32 %v4801_v1, 16  ;;  %v2115_v39 = vshrl.u32 %v4813_v62, 16  ;;  %v2226_v17 = vshll.u32 %v2209_v47, 16  ;;  %v3577_v26 = vor.u32 %v3642_v12, %v3576_v35 }
 0x351   : > { %v3597_v29 = vor.u32 %v3641_v50, %v3596_v57  ;;  %v3617_v53 = vor.u32 %v3643_v13, %v3616_v63  ;;  %v2122_v56 = vshrl.u32 %v4817_v14, 16  ;;  %v2234_v11 = vshll.u32 %v2211_v52, 16 }
 0x352   : > { %v2073_v25 = vshrl.u32 %v2050_v49, 16  ;;  %v2230_v41 = vshll.u32 %v2210_v58, 16  ;;  %v2125_v18 = vshll.u32 %v4817_v14, 16  ;;  %v2781_v54 = vsel %vm1227_vm5, %v3577_v26, 0 }
 0x353   : > { %v2878_v34 = vsel %vm1227_vm5, %v3597_v29, 0  ;;  %v2975_v0 = vsel %vm1227_vm5, %v3617_v53, 0  ;;  %2790 = vmatpush.bf16.msrb.mxu3 %v2781_v54  ;;  %v2066_v35 = vshrl.u32 %v4783_v3, 16  ;;  %v2228_v12 = vrot.slane %v2226_v17, 3 }
 0x354   : > { %2887 = vmatpush.bf16.msrb.mxu0 %v2878_v34  ;;  %v2075_v47 = vrot.slane %v2073_v25, 7  ;;  %v2232_v44 = vrot.slane %v2230_v41, 3  ;;  %2984 = vmatpush.bf16.msrb.mxu1 %v2975_v0  ;;  %v2080_v26 = vshrl.u32 %v4791_v59, 16  ;;  %v2236_v34 = vrot.slane %v2234_v11, 3 }
 0x355   : > { %v2068_v54 = vrot.slane %v2066_v35, 7  ;;  %v2212_v41 = vpack.c.b16 %v4756_v60, %v4756_v60  ;;  %v2213_v17 = vpack.c.b16 %v4759_v16, %v4759_v16  ;;  %v2087_v25 = vshrl.u32 %v4797_v9, 16 }
 0x356   : > { %v2078_v58 = vor.u32 %v2076_v8, %v2075_v47  ;;  %v2322_v53 = vsel %vm3778_vm4, %v2075_v47, %v2232_v44  ;;  %v2082_v3 = vrot.slane %v2080_v26, 7  ;;  %v2214_v52 = vpack.c.b16 %v4762_v45, %v4762_v45 }
 0x357   : > { %v2071_v44 = vor.u32 %v2069_v10, %v2068_v54  ;;  %v4885_v11 = vsel %vm3778_vm4, %v2068_v54, %v2228_v12  ;;  %v2557_v8 = vrot.slane %v2322_v53, 1  ;;  %v2363_v63 = vshll.u32 %v2322_v53, 16 }
 0x358   : > { %v4881_v59 = vsel %vm3778_vm4, %v4732_v46, %v2078_v58  ;;  %v2351_v13 = vshll.u32 %v4885_v11, 16  ;;  %v2085_v46 = vor.u32 %v2083_v33, %v2082_v3  ;;  %v4897_v10 = vsel %vm3778_vm4, %v2082_v3, %v2236_v34 }
 0x359   : > { %v2556_v60 = vrot.slane %v4881_v59, 1  ;;  %v2358_v16 = vshll.u32 %v4881_v59, 16  ;;  %v4892_v45 = vsel %vm3778_vm4, %v4730_v27, %v2071_v44  ;;  %v2242_v0 = vshll.u32 %v2213_v17, 16 }
 0x35a   : > { %v2346_v35 = vshll.u32 %v4892_v45, 16  ;;  %v2089_v12 = vrot.slane %v2087_v25, 7  ;;  %v2356_v26 = vshrl.u32 %v4881_v59, 16  ;;  %v4906_v27 = vsel %vm3778_vm4, %v4734_v19, %v2085_v46 }
 0x35b   : > { %v2558_v47 = vsel %vm996_vm2, %v2556_v60, %v2557_v8  ;;  %v2360_v58 = vrot.slane %v2358_v16, 1  ;;  %v2096_v33 = vrot.slane %v2094_v28, 7  ;;  %v2344_v53 = vshrl.u32 %v4892_v45, 16 }
 0x35c   : > { %2630 = vrot.lane.b32.xlu0 %v2558_v47, %s3704_s8  ;;  %v2348_v54 = vrot.slane %v2346_v35, 1  ;;  %v2370_v34 = vshll.u32 %v4906_v27, 16  ;;  %v2375_v17 = vshll.u32 %v4897_v10, 16  ;;  %v2353_v3 = vrot.slane %v2351_v13, 1 }
 0x35d   : > { %v2361_v25 = vor.u32 %v2360_v58, %v2356_v26  ;;  %v2365_v44 = vrot.slane %v2363_v63, 1  ;;  %v2238_v60 = vshll.u32 %v2212_v41, 16  ;;  %v2368_v16 = vshrl.u32 %v4906_v27, 16 }
 0x35e   : > { %v2349_v8 = vor.u32 %v2348_v54, %v2344_v53  ;;  %v2372_v47 = vrot.slane %v2370_v34, 1  ;;  %v5807_v50 = vshll.u32 %v4797_v9, 16  ;;  %v2143_v28 = vshrl.u32 %v4835_v4, 16 }
 0x35f   : > { %v2146_v46 = vshll.u32 %v4835_v4, 16  ;;  %v2366_v35 = vsel %vm785_vm3, %v2361_v25, %v2365_v44  ;;  %v5808_v57 = vshll.u32 %v4801_v1, 16  ;;  %v2377_v63 = vrot.slane %v2375_v17, 1 }
 0x360   : > { %v2092_v19 = vor.u32 %v5807_v50, %v2089_v12  ;;  %v2354_v13 = vsel %vm785_vm3, %v2349_v8, %v2353_v3  ;;  %2600 = vrot.lane.b32.xlu2 %v2366_v35, %s3703_s30  ;;  %v2373_v41 = vor.u32 %v2372_v47, %v2368_v16  ;;  %v2153_v50 = vshll.u32 %v4718_v20, 16 }
 0x361   : > { %v2099_v49 = vor.u32 %v5808_v57, %v2096_v33  ;;  %v2246_v26 = vshll.u32 %v2214_v52, 16  ;;  %2598 = vrot.lane.b32.xlu1 %v2354_v13, %s3703_s30  ;;  %v2240_v58 = vrot.slane %v2238_v60, 3  ;;  %v2157_v57 = vshrl.u32 %v4725_v5, 16 }
 0x362   : > { %v4924_v9 = vsel %vm3778_vm4, %v4736_v22, %v2092_v19  ;;  %v2244_v53 = vrot.slane %v2242_v0, 3  ;;  %v2378_v54 = vsel %vm785_vm3, %v2373_v41, %v2377_v63  ;;  %v2553_v34 = vrot.slane %v4892_v45, 1 }
 0x363   : > { %v4931_v1 = vsel %vm3778_vm4, %v4738_v30, %v2099_v49  ;;  %v2160_v22 = vshll.u32 %v4725_v5, 16  ;;  %v2215_v52 = vpack.c.b16 %v4767_v43, %v4767_v43  ;;  %v2382_v17 = vshll.u32 %v4924_v9, 16 }
 0x364   : > { %2602 = vrot.lane.b32.xlu0 %v2378_v54, %s3703_s30  ;;  %v5809_v3 = vshrl.u32 %v4805_v38, 16  ;;  %v2216_v49 = vpack.c.b16 %v4770_v55, %v4770_v55  ;;  %v2559_v0 = vrot.slane %v4906_v27, 1  ;;  %v2554_v25 = vrot.slane %v4885_v11, 1 }
 0x365   : > { %v2394_v44 = vshll.u32 %v4931_v1, 16  ;;  %v2217_v60 = vpack.c.b16 %v4773_v61, %v4773_v61  ;;  %v2248_v43 = vrot.slane %v2246_v26, 3  ;;  %v2324_v8 = vsel %vm3778_vm4, %v2089_v12, %v2240_v58 }
 0x366   : > { %v2103_v30 = vrot.slane %v5809_v3, 7  ;;  %v5810_v16 = vshll.u32 %v4805_v38, 16  ;;  %v2560_v19 = vrot.slane %v4897_v10, 1  ;;  %v2555_v55 = vsel %vm996_vm2, %v2553_v34, %v2554_v25 }
 0x367   : > { %v2562_v35 = vrot.slane %v4924_v9, 1  ;;  %v4959_v11 = vsel %vm3778_vm4, %v2096_v33, %v2244_v53  ;;  %v2384_v13 = vrot.slane %v2382_v17, 1  ;;  %v2108_v12 = vshrl.u32 %v4809_v42, 16 }
 0x368   : > { %v2106_v47 = vor.u32 %v5810_v16, %v2103_v30  ;;  %v4969_v38 = vrot.slane %v2115_v39, 7  ;;  %v2561_v10 = vsel %vm996_vm2, %v2559_v0, %v2560_v19  ;;  %2628 = vrot.lane.b32.xlu2 %v2555_v55, %s3704_s8  ;;  %v2563_v41 = vrot.slane %v2324_v8, 1 }
 0x369   : > { %v2396_v63 = vrot.slane %v2394_v44, 1  ;;  %2632 = vrot.lane.b32.xlu1 %v2561_v10, %s3704_s8  ;;  %v2380_v26 = vshrl.u32 %v4924_v9, 16  ;;  %v2326_v58 = vsel %vm3778_vm4, %v2103_v30, %v2248_v43  ;;  %v2110_v53 = vrot.slane %v2108_v12, 7 }
 0x36a   : > { %v4964_v61 = vsel %vm3778_vm4, %v4740_v24, %v2106_v47  ;;  %v2387_v24 = vshll.u32 %v2324_v8, 16  ;;  %v2564_v39 = vsel %vm996_vm2, %v2562_v35, %v2563_v41  ;;  %v2392_v54 = vshrl.u32 %v4931_v1, 16 }
 0x36b   : > { %v2406_v33 = vshll.u32 %v4964_v61, 16  ;;  %v2399_v34 = vshll.u32 %v4959_v11, 16  ;;  %v2250_v3 = vshll.u32 %v2215_v52, 16  ;;  %v2385_v0 = vor.u32 %v2384_v13, %v2380_v26 }
 0x36c   : > { %2634 = vrot.lane.b32.xlu0 %v2564_v39, %s3704_s8  ;;  %v5811_v25 = vshll.u32 %v4813_v62, 16  ;;  %v2124_v8 = vrot.slane %v2122_v56, 7  ;;  %v2397_v30 = vor.u32 %v2396_v63, %v2392_v54  ;;  %v2404_v43 = vshrl.u32 %v4964_v61, 16 }
 0x36d   : > { %v2408_v17 = vrot.slane %v2406_v33, 1  ;;  %v2411_v16 = vshll.u32 %v2326_v58, 16  ;;  %v5812_v47 = vshll.u32 %v4809_v42, 16  ;;  %v2164_v55 = vshrl.u32 %v4728_v51, 16 }
 0x36e   : > { %v2120_v44 = vor.u32 %v5811_v25, %v4969_v38  ;;  %v2167_v52 = vshll.u32 %v4728_v51, 16  ;;  %v2254_v35 = vshll.u32 %v2216_v49, 16  ;;  %v2389_v13 = vrot.slane %v2387_v24, 1 }
 0x36f   : > { %v2113_v19 = vor.u32 %v5812_v47, %v2110_v53  ;;  %v2218_v62 = vpack.c.b16 %v4776_v48, %v4776_v48  ;;  %v2219_v12 = vpack.c.b16 %v4779_v40, %v4779_v40  ;;  %v2401_v56 = vrot.slane %v2399_v34, 1 }
 0x370   : > { %v2409_v10 = vor.u32 %v2408_v17, %v2404_v43  ;;  %v2258_v41 = vshll.u32 %v2217_v60, 16  ;;  %v2390_v63 = vsel %vm785_vm3, %v2385_v0, %v2389_v13  ;;  %v5000_v42 = vsel %vm3778_vm4, %v4744_v15, %v2120_v44 }
 0x371   : > { %v2127_v49 = vor.u32 %v2125_v18, %v2124_v8  ;;  %v2252_v33 = vrot.slane %v2250_v3, 3  ;;  %v2402_v26 = vsel %vm785_vm3, %v2397_v30, %v2401_v56  ;;  %2604 = vrot.lane.b32.xlu2 %v2390_v63, %s3703_s30  ;;  %v2413_v48 = vrot.slane %v2411_v16, 1 }
 0x372   : > { %v5009_v40 = vsel %vm3778_vm4, %v4742_v6, %v2113_v19  ;;  %v2220_v60 = vpack.c.b16 %v4781_v31, %v4781_v31  ;;  %v2221_v15 = vpack.c.b16 %v4693_v23, %v4693_v23  ;;  %v2222_v18 = vpack.c.b16 %v4695_v21, %v4695_v21  ;;  %2606 = vrot.lane.b32.xlu1 %v2402_v26, %s3703_s30 }
 0x373   : > { %v2256_v14 = vrot.slane %v2254_v35, 3  ;;  %v2223_v24 = vpack.c.b16 %v4697_v2, %v4697_v2  ;;  %v5020_v39 = vshll.u32 %v2218_v62, 16  ;;  %v2414_v6 = vsel %vm785_vm3, %v2409_v10, %v2413_v48 }
 0x374   : > { %v2430_v54 = vshll.u32 %v5000_v42, 16  ;;  %2608 = vrot.lane.b32.xlu0 %v2414_v6, %s3703_s30  ;;  %v2568_v31 = vrot.slane %v4964_v61, 1  ;;  %v2565_v23 = vrot.slane %v4931_v1, 1  ;;  %v2418_v21 = vshll.u32 %v5009_v40, 16 }
 0x375   : > { %v5031_v34 = vsel %vm3778_vm4, %v4747_v32, %v2127_v49  ;;  %v2260_v2 = vrot.slane %v2258_v41, 3  ;;  %v5033_v17 = vshll.u32 %v2219_v12, 16  ;;  %v2327_v3 = vsel %vm3778_vm4, %v2110_v53, %v2252_v33 }
 0x376   : > { %v2129_v0 = vshrl.u32 %v4827_v7, 16  ;;  %v2274_v25 = vshll.u32 %v2221_v15, 16  ;;  %v2569_v44 = vrot.slane %v2326_v58, 1  ;;  %v2566_v30 = vrot.slane %v4959_v11, 1 }
 0x377   : > { %v5042_v43 = vsel %vm3778_vm4, %v4969_v38, %v2256_v14  ;;  %v2278_v16 = vshll.u32 %v2222_v18, 16  ;;  %v2571_v32 = vrot.slane %v5009_v40, 1  ;;  %v2432_v47 = vrot.slane %v2430_v54, 1 }
 0x378   : > { %v2442_v19 = vshll.u32 %v5031_v34, 16  ;;  %v2570_v35 = vsel %vm996_vm2, %v2568_v31, %v2569_v44  ;;  %v2567_v53 = vsel %vm996_vm2, %v2565_v23, %v2566_v30  ;;  %v2572_v13 = vrot.slane %v2327_v3, 1 }
 0x379   : > { %v2420_v62 = vrot.slane %v2418_v21, 1  ;;  %2636 = vrot.lane.b32.xlu2 %v2567_v53, %s3704_s8  ;;  %v2428_v11 = vshrl.u32 %v5000_v42, 16  ;;  %v2435_v58 = vshll.u32 %v5042_v43, 16  ;;  %v5053_v38 = vsel %vm3778_vm4, %v2124_v8, %v2260_v2 }
 0x37a   : > { %v2131_v12 = vrot.slane %v2129_v0, 7  ;;  %v2282_v56 = vshll.u32 %v2223_v24, 16  ;;  %2638 = vrot.lane.b32.xlu1 %v2570_v35, %s3704_s8  ;;  %v2416_v10 = vshrl.u32 %v5009_v40, 16  ;;  %v2423_v41 = vshll.u32 %v2327_v3, 16 }
 0x37b   : > { %v5813_v63 = vshrl.u32 %v4831_v37, 16  ;;  %v5059_v33 = vshll.u32 %v2220_v60, 16  ;;  %v2573_v26 = vsel %vm996_vm2, %v2571_v32, %v2572_v13  ;;  %v2433_v48 = vor.u32 %v2432_v47, %v2428_v11  ;;  %v5817_v13 = vld [vmem:[#allocation10_spill] sm:$0xff] }
 0x37c   : > { %v2444_v15 = vrot.slane %v2442_v19, 1  ;;  %v2264_v18 = vrot.slane %v5020_v39, 3  ;;  %2640 = vrot.lane.b32.xlu0 %v2573_v26, %s3704_s8  ;;  %v2421_v8 = vor.u32 %v2420_v62, %v2416_v10  ;;  %v2447_v14 = vshll.u32 %v5053_v38, 16  ;;  %v5821_v26 = vld [vmem:[#allocation5_spill] sm:$0xff] }
 0x37d   : > { %v2138_v49 = vrot.slane %v5813_v63, 7  ;;  %v2145_v24 = vrot.slane %v2143_v28, 7  ;;  %v2280_v6 = vrot.slane %v2278_v16, 3  ;;  %v2437_v54 = vrot.slane %v2435_v58, 1  ;;  %v5818_v58 = vld [vmem:[#allocation8_spill] sm:$0xff] }
 0x37e   : > { %v2440_v31 = vshrl.u32 %v5031_v34, 16  ;;  %v5814_v60 = vshll.u32 %v4827_v7, 16  ;;  %v2276_v21 = vrot.slane %v2274_v25, 3  ;;  %v2284_v2 = vrot.slane %v2282_v56, 3  ;;  %v5819_v56 = vld [vmem:[#allocation9_spill] sm:$0xff] }
 0x37f   : > { %v2425_v3 = vrot.slane %v2423_v41, 1  ;;  %v5815_v39 = vshll.u32 %v4831_v37, 16  ;;  %v2438_v44 = vsel %vm785_vm3, %v2433_v48, %v2437_v54  ;;  %v2150_v32 = vshrl.u32 %v4718_v20, 16  ;;  %v5820_v41 = vld [vmem:[#allocation11_spill] sm:$0xff]  ;;  %v5822_v54 = vld [vmem:[#allocation6_spill] sm:$0xff] }
 0x380   : > { %v2134_v23 = vor.u32 %v5814_v60, %v2131_v12  ;;  %v2445_v30 = vor.u32 %v2444_v15, %v2440_v31  ;;  %v2159_v28 = vrot.slane %v2157_v57, 7  ;;  %v2449_v47 = vrot.slane %v2447_v14, 1 }
 0x381   : > { %v2141_v0 = vor.u32 %v5815_v39, %v2138_v49  ;;  %v2426_v16 = vsel %vm785_vm3, %v2421_v8, %v2425_v3  ;;  %v2148_v7 = vor.u32 %v2146_v46, %v2145_v24  ;;  %v2166_v25 = vrot.slane %v2164_v55, 7  ;;  %v5816_v46 = vld [vmem:[#allocation7_spill] sm:$0xff] }
 0x382   : > { %2610 = vrot.lane.b32.xlu2 %v2426_v16, %s3703_s30  ;;  %v5085_v37 = vsel %vm3778_vm4, %v4749_v36, %v2134_v23  ;;  %v2152_v19 = vrot.slane %v2150_v32, 7  ;;  %v2162_v57 = vor.u32 %v2160_v22, %v2159_v28  ;;  %v5091_v35 = vsel %vm3778_vm4, %v2159_v28, %v2280_v6  ;;  %2612 = vrot.lane.b32.xlu1 %v2438_v44, %s3703_s30 }
 0x383   : > { %v2268_v4 = vrot.slane %v5033_v17, 3  ;;  %v5098_v55 = vsel %vm3778_vm4, %v5816_v46, %v2141_v0  ;;  %v2169_v36 = vor.u32 %v2167_v52, %v2166_v25  ;;  %v5104_v5 = vsel %vm3778_vm4, %v2166_v25, %v2284_v2  ;;  %v5823_v2 = vld [vmem:[#allocation4_spill] sm:$0xff] }
 0x384   : > { %v2450_v22 = vsel %vm785_vm3, %v2445_v30, %v2449_v47  ;;  %v2155_v53 = vor.u32 %v2153_v50, %v2152_v19  ;;  %v5111_v17 = vsel %vm3778_vm4, %v2152_v19, %v2276_v21  ;;  %v5116_v62 = vsel %vm3778_vm4, %v5817_v13, %v2162_v57 }
 0x385   : > { %2614 = vrot.lane.b32.xlu0 %v2450_v22, %s3703_s30  ;;  %v2577_v51 = vrot.slane %v5031_v34, 1  ;;  %v2574_v52 = vrot.slane %v5000_v42, 1  ;;  %v2454_v11 = vshll.u32 %v5085_v37, 16  ;;  %v5125_v20 = vsel %vm3778_vm4, %v5818_v58, %v2148_v7 }
 0x386   : > { %v2466_v50 = vshll.u32 %v5098_v55, 16  ;;  %v5131_v10 = vsel %vm3778_vm4, %v5819_v56, %v2155_v53  ;;  %v5136_v63 = vsel %vm3778_vm4, %v5820_v41, %v2169_v36  ;;  %v2171_v48 = vshrl.u32 %v5821_v26, 16 }
 0x387   : > { %v2272_v15 = vrot.slane %v5059_v33, 3  ;;  %v2578_v8 = vrot.slane %v5053_v38, 1  ;;  %v2575_v14 = vrot.slane %v5042_v43, 1  ;;  %v2330_v6 = vsel %vm3778_vm4, %v2131_v12, %v2264_v18 }
 0x388   : > { %v2288_v31 = vrot.slane %v5822_v54, 3  ;;  %v2580_v60 = vrot.slane %v5085_v37, 1  ;;  %v2331_v23 = vsel %vm3778_vm4, %v2138_v49, %v2268_v4  ;;  %v2478_v21 = vshll.u32 %v5125_v20, 16 }
 0x389   : > { %v5824_v3 = vpack.c.b16 %v5823_v2, %v5823_v2  ;;  %v2579_v38 = vsel %vm996_vm2, %v2577_v51, %v2578_v8  ;;  %v2576_v43 = vsel %vm996_vm2, %v2574_v52, %v2575_v14  ;;  %v2456_v39 = vrot.slane %v2454_v11, 1 }
 0x38a   : > { %2642 = vrot.lane.b32.xlu2 %v2576_v43, %s3704_s8  ;;  %v2581_v12 = vrot.slane %v2330_v6, 1  ;;  %v2468_v18 = vrot.slane %v2466_v50, 1  ;;  %v2459_v0 = vshll.u32 %v2330_v6, 16  ;;  %v2173_v44 = vrot.slane %v2171_v48, 7  ;;  %2644 = vrot.lane.b32.xlu1 %v2579_v38, %s3704_s8 }
 0x38b   : > { %v1999_v33 = vshrl.u32 %v5824_v3, 16  ;;  %v2464_v49 = vshrl.u32 %v5098_v55, 16  ;;  %v2471_v30 = vshll.u32 %v2331_v23, 16  ;;  %v2452_v32 = vshrl.u32 %v5085_v37, 16 }
 0x38c   : > { %v2332_v28 = vsel %vm3778_vm4, %v2145_v24, %v2272_v15  ;;  %v2582_v16 = vsel %vm996_vm2, %v2580_v60, %v2581_v12  ;;  %v2480_v47 = vrot.slane %v2478_v21, 1  ;;  %v5825_v7 = vshll.u32 %v5821_v26, 16 }
 0x38d   : > { %v5165_v19 = vsel %vm3778_vm4, %v2173_v44, %v2288_v31  ;;  %2646 = vrot.lane.b32.xlu0 %v2582_v16, %s3704_s8  ;;  %v2457_v57 = vor.u32 %v2456_v39, %v2452_v32  ;;  %v2469_v4 = vor.u32 %v2468_v18, %v2464_v49  ;;  %v2476_v46 = vshrl.u32 %v5125_v20, 16 }
 0x38e   : > { %v2176_v25 = vor.u32 %v5825_v7, %v2173_v44  ;;  %v2483_v36 = vshll.u32 %v2332_v28, 16  ;;  %v2461_v22 = vrot.slane %v2459_v0, 1  ;;  %v2473_v53 = vrot.slane %v2471_v30, 1 }
 0x38f   : > { %v2481_v13 = vor.u32 %v2480_v47, %v2476_v46  ;;  %v2583_v29 = vrot.slane %v5098_v55, 1  ;;  %v2490_v50 = vshll.u32 %v5131_v10, 16  ;;  %v2586_v56 = vrot.slane %v5125_v20, 1 }
 0x390   : > { %v5171_v24 = vsel %vm3778_vm4, %v1999_v33, %v2176_v25  ;;  %v2462_v51 = vsel %vm785_vm3, %v2457_v57, %v2461_v22  ;;  %v2474_v52 = vsel %vm785_vm3, %v2469_v4, %v2473_v53  ;;  %v2485_v11 = vrot.slane %v2483_v36, 1 }
 0x391   : > { %v2502_v41 = vshll.u32 %v5116_v62, 16  ;;  %v2584_v26 = vrot.slane %v2331_v23, 1  ;;  %v2587_v48 = vrot.slane %v2332_v28, 1  ;;  %v2589_v15 = vrot.slane %v5131_v10, 1 }
 0x392   : > { %2616 = vrot.lane.b32.xlu2 %v2462_v51, %s3703_s30  ;;  %2618 = vrot.lane.b32.xlu1 %v2474_v52, %s3703_s30  ;;  %v2486_v58 = vsel %vm785_vm3, %v2481_v13, %v2485_v11  ;;  %v2514_v8 = vshll.u32 %v5136_v63, 16  ;;  %v2492_v6 = vrot.slane %v2490_v50, 1  ;;  %v2590_v31 = vrot.slane %v5111_v17, 1 }
 0x393   : > { %v2585_v14 = vsel %vm996_vm2, %v2583_v29, %v2584_v26  ;;  %v2588_v54 = vsel %vm996_vm2, %v2586_v56, %v2587_v48  ;;  %v2504_v60 = vrot.slane %v2502_v41, 1  ;;  %v2488_v21 = vshrl.u32 %v5131_v10, 16 }
 0x394   : > { %v2495_v23 = vshll.u32 %v5111_v17, 16  ;;  %v2591_v2 = vsel %vm996_vm2, %v2589_v15, %v2590_v31  ;;  %v2500_v3 = vshrl.u32 %v5116_v62, 16  ;;  %v2507_v33 = vshll.u32 %v5091_v35, 16 }
 0x395   : > { %2620 = vrot.lane.b32.xlu0 %v2486_v58, %s3703_s30  ;;  %v2516_v38 = vrot.slane %v2514_v8, 1  ;;  %v2493_v43 = vor.u32 %v2492_v6, %v2488_v21  ;;  %v2512_v12 = vshrl.u32 %v5136_v63, 16  ;;  %v2519_v18 = vshll.u32 %v5104_v5, 16 }
 0x396   : > { %v2505_v39 = vor.u32 %v2504_v60, %v2500_v3  ;;  %v2497_v0 = vrot.slane %v2495_v23, 1  ;;  %v2509_v44 = vrot.slane %v2507_v33, 1  ;;  %v2592_v16 = vrot.slane %v5116_v62, 1 }
 0x397   : > { %v2517_v49 = vor.u32 %v2516_v38, %v2512_v12  ;;  %v2521_v32 = vrot.slane %v2519_v18, 1  ;;  %v2721_v47 = vshll.u32 %v5171_v24, 16  ;;  %v2595_v7 = vrot.slane %v5136_v63, 1 }
 0x398   : > { %v2498_v17 = vsel %vm785_vm3, %v2493_v43, %v2497_v0  ;;  %v2510_v30 = vsel %vm785_vm3, %v2505_v39, %v2509_v44  ;;  %v2593_v25 = vrot.slane %v5091_v35, 1  ;;  %v2596_v57 = vrot.slane %v5104_v5, 1 }
 0x399   : > { %v2522_v28 = vsel %vm785_vm3, %v2517_v49, %v2521_v32  ;;  %v2732_v4 = vrot.slane %v5171_v24, 1  ;;  %v2723_v36 = vrot.slane %v2721_v47, 1  ;;  %v2733_v53 = vrot.slane %v5165_v19, 1 }
 0x39a   : > { %2648 = vrot.lane.b32.xlu2 %v2585_v14, %s3704_s8  ;;  %2650 = vrot.lane.b32.xlu1 %v2588_v54, %s3704_s8  ;;  %v2594_v46 = vsel %vm996_vm2, %v2592_v16, %v2593_v25  ;;  %v2597_v22 = vsel %vm996_vm2, %v2595_v7, %v2596_v57  ;;  %v2719_v13 = vshrl.u32 %v5171_v24, 16  ;;  %v2726_v51 = vshll.u32 %v5165_v19, 16 }
 0x39b   : > { %v2734_v35 = vsel %vm996_vm2, %v2732_v4, %v2733_v53 }
 0x39c   : > { %v2724_v5 = vor.u32 %v2723_v36, %v2719_v13  ;;  %v2728_v52 = vrot.slane %v2726_v51, 1 }
 0x39d   : > { %2652 = vrot.lane.b32.xlu0 %v2591_v2, %s3704_s8 }
 0x39e   : > { %v2729_v11 = vsel %vm785_vm3, %v2724_v5, %v2728_v52 }
 0x3a2   : > { %2622 = vrot.lane.b32.xlu2 %v2498_v17, %s3703_s30  ;;  %2624 = vrot.lane.b32.xlu1 %v2510_v30, %s3703_s30 }
 0x3a5   : > { %2626 = vrot.lane.b32.xlu0 %v2522_v28, %s3703_s30 }
 0x3aa   : > { %2654 = vrot.lane.b32.xlu2 %v2594_v46, %s3704_s8  ;;  %2656 = vrot.lane.b32.xlu1 %v2597_v22, %s3704_s8 }
 0x3ad   : > { %2737 = vrot.lane.b32.xlu0 %v2734_v35, %s3704_s8 }
 0x3b2   : > { %2735 = vrot.lane.b32.xlu2 %v2729_v11, %s3703_s30 }
 0x3ba   : > { %v2601_v58 = vpop.permute.xlu2 %2600 }
 0x3bb   : > { %v2661_v29 = vsel %vm1102_vm6, %v4881_v59, %v2601_v58 }
 0x3c2   : > { %v2629_v41 = vpop.permute.xlu2 %2628 }
 0x3ce   : > { %v2631_v50 = vpop.permute.xlu0 %2630 }
 0x3cf   : > { %v2691_v56 = vsel %vm1133_vm7, %v2661_v29, %v2631_v50 }
 0x3d0   : > { %3578 = vmatmul.msk.bf16.vlgmr.msrb.gmra.mxu3 %vm1194_vm8, %v2691_v56 }
 0x3d3   : > { %v2599_v19 = vpop.permute.xlu1 %2598 }
 0x3d4   : > { %v2659_v26 = vsel %vm1102_vm6, %v4892_v45, %v2599_v19  ;;  %v2605_v45 = vpop.permute.xlu2 %2604 }
 0x3d5   : > { %v2689_v48 = vsel %vm1133_vm7, %v2659_v26, %v2629_v41  ;;  %v2665_v54 = vsel %vm1102_vm6, %v4924_v9, %v2605_v45 }
 0x3d6   : > { %3598 = vmatmul.msk.bf16.vlgmr.msrb.gmra.mxu0 %vm1194_vm8, %v2689_v48  ;;  %3618 = vmatmul.msk.bf16.vlgmr.msrb.gmra.mxu1 %vm1194_vm8, %v2689_v48  ;;  %v2603_v15 = vpop.permute.xlu0 %2602 }
 0x3d7   : > { %v2663_v8 = vsel %vm1102_vm6, %v4906_v27, %v2603_v15 }
 0x3db   : > { %v2633_v59 = vpop.permute.xlu1 %2632 }
 0x3dc   : > { %v2693_v14 = vsel %vm1133_vm7, %v2663_v8, %v2633_v59  ;;  %v2637_v21 = vpop.permute.xlu2 %2636 }
 0x3de   : > { %v2635_v6 = vpop.permute.xlu0 %2634 }
 0x3df   : > { %v2695_v31 = vsel %vm1133_vm7, %v2665_v54, %v2635_v6 }
 0x3e0   : > { %3579 = vmatmul.msk.bf16.gmra.mxu3 %vm1194_vm8, %v2689_v48 }
 0x3e4   : > { %v2607_v27 = vpop.permute.xlu1 %2606 }
 0x3e5   : > { %v2667_v60 = vsel %vm1102_vm6, %v4931_v1, %v2607_v27  ;;  %v2611_v1 = vpop.permute.xlu2 %2610 }
 0x3e6   : > { %3599 = vmatmul.msk.bf16.gmra.mxu0 %vm1194_vm8, %v2691_v56  ;;  %3619 = vmatmul.msk.bf16.gmra.mxu1 %vm1194_vm8, %v2693_v14  ;;  %v2697_v23 = vsel %vm1133_vm7, %v2667_v60, %v2637_v21  ;;  %v2609_v9 = vpop.permute.xlu0 %2608  ;;  %v2671_v43 = vsel %vm1102_vm6, %v5009_v40, %v2611_v1 }
 0x3e7   : > { %v2669_v3 = vsel %vm1102_vm6, %v4964_v61, %v2609_v9 }
 0x3ec   : > { %v2639_v2 = vpop.permute.xlu1 %2638 }
 0x3ed   : > { %v2699_v33 = vsel %vm1133_vm7, %v2669_v3, %v2639_v2  ;;  %v2643_v18 = vpop.permute.xlu2 %2642 }
 0x3ee   : > { %v2641_v38 = vpop.permute.xlu0 %2640 }
 0x3ef   : > { %v2701_v39 = vsel %vm1133_vm7, %v2671_v43, %v2641_v38 }
 0x3f0   : > { %3580 = vmatmul.msk.bf16.gmra.mxu3 %vm1194_vm8, %v2693_v14 }
 0x3f4   : > { %v2613_v61 = vpop.permute.xlu1 %2612 }
 0x3f5   : > { %v2673_v12 = vsel %vm1102_vm6, %v5000_v42, %v2613_v61  ;;  %v2617_v42 = vpop.permute.xlu2 %2616 }
 0x3f6   : > { %3600 = vmatmul.msk.bf16.gmra.mxu0 %vm1194_vm8, %v2689_v48  ;;  %3620 = vmatmul.msk.bf16.gmra.mxu1 %vm1194_vm8, %v2695_v31  ;;  %v2703_v0 = vsel %vm1133_vm7, %v2673_v12, %v2643_v18  ;;  %v2677_v47 = vsel %vm1102_vm6, %v5085_v37, %v2617_v42 }
 0x3f7   : > { %v2615_v40 = vpop.permute.xlu0 %2614 }
 0x3f8   : > { %v2675_v49 = vsel %vm1102_vm6, %v5031_v34, %v2615_v40 }
 0x3fc   : > { %v2645_v44 = vpop.permute.xlu1 %2644 }
 0x3fd   : > { %v2705_v17 = vsel %vm1133_vm7, %v2675_v49, %v2645_v44  ;;  %v2649_v5 = vpop.permute.xlu2 %2648 }
 0x3ff   : > { %v2647_v30 = vpop.permute.xlu0 %2646 }
 0x400   : > { %3581 = vmatmul.msk.bf16.gmra.mxu3 %vm1194_vm8, %v2695_v31  ;;  %v2707_v25 = vsel %vm1133_vm7, %v2677_v47, %v2647_v30 }
 0x404   : > { %v2619_v53 = vpop.permute.xlu1 %2618 }
 0x405   : > { %v2679_v37 = vsel %vm1102_vm6, %v5098_v55, %v2619_v53 }
 0x406   : > { %3601 = vmatmul.msk.bf16.gmra.mxu0 %vm1194_vm8, %v2693_v14  ;;  %3621 = vmatmul.msk.bf16.gmra.mxu1 %vm1194_vm8, %v2697_v23  ;;  %v2709_v11 = vsel %vm1133_vm7, %v2679_v37, %v2649_v5 }
 0x407   : > { %v2621_v55 = vpop.permute.xlu0 %2620 }
 0x408   : > { %v2681_v8 = vsel %vm1102_vm6, %v5125_v20, %v2621_v55 }
 0x40c   : > { %v2651_v26 = vpop.permute.xlu1 %2650 }
 0x40d   : > { %v2711_v45 = vsel %vm1133_vm7, %v2681_v8, %v2651_v26 }
 0x40f   : > { %v2653_v9 = vpop.permute.xlu0 %2652 }
 0x410   : > { %3582 = vmatmul.msk.bf16.gmra.mxu3 %vm1194_vm8, %v2697_v23 }
 0x414   : > { %v2625_v40 = vpop.permute.xlu1 %2624 }
 0x416   : > { %3602 = vmatmul.msk.bf16.gmra.mxu0 %vm1194_vm8, %v2695_v31  ;;  %3622 = vmatmul.msk.bf16.gmra.mxu1 %vm1194_vm8, %v2699_v33 }
 0x420   : > { %3583 = vmatmul.msk.bf16.gmra.mxu3 %vm1194_vm8, %v2699_v33 }
 0x426   : > { %3603 = vmatmul.msk.bf16.gmra.mxu0 %vm1194_vm8, %v2697_v23  ;;  %3623 = vmatmul.msk.bf16.gmra.mxu1 %vm1194_vm8, %v2701_v39  ;;  %v2623_v23 = vpop.permute.xlu2 %2622 }
 0x42e   : > { %v2655_v42 = vpop.permute.xlu2 %2654 }
 0x430   : > { %3584 = vmatmul.msk.bf16.gmra.mxu3 %vm1194_vm8, %v2701_v39 }
 0x436   : > { %3604 = vmatmul.msk.bf16.gmra.mxu0 %vm1194_vm8, %v2699_v33  ;;  %3624 = vmatmul.msk.bf16.gmra.mxu1 %vm1194_vm8, %v2703_v0  ;;  %v2683_v33 = vsel %vm1102_vm6, %v5131_v10, %v2623_v23  ;;  %v2685_v10 = vsel %vm1102_vm6, %v5116_v62, %v2625_v40  ;;  %v2627_v62 = vpop.permute.xlu0 %2626 }
 0x437   : > { %v2713_v38 = vsel %vm1133_vm7, %v2683_v33, %v2653_v9  ;;  %v2687_v37 = vsel %vm1102_vm6, %v5136_v63, %v2627_v62 }
 0x440   : > { %3585 = vmatmul.msk.bf16.gmra.mxu3 %vm1194_vm8, %v2703_v0 }
 0x446   : > { %3605 = vmatmul.msk.bf16.gmra.mxu0 %vm1194_vm8, %v2701_v39  ;;  %3625 = vmatmul.msk.bf16.gmra.mxu1 %vm1194_vm8, %v2705_v17 }
 0x450   : > { %3586 = vmatmul.msk.bf16.gmra.mxu3 %vm1194_vm8, %v2705_v17 }
 0x453   : > { %v2792_v32 = vpop.f32.mrf.mxu3  ;;  %v2889_v28 = vpop.f32.mrf.mxu0 }
 0x454   : > { %v2986_v16 = vpop.f32.mrf.mxu1  ;;  %v2890_v7 = vadd.f32 %v2889_v28, %v2792_v32  ;;  %v2715_v32 = vsel %vm1133_vm7, %v2685_v10, %v2655_v42 }
 0x456   : > { %v5276_v34 = vadd.f32 %v2986_v16, %v2890_v7  ;;  %3606 = vmatmul.msk.bf16.gmra.mxu0 %vm1194_vm8, %v2703_v0  ;;  %3626 = vmatmul.msk.bf16.gmra.mxu1 %vm1194_vm8, %v2707_v25 }
 0x45b   : > { %v2794_v57 = vpop.f32.mrf.mxu3  ;;  %v2891_v4 = vpop.f32.mrf.mxu0 }
 0x45c   : > { %v2988_v46 = vpop.f32.mrf.mxu1  ;;  %v2892_v36 = vadd.f32 %v2891_v4, %v2794_v57  ;;  %v2657_v4 = vpop.permute.xlu1 %2656 }
 0x45e   : > { %v5280_v22 = vadd.f32 %v2988_v46, %v2892_v36 }
 0x460   : > { %3587 = vmatmul.msk.bf16.gmra.mxu3 %vm1194_vm8, %v2707_v25 }
 0x463   : > { %v2797_v13 = vpop.f32.mrf.mxu3  ;;  %v2894_v51 = vpop.f32.mrf.mxu0 }
 0x464   : > { %v2991_v35 = vpop.f32.mrf.mxu1  ;;  %v2895_v52 = vadd.f32 %v2894_v51, %v2797_v13  ;;  %v2717_v51 = vsel %vm1133_vm7, %v2687_v37, %v2657_v4 }
 0x466   : > { %v5286_v58 = vadd.f32 %v2991_v35, %v2895_v52  ;;  %3607 = vmatmul.msk.bf16.gmra.mxu0 %vm1194_vm8, %v2705_v17  ;;  %3627 = vmatmul.msk.bf16.gmra.mxu1 %vm1194_vm8, %v2709_v11 }
 0x46b   : > { %v2799_v29 = vpop.f32.mrf.mxu3  ;;  %v2896_v50 = vpop.f32.mrf.mxu0 }
 0x46c   : > { %v2993_v56 = vpop.f32.mrf.mxu1  ;;  %v2897_v19 = vadd.f32 %v2896_v50, %v2799_v29 }
 0x46e   : > { %v5290_v41 = vadd.f32 %v2993_v56, %v2897_v19  ;;  %v2736_v56 = vpop.permute.xlu2 %2735  ;;  %v2738_v19 = vpop.permute.xlu0 %2737 }
 0x470   : > { %3588 = vmatmul.msk.bf16.gmra.mxu3 %vm1194_vm8, %v2709_v11 }
 0x473   : > { %v2802_v48 = vpop.f32.mrf.mxu3  ;;  %v2899_v15 = vpop.f32.mrf.mxu0 }
 0x474   : > { %v2996_v59 = vpop.f32.mrf.mxu1  ;;  %v2900_v14 = vadd.f32 %v2899_v15, %v2802_v48  ;;  %v2740_v48 = vsel %vm1102_vm6, %v5171_v24, %v2736_v56 }
 0x476   : > { %v5296_v6 = vadd.f32 %v2996_v59, %v2900_v14  ;;  %3608 = vmatmul.msk.bf16.gmra.mxu0 %vm1194_vm8, %v2707_v25  ;;  %3628 = vmatmul.msk.bf16.gmra.mxu1 %vm1194_vm8, %v2711_v45  ;;  %v2742_v59 = vsel %vm1133_vm7, %v2740_v48, %v2738_v19 }
 0x47b   : > { %v2804_v54 = vpop.f32.mrf.mxu3  ;;  %v2901_v31 = vpop.f32.mrf.mxu0 }
 0x47c   : > { %v2998_v27 = vpop.f32.mrf.mxu1  ;;  %v2902_v60 = vadd.f32 %v2901_v31, %v2804_v54 }
 0x47e   : > { %v5300_v21 = vadd.f32 %v2998_v27, %v2902_v60 }
 0x480   : > { %3589 = vmatmul.msk.bf16.gmra.mxu3 %vm1194_vm8, %v2711_v45 }
 0x483   : > { %v2807_v20 = vpop.f32.mrf.mxu3  ;;  %v2904_v2 = vpop.f32.mrf.mxu0 }
 0x484   : > { %v3001_v3 = vpop.f32.mrf.mxu1  ;;  %v2905_v1 = vadd.f32 %v2904_v2, %v2807_v20 }
 0x486   : > { %v5306_v43 = vadd.f32 %v3001_v3, %v2905_v1  ;;  %3609 = vmatmul.msk.bf16.gmra.mxu0 %vm1194_vm8, %v2709_v11  ;;  %3629 = vmatmul.msk.bf16.gmra.mxu1 %vm1194_vm8, %v2713_v38 }
 0x48b   : > { %v2809_v39 = vpop.f32.mrf.mxu3  ;;  %v2906_v61 = vpop.f32.mrf.mxu0 }
 0x48c   : > { %v3003_v12 = vpop.f32.mrf.mxu1  ;;  %v2907_v18 = vadd.f32 %v2906_v61, %v2809_v39 }
 0x48e   : > { %v5310_v0 = vadd.f32 %v3003_v12, %v2907_v18 }
 0x490   : > { %3590 = vmatmul.msk.bf16.gmra.mxu3 %vm1194_vm8, %v2713_v38 }
 0x493   : > { %v2812_v44 = vpop.f32.mrf.mxu3  ;;  %v2909_v49 = vpop.f32.mrf.mxu0 }
 0x494   : > { %v3006_v17 = vpop.f32.mrf.mxu1  ;;  %v2910_v30 = vadd.f32 %v2909_v49, %v2812_v44 }
 0x496   : > { %v5316_v28 = vadd.f32 %v3006_v17, %v2910_v30  ;;  %3610 = vmatmul.msk.bf16.gmra.mxu0 %vm1194_vm8, %v2711_v45  ;;  %3630 = vmatmul.msk.bf16.gmra.mxu1 %vm1194_vm8, %v2715_v32 }
 0x49b   : > { %v2814_v16 = vpop.f32.mrf.mxu3  ;;  %v2911_v47 = vpop.f32.mrf.mxu0 }
 0x49c   : > { %v3008_v7 = vpop.f32.mrf.mxu1  ;;  %v2912_v25 = vadd.f32 %v2911_v47, %v2814_v16 }
 0x49e   : > { %v5320_v57 = vadd.f32 %v3008_v7, %v2912_v25 }
 0x4a0   : > { %3591 = vmatmul.msk.bf16.gmra.mxu3 %vm1194_vm8, %v2715_v32 }
 0x4a3   : > { %v2817_v46 = vpop.f32.mrf.mxu3  ;;  %v2914_v36 = vpop.f32.mrf.mxu0 }
 0x4a4   : > { %v3011_v53 = vpop.f32.mrf.mxu1  ;;  %v2915_v13 = vadd.f32 %v2914_v36, %v2817_v46 }
 0x4a6   : > { %v5326_v35 = vadd.f32 %v3011_v53, %v2915_v13  ;;  %3611 = vmatmul.msk.bf16.gmra.mxu0 %vm1194_vm8, %v2713_v38  ;;  %3631 = vmatmul.msk.bf16.gmra.mxu1 %vm1194_vm8, %v2717_v51 }
 0x4ab   : > { %v2819_v5 = vpop.f32.mrf.mxu3  ;;  %v2916_v52 = vpop.f32.mrf.mxu0 }
 0x4ac   : > { %v3013_v11 = vpop.f32.mrf.mxu1  ;;  %v2917_v29 = vadd.f32 %v2916_v52, %v2819_v5 }
 0x4ae   : > { %v5330_v50 = vadd.f32 %v3013_v11, %v2917_v29 }
 0x4b0   : > { %3592 = vmatmul.msk.bf16.gmra.mxu3 %vm1194_vm8, %v2717_v51 }
 0x4b3   : > { %v2822_v63 = vpop.f32.mrf.mxu3  ;;  %v2919_v55 = vpop.f32.mrf.mxu0 }
 0x4b4   : > { %v3016_v26 = vpop.f32.mrf.mxu1  ;;  %v2920_v15 = vadd.f32 %v2919_v55, %v2822_v63 }
 0x4b6   : > { %v5336_v8 = vadd.f32 %v3016_v26, %v2920_v15  ;;  %3612 = vmatmul.msk.bf16.gmra.mxu0 %vm1194_vm8, %v2715_v32  ;;  %3632 = vmatmul.msk.bf16.gmra.mxu1 %vm1194_vm8, %v2742_v59  ;;  %v3101_v15 = vsel %vm1102_vm6, %v5280_v22, 0.0 }
 0x4bb   : > { %v2824_v14 = vpop.f32.mrf.mxu3  ;;  %v2921_v45 = vpop.f32.mrf.mxu0 }
 0x4bc   : > { %v3018_v54 = vpop.f32.mrf.mxu1  ;;  %v2922_v31 = vadd.f32 %v2921_v45, %v2824_v14 }
 0x4be   : > { %v5340_v27 = vadd.f32 %v3018_v54, %v2922_v31  ;;  %v3100_v54 = vsel %vm1102_vm6, %v5276_v34, 0.0  ;;  %v3103_v31 = vsel %vm1102_vm6, %v5286_v58, 0.0 }
 0x4c0   : > { %3593 = vmatmul.msk.bf16.gmra.mxu3 %vm1194_vm8, %v2742_v59 }
 0x4c3   : > { %v2827_v60 = vpop.f32.mrf.mxu3  ;;  %v2924_v23 = vpop.f32.mrf.mxu0 }
 0x4c4   : > { %v3021_v24 = vpop.f32.mrf.mxu1  ;;  %v2925_v9 = vadd.f32 %v2924_v23, %v2827_v60  ;;  %v3102_v60 = vadd.f32 %v3101_v15, %v3100_v54  ;;  %v3105_v23 = vsel %vm1102_vm6, %v5290_v41, 0.0 }
 0x4c6   : > { %v5343_v20 = vadd.f32 %v3021_v24, %v2925_v9  ;;  %3613 = vmatmul.msk.bf16.gmra.mxu0 %vm1194_vm8, %v2717_v51  ;;  %3633 = vmatmul.msk.bf16.gmra.mxu1 %vm1194_vm8, %v2717_v51  ;;  %v3104_v24 = vadd.f32 %v3103_v31, %v3102_v60  ;;  %v3107_v9 = vsel %vm1102_vm6, %v5296_v6, 0.0 }
 0x4cb   : > { %v2829_v2 = vpop.f32.mrf.mxu3  ;;  %v2926_v3 = vpop.f32.mrf.mxu0 }
 0x4cc   : > { %v3023_v33 = vpop.f32.mrf.mxu1  ;;  %v2927_v1 = vadd.f32 %v2926_v3, %v2829_v2  ;;  %v3106_v2 = vadd.f32 %v3105_v23, %v3104_v24  ;;  %v3109_v3 = vsel %vm1102_vm6, %v5300_v21, 0.0  ;;  %v3127_v23 = vsel %vm1102_vm6, %v5343_v20, 0.0 }
 0x4ce   : > { %v5347_v38 = vadd.f32 %v3023_v33, %v2927_v1  ;;  %v3108_v1 = vadd.f32 %v3107_v9, %v3106_v2 }
 0x4d0   : > { %v3129_v9 = vsel %vm1102_vm6, %v5347_v38, 0.0 }
 0x4d3   : > { %v2832_v39 = vpop.f32.mrf.mxu3  ;;  %v2929_v61 = vpop.f32.mrf.mxu0 }
 0x4d4   : > { %v3026_v12 = vpop.f32.mrf.mxu1  ;;  %v2930_v18 = vadd.f32 %v2929_v61, %v2832_v39 }
 0x4d6   : > { %v5349_v40 = vadd.f32 %v3026_v12, %v2930_v18  ;;  %v3111_v12 = vsel %vm1102_vm6, %v5306_v43, 0.0  ;;  %v3110_v18 = vadd.f32 %v3109_v3, %v3108_v1 }
 0x4d8   : > { %v3131_v3 = vsel %vm1102_vm6, %v5349_v40, 0.0 }
 0x4db   : > { %v2834_v10 = vpop.f32.mrf.mxu3  ;;  %v2931_v44 = vpop.f32.mrf.mxu0 }
 0x4dc   : > { %v3028_v49 = vpop.f32.mrf.mxu1  ;;  %v2932_v17 = vadd.f32 %v2931_v44, %v2834_v10  ;;  %v3113_v10 = vsel %vm1102_vm6, %v5310_v0, 0.0  ;;  %v3112_v44 = vadd.f32 %v3111_v12, %v3110_v18 }
 0x4de   : > { %v5351_v42 = vadd.f32 %v3028_v49, %v2932_v17  ;;  %v3115_v49 = vsel %vm1102_vm6, %v5316_v28, 0.0  ;;  %v3114_v17 = vadd.f32 %v3113_v10, %v3112_v44 }
 0x4e0   : > { %v3133_v12 = vsel %vm1102_vm6, %v5351_v42, 0.0 }
 0x4e3   : > { %v2837_v30 = vpop.f32.mrf.mxu3  ;;  %v2934_v32 = vpop.f32.mrf.mxu0 }
 0x4e4   : > { %v3031_v16 = vpop.f32.mrf.mxu1  ;;  %v2935_v47 = vadd.f32 %v2934_v32, %v2837_v30  ;;  %v3117_v30 = vsel %vm1102_vm6, %v5320_v57, 0.0 }
 0x4e6   : > { %v5353_v7 = vadd.f32 %v3031_v16, %v2935_v47  ;;  %v3116_v16 = vadd.f32 %v3115_v49, %v3114_v17 }
 0x4eb   : > { %v2839_v25 = vpop.f32.mrf.mxu3  ;;  %v2936_v62 = vpop.f32.mrf.mxu0 }
 0x4ec   : > { %v3033_v4 = vpop.f32.mrf.mxu1  ;;  %v2937_v46 = vadd.f32 %v2936_v62, %v2839_v25  ;;  %v3119_v62 = vsel %vm1102_vm6, %v5326_v35, 0.0 }
 0x4ee   : > { %v5355_v36 = vadd.f32 %v3033_v4, %v2937_v46  ;;  %v3118_v4 = vadd.f32 %v3117_v30, %v3116_v16  ;;  %v3121_v46 = vsel %vm1102_vm6, %v5330_v50, 0.0  ;;  %v3135_v30 = vsel %vm1102_vm6, %v5353_v7, 0.0 }
 0x4f3   : > { %v2842_v53 = vpop.f32.mrf.mxu3  ;;  %v2939_v37 = vpop.f32.mrf.mxu0 }
 0x4f4   : > { %v3036_v13 = vpop.f32.mrf.mxu1  ;;  %v2940_v51 = vadd.f32 %v2939_v37, %v2842_v53  ;;  %v3120_v53 = vadd.f32 %v3119_v62, %v3118_v4  ;;  %v3123_v37 = vsel %vm1102_vm6, %v5336_v8, 0.0  ;;  %v3137_v4 = vsel %vm1102_vm6, %v5355_v36, 0.0 }
 0x4f6   : > { %v5357_v5 = vadd.f32 %v3036_v13, %v2940_v51  ;;  %v3122_v13 = vadd.f32 %v3121_v46, %v3120_v53  ;;  %v3125_v51 = vsel %vm1102_vm6, %v5340_v27, 0.0 }
 0x4f8   : > { %v3124_v54 = vadd.f32 %v3123_v37, %v3122_v13  ;;  %v3139_v13 = vsel %vm1102_vm6, %v5357_v5, 0.0 }
 0x4fa   : > { %v3126_v24 = vadd.f32 %v3125_v51, %v3124_v54 }
 0x4fb   : > { %v2844_v52 = vpop.f32.mrf.mxu3  ;;  %v2941_v11 = vpop.f32.mrf.mxu0 }
 0x4fc   : > { %v3038_v29 = vpop.f32.mrf.mxu1  ;;  %v3128_v2 = vadd.f32 %v3127_v23, %v3126_v24  ;;  %v2942_v18 = vadd.f32 %v2941_v11, %v2844_v52 }
 0x4fe   : > { %v3130_v1 = vadd.f32 %v3129_v9, %v3128_v2  ;;  %v5403_v46 = vadd.f32 %v3038_v29, %v2942_v18 }
 0x500   : > { %v3132_v44 = vadd.f32 %v3131_v3, %v3130_v1  ;;  %v3141_v54 = vsel %vm1102_vm6, %v5403_v46, 0.0 }
 0x502   : > { %v3134_v62 = vadd.f32 %v3133_v12, %v3132_v44 }
 0x503   : > { %v2847_v56 = vpop.f32.mrf.mxu3  ;;  %v2944_v19 = vpop.f32.mrf.mxu0 }
 0x504   : > { %v3041_v63 = vpop.f32.mrf.mxu1  ;;  %v2945_v16 = vadd.f32 %v2944_v19, %v2847_v56  ;;  %v3136_v37 = vadd.f32 %v3135_v30, %v3134_v62 }
 0x506   : > { %v5407_v52 = vadd.f32 %v3041_v63, %v2945_v16  ;;  %v3138_v51 = vadd.f32 %v3137_v4, %v3136_v37 }
 0x508   : > { %v3140_v24 = vadd.f32 %v3139_v13, %v3138_v51 }
 0x50b   : > { %v2849_v55 = vpop.f32.mrf.mxu3  ;;  %v2946_v26 = vpop.f32.mrf.mxu0 }
 0x50c   : > { %v5359_v48 = vpop.f32.mrf.mxu1  ;;  %v2947_v53 = vadd.f32 %v2946_v26, %v2849_v55  ;;  %v3143_v55 = vsel %vm1102_vm6, %v5407_v52, 0.0 }
 0x50e   : > { %v5412_v56 = vadd.f32 %v5359_v48, %v2947_v53 }
 0x513   : > { %v2852_v59 = vpop.f32.mrf.mxu3  ;;  %v2949_v14 = vpop.f32.mrf.mxu0 }
 0x514   : > { %v5363_v45 = vpop.f32.mrf.mxu1  ;;  %v2950_v11 = vadd.f32 %v2949_v14, %v2852_v59  ;;  %v3142_v59 = vadd.f32 %v3141_v54, %v3140_v24  ;;  %v3145_v14 = vsel %vm1102_vm6, %v5412_v56, 0.0 }
 0x516   : > { %v5417_v26 = vadd.f32 %v5363_v45, %v2950_v11  ;;  %v3144_v3 = vadd.f32 %v3143_v55, %v3142_v59 }
 0x518   : > { %v3146_v12 = vadd.f32 %v3145_v14, %v3144_v3 }
 0x51b   : > { %v2854_v33 = vpop.f32.mrf.mxu3  ;;  %v2951_v39 = vpop.f32.mrf.mxu0 }
 0x51c   : > { %v3048_v61 = vpop.f32.mrf.mxu1  ;;  %v2952_v19 = vadd.f32 %v2951_v39, %v2854_v33  ;;  %v3147_v33 = vsel %vm1102_vm6, %v5417_v26, 0.0 }
 0x51d   : > { %v3148_v44 = vadd.f32 %v3147_v33, %v3146_v12 }
 0x51e   : > { %v5421_v2 = vadd.f32 %v3048_v61, %v2952_v19 }
 0x520   : > { %v3149_v45 = vsel %vm1102_vm6, %v5421_v2, 0.0 }
 0x523   : > { %v2857_v32 = vpop.f32.mrf.mxu3  ;;  %v2954_v47 = vpop.f32.mrf.mxu0 }
 0x524   : > { %v3051_v25 = vpop.f32.mrf.mxu1  ;;  %v2955_v63 = vadd.f32 %v2954_v47, %v2857_v32 }
 0x526   : > { %v5425_v39 = vadd.f32 %v3051_v25, %v2955_v63  ;;  %v3150_v25 = vadd.f32 %v3149_v45, %v3148_v44 }
 0x52b   : > { %v2859_v15 = vpop.f32.mrf.mxu3  ;;  %v2956_v31 = vpop.f32.mrf.mxu0 }
 0x52c   : > { %v3053_v60 = vpop.f32.mrf.mxu1  ;;  %v2957_v48 = vadd.f32 %v2956_v31, %v2859_v15  ;;  %v3151_v15 = vsel %vm1102_vm6, %v5425_v39, 0.0 }
 0x52d   : > { %v3152_v62 = vadd.f32 %v3151_v15, %v3150_v25 }
 0x52e   : > { %v5429_v18 = vadd.f32 %v3053_v60, %v2957_v48 }
 0x533   : > { %v2862_v10 = vpop.f32.mrf.mxu3  ;;  %v2959_v49 = vpop.f32.mrf.mxu0 }
 0x534   : > { %v3056_v17 = vpop.f32.mrf.mxu1  ;;  %v2960_v1 = vadd.f32 %v2959_v49, %v2862_v10  ;;  %v3153_v10 = vsel %vm1102_vm6, %v5429_v18, 0.0 }
 0x535   : > { %v3154_v53 = vadd.f32 %v3153_v10, %v3152_v62 }
 0x536   : > { %v5433_v31 = vadd.f32 %v3056_v17, %v2960_v1  ;;  %v5826_v1 = vld [vmem:[#allocation3_spill] sm:$0xff] }
 0x538   : > { %v3155_v60 = vsel %vm1102_vm6, %v5433_v31, 0.0 }
 0x539   : > { %v3156_v17 = vadd.f32 %v3155_v60, %v3154_v53 }
 0x53b   : > { %v2864_v23 = vpop.f32.mrf.mxu3  ;;  %v2961_v29 = vpop.f32.mrf.mxu0 }
 0x53c   : > { %v3058_v9 = vpop.f32.mrf.mxu1  ;;  %v2962_v32 = vadd.f32 %v2961_v29, %v2864_v23 }
 0x53e   : > { %v5437_v49 = vadd.f32 %v3058_v9, %v2962_v32 }
 0x540   : > { %v3157_v37 = vsel %vm1102_vm6, %v5437_v49, 0.0 }
 0x541   : > { %v3158_v19 = vadd.f32 %v3157_v37, %v3156_v17 }
 0x543   : > { %v2867_v47 = vpop.f32.mrf.mxu3  ;;  %v2964_v30 = vpop.f32.mrf.mxu0 }
 0x544   : > { %v3061_v61 = vpop.f32.mrf.mxu1  ;;  %v2965_v16 = vadd.f32 %v2964_v30, %v2867_v47 }
 0x546   : > { %v5441_v4 = vadd.f32 %v3061_v61, %v2965_v16 }
 0x548   : > { %v3159_v51 = vsel %vm1102_vm6, %v5441_v4, 0.0 }
 0x549   : > { %v3160_v29 = vadd.f32 %v3159_v51, %v3158_v19 }
 0x54b   : > { %v2869_v13 = vpop.f32.mrf.mxu3  ;;  %v2966_v11 = vpop.f32.mrf.mxu0 }
 0x54c   : > { %v2967_v54 = vadd.f32 %v2966_v11, %v2869_v13  ;;  %v3063_v23 = vpop.f32.mrf.mxu1 }
 0x54e   : > { %v5447_v24 = vadd.f32 %v3063_v23, %v2967_v54 }
 0x550   : > { %v3161_v9 = vsel %vm1102_vm6, %v5447_v24, 0.0 }
 0x551   : > { %v3162_v55 = vadd.f32 %v3161_v9, %v3160_v29 }
 0x553   : > { %v3163_v63 = vrot.slane %v3162_v55, 4 }
 0x555   : > { %v3164_v59 = vadd.f32 %v3163_v63, %v3162_v55 }
 0x557   : > { %v3165_v14 = vrot.slane %v3164_v59, 2 }
 0x559   : > { %v3166_v48 = vadd.f32 %v3165_v14, %v3164_v59 }
 0x55b   : > { %v3167_v3 = vrot.slane %v3166_v48, 1 }
 0x55d   : > { %v3168_v33 = vadd.f32 %v3167_v3, %v3166_v48 }
 0x55f   : > { %v5452_v12 = vmul.f32 %v3168_v33, %v5826_v1 }
 0x561   : > { %v3170_v45 = vsub.f32 %v5276_v34, %v5452_v12  ;;  %v3171_v32 = vsub.f32 %v5280_v22, %v5452_v12  ;;  %v3172_v47 = vsub.f32 %v5286_v58, %v5452_v12  ;;  %v3173_v44 = vsub.f32 %v5290_v41, %v5452_v12 }
 0x562   : > { %v3174_v15 = vsub.f32 %v5296_v6, %v5452_v12  ;;  %v3175_v25 = vsub.f32 %v5300_v21, %v5452_v12  ;;  %v3176_v37 = vsub.f32 %v5306_v43, %v5452_v12  ;;  %v3177_v51 = vsub.f32 %v5310_v0, %v5452_v12 }
 0x563   : > { %v3202_v30 = vmul.f32 %v3170_v45, %v3170_v45  ;;  %v3203_v61 = vmul.f32 %v3171_v32, %v3171_v32  ;;  %v3204_v16 = vmul.f32 %v3172_v47, %v3172_v47  ;;  %v3205_v10 = vmul.f32 %v3173_v44, %v3173_v44 }
 0x564   : > { %v3206_v13 = vmul.f32 %v3174_v15, %v3174_v15  ;;  %v3207_v54 = vmul.f32 %v3175_v25, %v3175_v25  ;;  %v3178_v29 = vsub.f32 %v5316_v28, %v5452_v12  ;;  %v3208_v9 = vmul.f32 %v3176_v37, %v3176_v37 }
 0x565   : > { %v3234_v62 = vsel %vm1102_vm6, %v3202_v30, 0.0  ;;  %v3235_v60 = vsel %vm1102_vm6, %v3203_v61, 0.0  ;;  %v3237_v17 = vsel %vm1102_vm6, %v3204_v16, 0.0  ;;  %v3239_v19 = vsel %vm1102_vm6, %v3205_v10, 0.0 }
 0x566   : > { %v3236_v53 = vadd.f32 %v3235_v60, %v3234_v62  ;;  %v3241_v55 = vsel %vm1102_vm6, %v3206_v13, 0.0  ;;  %v3179_v59 = vsub.f32 %v5320_v57, %v5452_v12  ;;  %v3209_v14 = vmul.f32 %v3177_v51, %v3177_v51 }
 0x567   : > { %v3243_v48 = vsel %vm1102_vm6, %v3207_v54, 0.0  ;;  %v3180_v33 = vsub.f32 %v5326_v35, %v5452_v12  ;;  %v3210_v45 = vmul.f32 %v3178_v29, %v3178_v29  ;;  %v3245_v32 = vsel %vm1102_vm6, %v3208_v9, 0.0 }
 0x568   : > { %v3238_v11 = vadd.f32 %v3237_v17, %v3236_v53  ;;  %v3181_v44 = vsub.f32 %v5330_v50, %v5452_v12  ;;  %v3211_v30 = vmul.f32 %v3179_v59, %v3179_v59  ;;  %v3247_v61 = vsel %vm1102_vm6, %v3209_v14, 0.0 }
 0x569   : > { %v3182_v16 = vsub.f32 %v5336_v8, %v5452_v12  ;;  %v3212_v25 = vmul.f32 %v3180_v33, %v3180_v33  ;;  %v3249_v10 = vsel %vm1102_vm6, %v3210_v45, 0.0  ;;  %v3183_v60 = vsub.f32 %v5340_v27, %v5452_v12 }
 0x56a   : > { %v3240_v23 = vadd.f32 %v3239_v19, %v3238_v11  ;;  %v3213_v53 = vmul.f32 %v3181_v44, %v3181_v44  ;;  %v3251_v37 = vsel %vm1102_vm6, %v3211_v30, 0.0  ;;  %v3184_v17 = vsub.f32 %v5343_v20, %v5452_v12 }
 0x56b   : > { %v3214_v11 = vmul.f32 %v3182_v16, %v3182_v16  ;;  %v3253_v51 = vsel %vm1102_vm6, %v3212_v25, 0.0  ;;  %v3185_v19 = vsub.f32 %v5347_v38, %v5452_v12 }
 0x56c   : > { %v3242_v63 = vadd.f32 %v3241_v55, %v3240_v23  ;;  %v3215_v23 = vmul.f32 %v3183_v60, %v3183_v60  ;;  %v3255_v29 = vsel %vm1102_vm6, %v3213_v53, 0.0  ;;  %v3186_v55 = vsub.f32 %v5349_v40, %v5452_v12 }
 0x56d   : > { %v3257_v59 = vsel %vm1102_vm6, %v3214_v11, 0.0 }
 0x56e   : > { %v3244_v3 = vadd.f32 %v3243_v48, %v3242_v63  ;;  %v3216_v63 = vmul.f32 %v3184_v17, %v3184_v17  ;;  %v3187_v48 = vsub.f32 %v5351_v42, %v5452_v12  ;;  %v3259_v33 = vsel %vm1102_vm6, %v3215_v23, 0.0 }
 0x570   : > { %v3246_v47 = vadd.f32 %v3245_v32, %v3244_v3  ;;  %v3217_v3 = vmul.f32 %v3185_v19, %v3185_v19  ;;  %v3188_v32 = vsub.f32 %v5353_v7, %v5452_v12  ;;  %v3261_v44 = vsel %vm1102_vm6, %v3216_v63, 0.0 }
 0x572   : > { %v3248_v15 = vadd.f32 %v3247_v61, %v3246_v47  ;;  %v3218_v47 = vmul.f32 %v3186_v55, %v3186_v55  ;;  %v3189_v61 = vsub.f32 %v5355_v36, %v5452_v12  ;;  %v3263_v16 = vsel %vm1102_vm6, %v3217_v3, 0.0 }
 0x574   : > { %v3250_v62 = vadd.f32 %v3249_v10, %v3248_v15  ;;  %v3219_v15 = vmul.f32 %v3187_v48, %v3187_v48  ;;  %v3190_v10 = vsub.f32 %v5357_v5, %v5452_v12  ;;  %v3265_v60 = vsel %vm1102_vm6, %v3218_v47, 0.0 }
 0x576   : > { %v3252_v13 = vadd.f32 %v3251_v37, %v3250_v62  ;;  %v3220_v62 = vmul.f32 %v3188_v32, %v3188_v32  ;;  %v3191_v37 = vsub.f32 %v5403_v46, %v5452_v12  ;;  %v3267_v17 = vsel %vm1102_vm6, %v3219_v15, 0.0 }
 0x578   : > { %v3254_v54 = vadd.f32 %v3253_v51, %v3252_v13  ;;  %v3221_v13 = vmul.f32 %v3189_v61, %v3189_v61  ;;  %v3192_v51 = vsub.f32 %v5407_v52, %v5452_v12  ;;  %v3269_v19 = vsel %vm1102_vm6, %v3220_v62, 0.0 }
 0x57a   : > { %v3256_v9 = vadd.f32 %v3255_v29, %v3254_v54  ;;  %v3222_v54 = vmul.f32 %v3190_v10, %v3190_v10  ;;  %v3193_v29 = vsub.f32 %v5412_v56, %v5452_v12  ;;  %v3271_v55 = vsel %vm1102_vm6, %v3221_v13, 0.0 }
 0x57c   : > { %v3258_v14 = vadd.f32 %v3257_v59, %v3256_v9  ;;  %v3223_v9 = vmul.f32 %v3191_v37, %v3191_v37  ;;  %v3194_v59 = vsub.f32 %v5417_v26, %v5452_v12  ;;  %v3273_v48 = vsel %vm1102_vm6, %v3222_v54, 0.0 }
 0x57e   : > { %v3260_v45 = vadd.f32 %v3259_v33, %v3258_v14  ;;  %v3224_v14 = vmul.f32 %v3192_v51, %v3192_v51  ;;  %v3195_v33 = vsub.f32 %v5421_v2, %v5452_v12  ;;  %v3275_v32 = vsel %vm1102_vm6, %v3223_v9, 0.0 }
 0x580   : > { %v3262_v30 = vadd.f32 %v3261_v44, %v3260_v45  ;;  %v3225_v45 = vmul.f32 %v3193_v29, %v3193_v29  ;;  %v3196_v44 = vsub.f32 %v5425_v39, %v5452_v12  ;;  %v3277_v61 = vsel %vm1102_vm6, %v3224_v14, 0.0 }
 0x582   : > { %v3264_v25 = vadd.f32 %v3263_v16, %v3262_v30  ;;  %v3226_v30 = vmul.f32 %v3194_v59, %v3194_v59  ;;  %v3197_v16 = vsub.f32 %v5429_v18, %v5452_v12  ;;  %v3279_v10 = vsel %vm1102_vm6, %v3225_v45, 0.0 }
 0x584   : > { %v3266_v53 = vadd.f32 %v3265_v60, %v3264_v25  ;;  %v3227_v25 = vmul.f32 %v3195_v33, %v3195_v33  ;;  %v3198_v60 = vsub.f32 %v5433_v31, %v5452_v12  ;;  %v3281_v37 = vsel %vm1102_vm6, %v3226_v30, 0.0 }
 0x586   : > { %v3268_v11 = vadd.f32 %v3267_v17, %v3266_v53  ;;  %v3228_v53 = vmul.f32 %v3196_v44, %v3196_v44  ;;  %v3199_v17 = vsub.f32 %v5437_v49, %v5452_v12  ;;  %v3283_v51 = vsel %vm1102_vm6, %v3227_v25, 0.0 }
 0x588   : > { %v3270_v23 = vadd.f32 %v3269_v19, %v3268_v11  ;;  %v3229_v11 = vmul.f32 %v3197_v16, %v3197_v16  ;;  %v3200_v19 = vsub.f32 %v5441_v4, %v5452_v12  ;;  %v3285_v29 = vsel %vm1102_vm6, %v3228_v53, 0.0 }
 0x58a   : > { %v3272_v63 = vadd.f32 %v3271_v55, %v3270_v23  ;;  %v3230_v23 = vmul.f32 %v3198_v60, %v3198_v60  ;;  %v3201_v55 = vsub.f32 %v5447_v24, %v5452_v12  ;;  %v3287_v59 = vsel %vm1102_vm6, %v3229_v11, 0.0 }
 0x58c   : > { %v3274_v3 = vadd.f32 %v3273_v48, %v3272_v63  ;;  %v3231_v63 = vmul.f32 %v3199_v17, %v3199_v17  ;;  %v3232_v48 = vmul.f32 %v3200_v19, %v3200_v19  ;;  %v3233_v45 = vmul.f32 %v3201_v55, %v3201_v55 }
 0x58e   : > { %v3276_v47 = vadd.f32 %v3275_v32, %v3274_v3  ;;  %v3289_v3 = vsel %vm1102_vm6, %v3230_v23, 0.0  ;;  %v3291_v32 = vsel %vm1102_vm6, %v3231_v63, 0.0  ;;  %v3293_v44 = vsel %vm1102_vm6, %v3232_v48, 0.0 }
 0x590   : > { %v3278_v15 = vadd.f32 %v3277_v61, %v3276_v47  ;;  %v3295_v61 = vsel %vm1102_vm6, %v3233_v45, 0.0 }
 0x592   : > { %v3280_v62 = vadd.f32 %v3279_v10, %v3278_v15 }
 0x594   : > { %v3282_v13 = vadd.f32 %v3281_v37, %v3280_v62 }
 0x596   : > { %v3284_v54 = vadd.f32 %v3283_v51, %v3282_v13 }
 0x598   : > { %v3286_v9 = vadd.f32 %v3285_v29, %v3284_v54  ;;  %v3098_v29 = vld [vmem:[%s5769_s5] sm:$0x1] }
 0x59a   : > { %v3288_v14 = vadd.f32 %v3287_v59, %v3286_v9 }
 0x59c   : > { %v3290_v33 = vadd.f32 %v3289_v3, %v3288_v14 }
 0x59e   : > { %v3292_v47 = vadd.f32 %v3291_v32, %v3290_v33 }
 0x5a0   : > { %v3294_v30 = vadd.f32 %v3293_v44, %v3292_v47 }
 0x5a2   : > { %v3296_v15 = vadd.f32 %v3295_v61, %v3294_v30 }
 0x5a4   : > { %v3297_v16 = vrot.slane %v3296_v15, 4 }
 0x5a6   : > { %v3298_v25 = vadd.f32 %v3297_v16, %v3296_v15  ;;  %v3663_v15 = vld [vmem:[%s3762_s29] sm:$0xff] }
 0x5a8   : > { %v3299_v10 = vrot.slane %v3298_v25, 2 }
 0x5aa   : > { %v3300_v62 = vadd.f32 %v3299_v10, %v3298_v25  ;;  %v3664_v25 = vld [vmem:[%s3762_s29 + $0x8] sm:$0xff] }
 0x5ac   : > { %v3301_v60 = vrot.slane %v3300_v62, 1 }
 0x5ae   : > { %v3302_v53 = vadd.f32 %v3301_v60, %v3300_v62  ;;  %v3665_v62 = vld [vmem:[%s3762_s29 + $0x10] sm:$0xff] }
 0x5b0   : > { %v3303_v37 = vmul.f32 %v3302_v53, %v5826_v1  ;;  %v3099_v1 = vld [vmem:[%s5770_s6] sm:$0x1] }
 0x5b2   : > { %v3304_v13 = vadd.f32 1e-05, %v3303_v37 }
 0x5b4   : > { %3661 = vrsqrt.f32 %v3304_v13  ;;  %vm3311_vm14 = vweird.f32 %v3304_v13 }
 0x5ba   : > { %v3662_v17 = vpop.eup %3661 }
 0x5bb   : > { %v3306_v11 = vmul.f32 %v3662_v17, %v3304_v13  ;;  %vm3312_vm13 = vweird.f32 %v3662_v17 }
 0x5bc   : > { %vm3313_vm15 = vmor %vm3311_vm14, %vm3312_vm13 }
 0x5bd   : > { %v3307_v51 = vmul.f32 %v3662_v17, %v3306_v11  ;;  %v3667_v11 = vld [vmem:[%s3762_s29 + $0x20] sm:$0xff] }
 0x5bf   : > { %v3308_v54 = vmul.f32 0.5, %v3307_v51 }
 0x5c1   : > { %v3309_v19 = vsub.f32 1.5, %v3308_v54 }
 0x5c3   : > { %v3310_v23 = vmul.f32 %v3662_v17, %v3309_v19  ;;  %v3668_v19 = vld [vmem:[%s3762_s29 + $0x28] sm:$0xff] }
 0x5c5   : > { %v3314_v9 = vsel %vm3313_vm15, %v3662_v17, %v3310_v23 }
 0x5c6   : > { %v3315_v55 = vmul.f32 %v3314_v9, %v3098_v29  ;;  %v3669_v9 = vld [vmem:[%s3762_s29 + $0x30] sm:$0xff] }
 0x5c8   : > { %v3316_v63 = vmul.f32 %v3315_v55, %v5452_v12  ;;  %v5558_v14 = vperm.slane %v3315_v55, 0 }
 0x5ca   : > { %v3317_v59 = vsub.f32 %v3099_v1, %v3316_v63  ;;  %v3319_v3 = vmul.f32 %v5558_v14, %v5276_v34  ;;  %v3320_v33 = vmul.f32 %v5558_v14, %v5280_v22  ;;  %v3321_v12 = vmul.f32 %v5558_v14, %v5286_v58  ;;  %v3670_v1 = vld [vmem:[%s3762_s29 + $0x38] sm:$0xff] }
 0x5cb   : > { %v3322_v45 = vmul.f32 %v5558_v14, %v5290_v41  ;;  %v3323_v32 = vmul.f32 %v5558_v14, %v5296_v6  ;;  %v3324_v22 = vmul.f32 %v5558_v14, %v5300_v21  ;;  %v3325_v58 = vmul.f32 %v5558_v14, %v5306_v43 }
 0x5cc   : > { %v5560_v48 = vperm.slane %v3317_v59, 0  ;;  %v3326_v6 = vmul.f32 %v5558_v14, %v5310_v0  ;;  %v3327_v21 = vmul.f32 %v5558_v14, %v5316_v28  ;;  %v3328_v0 = vmul.f32 %v5558_v14, %v5320_v57  ;;  %v3666_v28 = vld [vmem:[%s3762_s29 + $0x18] sm:$0xff] }
 0x5cd   : > { %v3329_v13 = vmul.f32 %v5558_v14, %v5326_v35  ;;  %v3330_v57 = vmul.f32 %v5558_v14, %v5330_v50  ;;  %v3331_v35 = vmul.f32 %v5558_v14, %v5336_v8  ;;  %v3332_v50 = vmul.f32 %v5558_v14, %v5340_v27 }
 0x5ce   : > { %v3354_v47 = vadd.f32 %v5560_v48, %v3319_v3  ;;  %v3355_v44 = vadd.f32 %v5560_v48, %v3320_v33  ;;  %v3356_v34 = vadd.f32 %v5560_v48, %v3321_v12  ;;  %v3357_v30 = vadd.f32 %v5560_v48, %v3322_v45  ;;  %v3671_v33 = vld [vmem:[%s3762_s29 + $0x40] sm:$0xff] }
 0x5cf   : > { %v3358_v41 = vadd.f32 %v5560_v48, %v3323_v32  ;;  %v3359_v61 = vadd.f32 %v5560_v48, %v3324_v22  ;;  %v3360_v43 = vadd.f32 %v5560_v48, %v3325_v58  ;;  %v3361_v53 = vadd.f32 %v5560_v48, %v3326_v6  ;;  %v3672_v32 = vld [vmem:[%s3762_s29 + $0x48] sm:$0xff]  ;;  %v3674_v58 = vld [vmem:[%s3762_s29 + $0x58] sm:$0xff] }
 0x5d0   : > { %v3386_v16 = vadd.f32 %v3663_v15, %v3354_v47  ;;  %v3387_v10 = vadd.f32 %v3664_v25, %v3355_v44  ;;  %v3388_v60 = vadd.f32 %v3665_v62, %v3356_v34  ;;  %v3389_v37 = vadd.f32 %v3666_v28, %v3357_v30  ;;  %v3673_v34 = vld [vmem:[%s3762_s29 + $0x50] sm:$0xff]  ;;  %v3676_v15 = vld [vmem:[%s3762_s29 + $0x68] sm:$0xff] }
 0x5d1   : > { %v3362_v17 = vadd.f32 %v5560_v48, %v3327_v21  ;;  %v3390_v51 = vadd.f32 %v3667_v11, %v3358_v41  ;;  %v3363_v54 = vadd.f32 %v5560_v48, %v3328_v0  ;;  %v3391_v23 = vadd.f32 %v3668_v19, %v3359_v61  ;;  %v3675_v21 = vld [vmem:[%s3762_s29 + $0x60] sm:$0xff]  ;;  %v3678_v0 = vld [vmem:[%s3762_s29 + $0x78] sm:$0xff]  ;;  %v3680_v11 = vld [vmem:[%s3762_s29 + $0x88] sm:$0xff] }
 0x5d2   : > { %3418 = vst.msk [vmem:[%s5586_s27] sm:$0xff] %vm1102_vm6, %v3386_v16  ;;  %v3364_v29 = vadd.f32 %v5560_v48, %v3329_v13  ;;  %v3392_v55 = vadd.f32 %v3669_v9, %v3360_v43  ;;  %v3365_v63 = vadd.f32 %v5560_v48, %v3330_v57  ;;  %v3393_v59 = vadd.f32 %v3670_v1, %v3361_v53  ;;  %v3684_v1 = vld [vmem:[%s3762_s29 + $0xa8] sm:$0xff] }
 0x5d3   : > { %3419 = vst.msk [vmem:[%s5586_s27 + $0x8] sm:$0xff] %vm1102_vm6, %v3387_v10  ;;  %v3333_v8 = vmul.f32 %v5558_v14, %v5343_v20  ;;  %v3366_v3 = vadd.f32 %v5560_v48, %v3331_v35  ;;  %v3394_v12 = vadd.f32 %v3671_v33, %v3362_v17  ;;  %v3334_v27 = vmul.f32 %v5558_v14, %v5347_v38  ;;  %v3677_v10 = vld [vmem:[%s3762_s29 + $0x70] sm:$0xff]  ;;  %v3682_v35 = vld [vmem:[%s3762_s29 + $0x98] sm:$0xff] }
 0x5d4   : > { %3420 = vst.msk [vmem:[%s5586_s27 + $0x10] sm:$0xff] %vm1102_vm6, %v3388_v60  ;;  %v3367_v45 = vadd.f32 %v5560_v48, %v3332_v50  ;;  %v3395_v47 = vadd.f32 %v3672_v32, %v3363_v54  ;;  %v3335_v20 = vmul.f32 %v5558_v14, %v5349_v40  ;;  %v3396_v22 = vadd.f32 %v3673_v34, %v3364_v29  ;;  %v3681_v54 = vld [vmem:[%s3762_s29 + $0x90] sm:$0xff]  ;;  %v3688_v34 = vld [vmem:[%s3762_s29 + $0xc8] sm:$0xff] }
 0x5d5   : > { %3421 = vst.msk [vmem:[%s5586_s27 + $0x18] sm:$0xff] %vm1102_vm6, %v3389_v37  ;;  %v3368_v44 = vadd.f32 %v5560_v48, %v3333_v8  ;;  %v3336_v38 = vmul.f32 %v5558_v14, %v5351_v42  ;;  %v3369_v30 = vadd.f32 %v5560_v48, %v3334_v27  ;;  %v3397_v41 = vadd.f32 %v3674_v58, %v3365_v63  ;;  %v3679_v37 = vld [vmem:[%s3762_s29 + $0x80] sm:$0xff]  ;;  %v3686_v27 = vld [vmem:[%s3762_s29 + $0xb8] sm:$0xff] }
 0x5d6   : > { %3422 = vst.msk [vmem:[%s5586_s27 + $0x20] sm:$0xff] %vm1102_vm6, %v3390_v51  ;;  %v3337_v40 = vmul.f32 %v5558_v14, %v5353_v7  ;;  %v3370_v6 = vadd.f32 %v5560_v48, %v3335_v20  ;;  %v3398_v61 = vadd.f32 %v3675_v21, %v3366_v3  ;;  %v3338_v42 = vmul.f32 %v5558_v14, %v5355_v36  ;;  %v3685_v3 = vld [vmem:[%s3762_s29 + $0xb0] sm:$0xff] }
 0x5d7   : > { %3423 = vst.msk [vmem:[%s5586_s27 + $0x28] sm:$0xff] %vm1102_vm6, %v3391_v23  ;;  %v3371_v43 = vadd.f32 %v5560_v48, %v3336_v38  ;;  %v3399_v16 = vadd.f32 %v3676_v15, %v3367_v45  ;;  %v3339_v7 = vmul.f32 %v5558_v14, %v5357_v5  ;;  %v3400_v62 = vadd.f32 %v3677_v10, %v3368_v44  ;;  %v3689_v38 = vld [vmem:[%s3762_s29 + $0xd0] sm:$0xff] }
 0x5d8   : > { %3424 = vst.msk [vmem:[%s5586_s27 + $0x30] sm:$0xff] %vm1102_vm6, %v3392_v55  ;;  %v3372_v25 = vadd.f32 %v5560_v48, %v3337_v40  ;;  %v3340_v36 = vmul.f32 %v5558_v14, %v5403_v46  ;;  %v3373_v60 = vadd.f32 %v5560_v48, %v3338_v42  ;;  %v3401_v53 = vadd.f32 %v3678_v0, %v3369_v30  ;;  %v3683_v55 = vld [vmem:[%s3762_s29 + $0xa0] sm:$0xff] }
 0x5d9   : > { %3425 = vst.msk [vmem:[%s5586_s27 + $0x38] sm:$0xff] %vm1102_vm6, %v3393_v59  ;;  %v3341_v5 = vmul.f32 %v5558_v14, %v5407_v52  ;;  %v3374_v28 = vadd.f32 %v5560_v48, %v3339_v7  ;;  %v3402_v13 = vadd.f32 %v3679_v37, %v3370_v6  ;;  %v3342_v46 = vmul.f32 %v5558_v14, %v5412_v56  ;;  %v3692_v6 = vld [vmem:[%s3762_s29 + $0xe8] sm:$0xff] }
 0x5da   : > { %3426 = vst.msk [vmem:[%s5586_s27 + $0x40] sm:$0xff] %vm1102_vm6, %v3394_v12  ;;  %v3375_v17 = vadd.f32 %v5560_v48, %v3340_v36  ;;  %v3403_v51 = vadd.f32 %v3680_v11, %v3371_v43  ;;  %v3343_v52 = vmul.f32 %v5558_v14, %v5417_v26  ;;  %v3404_v19 = vadd.f32 %v3681_v54, %v3372_v25 }
 0x5db   : > { %3427 = vst.msk [vmem:[%s5586_s27 + $0x48] sm:$0xff] %vm1102_vm6, %v3395_v47  ;;  %v3376_v57 = vadd.f32 %v5560_v48, %v3341_v5  ;;  %v3344_v56 = vmul.f32 %v5558_v14, %v5421_v2  ;;  %v3377_v23 = vadd.f32 %v5560_v48, %v3342_v46  ;;  %v3405_v29 = vadd.f32 %v3682_v35, %v3373_v60  ;;  %v3687_v47 = vld [vmem:[%s3762_s29 + $0xc0] sm:$0xff] }
 0x5dc   : > { %3428 = vst.msk [vmem:[%s5586_s27 + $0x50] sm:$0xff] %vm1102_vm6, %v3396_v22  ;;  %v3345_v26 = vmul.f32 %v5558_v14, %v5425_v39  ;;  %v3378_v9 = vadd.f32 %v5560_v48, %v3343_v52  ;;  %v3406_v50 = vadd.f32 %v3683_v55, %v3374_v28  ;;  %v3346_v2 = vmul.f32 %v5558_v14, %v5429_v18 }
 0x5dd   : > { %3429 = vst.msk [vmem:[%s5586_s27 + $0x58] sm:$0xff] %vm1102_vm6, %v3397_v41  ;;  %v3379_v63 = vadd.f32 %v5560_v48, %v3344_v56  ;;  %v3407_v59 = vadd.f32 %v3684_v1, %v3375_v17  ;;  %v3347_v39 = vmul.f32 %v5558_v14, %v5433_v31  ;;  %v3408_v33 = vadd.f32 %v3685_v3, %v3376_v57  ;;  %v3691_v41 = vld [vmem:[%s3762_s29 + $0xe0] sm:$0xff] }
 0x5de   : > { %3430 = vst.msk [vmem:[%s5586_s27 + $0x60] sm:$0xff] %vm1102_vm6, %v3398_v61  ;;  %v3380_v8 = vadd.f32 %v5560_v48, %v3345_v26  ;;  %v3348_v18 = vmul.f32 %v5558_v14, %v5437_v49  ;;  %v3381_v12 = vadd.f32 %v5560_v48, %v3346_v2  ;;  %v3409_v45 = vadd.f32 %v3686_v27, %v3377_v23  ;;  %v3693_v61 = vld [vmem:[%s3762_s29 + $0xf0] sm:$0xff] }
 0x5df   : > { %3431 = vst.msk [vmem:[%s5586_s27 + $0x68] sm:$0xff] %vm1102_vm6, %v3399_v16  ;;  %v3349_v31 = vmul.f32 %v5558_v14, %v5441_v4  ;;  %v3382_v32 = vadd.f32 %v5560_v48, %v3347_v39  ;;  %v3410_v20 = vadd.f32 %v3687_v47, %v3378_v9  ;;  %v3350_v49 = vmul.f32 %v5558_v14, %v5447_v24  ;;  %v3690_v14 = vld [vmem:[%s3762_s29 + $0xd8] sm:$0xff] }
 0x5e0   : > { %3432 = vst.msk [vmem:[%s5586_s27 + $0x70] sm:$0xff] %vm1102_vm6, %v3400_v62  ;;  %v3383_v44 = vadd.f32 %v5560_v48, %v3348_v18  ;;  %v3411_v22 = vadd.f32 %v3688_v34, %v3379_v63  ;;  %v3412_v30 = vadd.f32 %v3689_v38, %v3380_v8  ;;  %v3413_v58 = vadd.f32 %v3690_v14, %v3381_v12 }
 0x5e1   : > { %3433 = vst.msk [vmem:[%s5586_s27 + $0x78] sm:$0xff] %vm1102_vm6, %v3401_v53  ;;  %v3384_v4 = vadd.f32 %v5560_v48, %v3349_v31  ;;  %v3385_v24 = vadd.f32 %v5560_v48, %v3350_v49  ;;  %v3414_v40 = vadd.f32 %v3691_v41, %v3382_v32  ;;  %v3694_v48 = vld [vmem:[%s3762_s29 + $0xf8] sm:$0xff] }
 0x5e2   : > { %3434 = vst.msk [vmem:[%s5586_s27 + $0x80] sm:$0xff] %vm1102_vm6, %v3402_v13  ;;  %v3415_v21 = vadd.f32 %v3692_v6, %v3383_v44 }
 0x5e3   : > { %3435 = vst.msk [vmem:[%s5586_s27 + $0x88] sm:$0xff] %vm1102_vm6, %v3403_v51  ;;  %v3416_v42 = vadd.f32 %v3693_v61, %v3384_v4  ;;  %v3417_v43 = vadd.f32 %v3694_v48, %v3385_v24 }
 0x5e4   : > { %3436 = vst.msk [vmem:[%s5586_s27 + $0x90] sm:$0xff] %vm1102_vm6, %v3404_v19 }
 0x5e5   : > { %3437 = vst.msk [vmem:[%s5586_s27 + $0x98] sm:$0xff] %vm1102_vm6, %v3405_v29 }
 0x5e6   : > { %3438 = vst.msk [vmem:[%s5586_s27 + $0xa0] sm:$0xff] %vm1102_vm6, %v3406_v50 }
 0x5e7   : > { %3439 = vst.msk [vmem:[%s5586_s27 + $0xa8] sm:$0xff] %vm1102_vm6, %v3407_v59 }
 0x5e8   : > { %3440 = vst.msk [vmem:[%s5586_s27 + $0xb0] sm:$0xff] %vm1102_vm6, %v3408_v33 }
 0x5e9   : > { %3441 = vst.msk [vmem:[%s5586_s27 + $0xb8] sm:$0xff] %vm1102_vm6, %v3409_v45 }
 0x5ea   : > { %3442 = vst.msk [vmem:[%s5586_s27 + $0xc0] sm:$0xff] %vm1102_vm6, %v3410_v20 }
 0x5eb   : > { %3443 = vst.msk [vmem:[%s5586_s27 + $0xc8] sm:$0xff] %vm1102_vm6, %v3411_v22 }
 0x5ec   : > { %3444 = vst.msk [vmem:[%s5586_s27 + $0xd0] sm:$0xff] %vm1102_vm6, %v3412_v30 }
 0x5ed   : > { %3445 = vst.msk [vmem:[%s5586_s27 + $0xd8] sm:$0xff] %vm1102_vm6, %v3413_v58 }
 0x5ee   : > { %3446 = vst.msk [vmem:[%s5586_s27 + $0xe0] sm:$0xff] %vm1102_vm6, %v3414_v40 }
 0x5ef   : > { %3447 = vst.msk [vmem:[%s5586_s27 + $0xe8] sm:$0xff] %vm1102_vm6, %v3415_v21 }
 0x5f0   : > { %3448 = vst.msk [vmem:[%s5586_s27 + $0xf0] sm:$0xff] %vm1102_vm6, %v3416_v42 }
 0x5f1   : > { %3449 = vst.msk [vmem:[%s5586_s27 + $0xf8] sm:$0xff] %vm1102_vm6, %v3417_v43 }
 0x5f2 PF: > { %s17_s24 = sadd.s32 1, %s3701_s24  }
 0x5f3   : > { %p14_p4 = scmp.ge.s32.totalorder %s17_s24, 4  }
 0x5f5   :  { %16 = sbr.rel (!%p14_p4) target bundleno = 1 (0x1), region = 78 }

</bundles_post_ra>
